<compile_context>
chip_gen: v5e
topology: v5e:2x2
jax: 0.10.0
libtpu: 0.0.40
codegen_flags: <defaults>
</compile_context>

<pallas_src>
import functools
import math

import jax
import jax.numpy as jnp
from jax.experimental import pallas as pl
from jax.experimental.pallas import tpu as pltpu


# ----------------------------------------------------------------------------
# Single-shot matmul kernel (used once, for the attention memory projection)
# ----------------------------------------------------------------------------

def _matmul_kernel(x_ref, w_ref, o_ref):
    o_ref[...] = jnp.dot(x_ref[...], w_ref[...],
                         preferred_element_type=jnp.float32).astype(o_ref.dtype)


def dense(x, w):
    M, K = x.shape
    N = w.shape[1]
    return pl.pallas_call(
        _matmul_kernel,
        out_shape=jax.ShapeDtypeStruct((M, N), jnp.float32),
        grid=(1,),
        in_specs=[pl.BlockSpec((M, K), lambda i: (0, 0)),
                  pl.BlockSpec((K, N), lambda i: (0, 0))],
        out_specs=pl.BlockSpec((M, N), lambda i: (0, 0)),
    )(x, w)


# ----------------------------------------------------------------------------
# Conv1d + (folded eval-mode BatchNorm) + activation, as K shifted matmuls
# ----------------------------------------------------------------------------

def _conv1d_kernel(x_ref, w_ref, shift_ref, o_ref, *, K, T, activation):
    x = x_ref[0]                                            # (T + K - 1, Cin)
    acc = jnp.zeros(o_ref.shape[1:], jnp.float32) + shift_ref[...]
    for k in range(K):                                      # K shifted MXU matmuls
        acc = acc + jnp.dot(x[k:k + T, :], w_ref[k],
                            preferred_element_type=jnp.float32)
    if activation == "relu":
        acc = jnp.maximum(acc, 0.0)
    elif activation == "tanh":
        acc = jnp.tanh(acc)
    o_ref[0] = acc.astype(o_ref.dtype)


def conv1d_bn(x, w_eff, shift, activation="none"):
    """x: (B, T, Cin); w_eff: (K, Cin, Cout) with BN scale folded; shift: (1, Cout)."""
    B, T, Cin = x.shape
    K, _, Cout = w_eff.shape
    pad = (K - 1) // 2
    xp = jnp.pad(x, ((0, 0), (pad, pad), (0, 0)))           # (B, T + 2*pad, Cin)
    Tp = T + 2 * pad
    return pl.pallas_call(
        functools.partial(_conv1d_kernel, K=K, T=T, activation=activation),
        out_shape=jax.ShapeDtypeStruct((B, T, Cout), jnp.float32),
        grid=(B,),
        in_specs=[pl.BlockSpec((1, Tp, Cin), lambda b: (b, 0, 0)),
                  pl.BlockSpec((K, Cin, Cout), lambda b: (0, 0, 0)),
                  pl.BlockSpec((1, Cout), lambda b: (0, 0))],
        out_specs=pl.BlockSpec((1, T, Cout), lambda b: (b, 0, 0)),
        compiler_params=pltpu.CompilerParams(dimension_semantics=("parallel",)),
    )(xp, w_eff, shift)


# ----------------------------------------------------------------------------
# Encoder bidirectional LSTM: single fused recurrent kernel, grid over time
# ----------------------------------------------------------------------------

def _lstm_update(xh, c, w_ref, b_ref):
    H = c.shape[-1]
    gates = jnp.dot(xh, w_ref[...], preferred_element_type=jnp.float32) + b_ref[...]
    i = jax.nn.sigmoid(gates[:, 0 * H:1 * H])
    f = jax.nn.sigmoid(gates[:, 1 * H:2 * H])
    g = jnp.tanh(gates[:, 2 * H:3 * H])
    o = jax.nn.sigmoid(gates[:, 3 * H:4 * H])
    c_new = f * c + i * g
    h_new = o * jnp.tanh(c_new)
    return h_new, c_new


def _bilstm_kernel(xf_ref, xb_ref, wf_ref, bf_ref, wb_ref, bb_ref,
                   of_ref, ob_ref, hf, cf, hb, cb):
    @pl.when(pl.program_id(0) == 0)
    def _():
        hf[...] = jnp.zeros_like(hf)
        cf[...] = jnp.zeros_like(cf)
        hb[...] = jnp.zeros_like(hb)
        cb[...] = jnp.zeros_like(cb)

    h_new, c_new = _lstm_update(
        jnp.concatenate([xf_ref[0], hf[...]], axis=-1), cf[...], wf_ref, bf_ref)
    hf[...] = h_new
    cf[...] = c_new
    of_ref[0] = h_new

    h_new, c_new = _lstm_update(
        jnp.concatenate([xb_ref[0], hb[...]], axis=-1), cb[...], wb_ref, bb_ref)
    hb[...] = h_new
    cb[...] = c_new
    ob_ref[0] = h_new


def bilstm_encoder(x, wf, bf, wb, bb, Hb):
    """x: (B, T, C) -> (B, T, 2*Hb).  One pallas_call; weights/state stay in VMEM."""
    B, T, C = x.shape
    x_t = jnp.transpose(x, (1, 0, 2))                       # (T, B, C)
    out_f, out_b = pl.pallas_call(
        _bilstm_kernel,
        out_shape=(jax.ShapeDtypeStruct((T, B, Hb), jnp.float32),
                   jax.ShapeDtypeStruct((T, B, Hb), jnp.float32)),
        grid=(T,),
        in_specs=[
            pl.BlockSpec((1, B, C), lambda t: (t, 0, 0)),
            pl.BlockSpec((1, B, C), lambda t: (T - 1 - t, 0, 0)),
            pl.BlockSpec((C + Hb, 4 * Hb), lambda t: (0, 0)),
            pl.BlockSpec((1, 4 * Hb), lambda t: (0, 0)),
            pl.BlockSpec((C + Hb, 4 * Hb), lambda t: (0, 0)),
            pl.BlockSpec((1, 4 * Hb), lambda t: (0, 0)),
        ],
        out_specs=(pl.BlockSpec((1, B, Hb), lambda t: (t, 0, 0)),
                   pl.BlockSpec((1, B, Hb), lambda t: (T - 1 - t, 0, 0))),
        scratch_shapes=[pltpu.VMEM((B, Hb), jnp.float32)] * 4,
        compiler_params=pltpu.CompilerParams(dimension_semantics=("arbitrary",)),
    )(x_t, x_t, wf, bf, wb, bb)
    return jnp.transpose(jnp.concatenate([out_f, out_b], axis=-1), (1, 0, 2))


# ----------------------------------------------------------------------------
# Decoder: one fused kernel per forward pass, grid over decoder steps
# ----------------------------------------------------------------------------

def make_decoder_kernel(*, n_pre, T_enc, A, r, mel_dim, kloc):
    pad = (kloc - 1) // 2

    def kernel(*refs):
        it = iter(refs)
        prev_ref = next(it); mem_ref = next(it); pm_ref = next(it); mask_ref = next(it)
        pre_w = [next(it) for _ in range(n_pre)]
        pre_b = [next(it) for _ in range(n_pre)]
        aw_x = next(it); aw_c = next(it); aw_h = next(it); a_b = next(it)
        q_w = next(it); loc_w = next(it); v_w = next(it)
        dw_a = next(it); dw_c = next(it); dw_h = next(it); d_b = next(it)
        pw_h = next(it); pw_c = next(it); p_b = next(it)
        mel_o = next(it); stop_o = next(it); align_o = next(it)
        s_ah = next(it); s_ac = next(it); s_dh = next(it); s_dc = next(it)
        s_ctx = next(it); s_cum = next(it)

        step = pl.program_id(0)

        @pl.when(step == 0)
        def _():
            s_ah[...] = jnp.zeros_like(s_ah)
            s_ac[...] = jnp.zeros_like(s_ac)
            s_dh[...] = jnp.zeros_like(s_dh)
            s_dc[...] = jnp.zeros_like(s_dc)
            s_ctx[...] = jnp.zeros_like(s_ctx)
            s_cum[...] = jnp.zeros_like(s_cum)

        # --- Prenet (dropout = identity in eval mode) ---
        x = prev_ref[0]                                                   # (B, mel_dim)
        for li in range(n_pre):
            x = jnp.maximum(
                jnp.dot(x, pre_w[li][...], preferred_element_type=jnp.float32)
                + pre_b[li][...], 0.0)
        B = x.shape[0]

        # --- Attention RNN: LSTMCell on [prenet_out, prev_context] (split weights) ---
        ctx = s_ctx[...]
        h_a_prev = s_ah[...]
        Ha = h_a_prev.shape[-1]
        gates = (jnp.dot(x, aw_x[...], preferred_element_type=jnp.float32)
                 + jnp.dot(ctx, aw_c[...], preferred_element_type=jnp.float32)
                 + jnp.dot(h_a_prev, aw_h[...], preferred_element_type=jnp.float32)
                 + a_b[...])
        i = jax.nn.sigmoid(gates[:, 0 * Ha:1 * Ha])
        f = jax.nn.sigmoid(gates[:, 1 * Ha:2 * Ha])
        g = jnp.tanh(gates[:, 2 * Ha:3 * Ha])
        o = jax.nn.sigmoid(gates[:, 3 * Ha:4 * Ha])
        c_a = f * s_ac[...] + i * g
        h_a = o * jnp.tanh(c_a)
        s_ah[...] = h_a
        s_ac[...] = c_a

        # --- Location-sensitive attention ---
        q = jnp.dot(h_a, q_w[...], preferred_element_type=jnp.float32)    # (B, A)
        cum = s_cum[...]                                                  # (B, T_enc)
        if pad > 0:
            zpad = jnp.zeros((B, pad), jnp.float32)
            cum_p = jnp.concatenate([zpad, cum, zpad], axis=1)
        else:
            cum_p = cum
        ploc = jnp.zeros((B, T_enc, A), jnp.float32)
        for k in range(kloc):   # loc-conv (1->filt) + linear (filt->A) folded in loc_w
            ploc = ploc + cum_p[:, k:k + T_enc, None] * loc_w[k][None, :, :]
        e = jnp.tanh(q[:, None, :] + pm_ref[...] + ploc)                  # (B, T_enc, A)
        scores = jnp.sum(e * v_w[...][None, :, :], axis=-1) + mask_ref[...]
        m = jnp.max(scores, axis=-1, keepdims=True)
        ex = jnp.exp(scores - m)
        align = ex / jnp.sum(ex, axis=-1, keepdims=True)                  # (B, T_enc)
        ctx = jnp.sum(align[:, :, None] * mem_ref[...], axis=1)           # (B, E)
        s_ctx[...] = ctx
        s_cum[...] = cum + align

        # --- Decoder RNN: LSTMCell on [attn_h, context] (split weights) ---
        h_d_prev = s_dh[...]
        Hd = h_d_prev.shape[-1]
        gates = (jnp.dot(h_a, dw_a[...], preferred_element_type=jnp.float32)
                 + jnp.dot(ctx, dw_c[...], preferred_element_type=jnp.float32)
                 + jnp.dot(h_d_prev, dw_h[...], preferred_element_type=jnp.float32)
                 + d_b[...])
        i = jax.nn.sigmoid(gates[:, 0 * Hd:1 * Hd])
        f = jax.nn.sigmoid(gates[:, 1 * Hd:2 * Hd])
        g = jnp.tanh(gates[:, 2 * Hd:3 * Hd])
        o = jax.nn.sigmoid(gates[:, 3 * Hd:4 * Hd])
        c_d = f * s_dc[...] + i * g
        h_d = o * jnp.tanh(c_d)
        s_dh[...] = h_d
        s_dc[...] = c_d

        # --- Fused mel + stop projection on [dec_h, context] ---
        proj = (jnp.dot(h_d, pw_h[...], preferred_element_type=jnp.float32)
                + jnp.dot(ctx, pw_c[...], preferred_element_type=jnp.float32)
                + p_b[...])                                               # (B, r*mel + 1)
        mel_o[0] = proj[:, :r * mel_dim]
        stop_o[0] = jax.nn.sigmoid(proj[:, r * mel_dim:])
        align_o[0] = align

    return kernel


def decoder(kp, enc, pm, mask_bias, mels, hp):
    B, T_enc, E = enc.shape
    mel_dim, r = hp["mel_dim"], hp["n_frames_per_step"]
    A = hp["attention_dim"]
    Ha, Hd = hp["attention_rnn_units"], hp["decoder_rnn_units"]
    kloc = hp["attention_location_kernel_size"]
    n_pre = len(hp["prenet_dims"])
    T_dec = mels.shape[1]
    n_steps = -(-T_dec // r)

    # Teacher forcing: frame fed at step s is mels[:, s*r - 1, :]  (zeros at s=0).
    inputs_t = jnp.transpose(mels, (1, 0, 2)).astype(jnp.float32)   # (T_dec, B, mel)
    zero0 = jnp.zeros((1, B, mel_dim), jnp.float32)
    if n_steps > 1:
        idx = jnp.arange(1, n_steps) * r - 1
        prev = jnp.concatenate([zero0, inputs_t[idx]], axis=0)      # (n_steps, B, mel)
    else:
        prev = zero0

    args = [prev, enc, pm, mask_bias]
    args += [kp[f"prenet{i}_w"] for i in range(n_pre)]
    args += [kp[f"prenet{i}_b"] for i in range(n_pre)]
    args += [kp["attn_w_x"], kp["attn_w_ctx"], kp["attn_w_h"], kp["attn_b"],
             kp["query_w"], kp["loc_w"], kp["v_w"],
             kp["dec_w_a"], kp["dec_w_ctx"], kp["dec_w_h"], kp["dec_b"],
             kp["proj_w_h"], kp["proj_w_ctx"], kp["proj_b"]]

    def stepped(shape):
        nd = len(shape)

        def imap(s):
            return (s,) + (0,) * (nd - 1)

        return pl.BlockSpec((1,) + tuple(shape[1:]), imap)

    def resident(a):
        nd = a.ndim

        def imap(s):
            return (0,) * nd

        return pl.BlockSpec(tuple(a.shape), imap)

    in_specs = [stepped(prev.shape)] + [resident(a) for a in args[1:]]

    out_shape = (jax.ShapeDtypeStruct((n_steps, B, r * mel_dim), jnp.float32),
                 jax.ShapeDtypeStruct((n_steps, B, 1), jnp.float32),
                 jax.ShapeDtypeStruct((n_steps, B, T_enc), jnp.float32))
    out_specs = (stepped((n_steps, B, r * mel_dim)),
                 stepped((n_steps, B, 1)),
                 stepped((n_steps, B, T_enc)))

    scratch = [pltpu.VMEM((B, Ha), jnp.float32), pltpu.VMEM((B, Ha), jnp.float32),
               pltpu.VMEM((B, Hd), jnp.float32), pltpu.VMEM((B, Hd), jnp.float32),
               pltpu.VMEM((B, E), jnp.float32), pltpu.VMEM((B, T_enc), jnp.float32)]

    kernel = make_decoder_kernel(n_pre=n_pre, T_enc=T_enc, A=A, r=r,
                                 mel_dim=mel_dim, kloc=kloc)

    mel_s, stop_s, align_s = pl.pallas_call(
        kernel,
        out_shape=out_shape,
        grid=(n_steps,),
        in_specs=in_specs,
        out_specs=out_specs,
        scratch_shapes=scratch,
        compiler_params=pltpu.CompilerParams(dimension_semantics=("arbitrary",)),
    )(*args)

    mel_outputs = jnp.transpose(mel_s, (1, 0, 2)).reshape(B, n_steps * r, mel_dim)
    stop_tokens = jnp.repeat(jnp.transpose(stop_s[:, :, 0], (1, 0)), r, axis=1)
    attn_scores = jnp.transpose(align_s, (1, 0, 2))
    return mel_outputs, stop_tokens, attn_scores


# ----------------------------------------------------------------------------
# Parameter initialization (deterministic, synthetic) + kernel-layout prep
# ----------------------------------------------------------------------------

class KeyGen:
    def __init__(self, key):
        self.key = key

    def __call__(self):
        self.key, k = jax.random.split(self.key)
        return k


def init_params(key, hp):
    kg = KeyGen(key)
    p = {}

    def unif(shape, bound):
        return jax.random.uniform(kg(), shape, minval=-bound, maxval=bound, dtype=jnp.float32)

    def linear(in_d, out_d, bias=True):
        bnd = 1.0 / math.sqrt(in_d)
        w = unif((in_d, out_d), bnd)
        b = unif((out_d,), bnd) if bias else None
        return w, b

    def conv_bn(name, cin, cout, k):
        bnd = 1.0 / math.sqrt(cin * k)
        p[f"{name}_w"] = unif((k, cin, cout), bnd)
        gamma = jnp.ones((cout,), jnp.float32)
        beta = jnp.zeros((cout,), jnp.float32)
        rmean = jnp.zeros((cout,), jnp.float32)
        rvar = jnp.ones((cout,), jnp.float32)
        eps = 1e-5
        sc = gamma / jnp.sqrt(rvar + eps)
        p[f"{name}_scale"] = sc
        p[f"{name}_shift"] = beta - rmean * sc

    def lstm(name, in_d, hdim):
        bnd = 1.0 / math.sqrt(hdim)
        p[f"{name}_wih"] = unif((in_d, 4 * hdim), bnd)
        p[f"{name}_whh"] = unif((hdim, 4 * hdim), bnd)
        p[f"{name}_b"] = unif((4 * hdim,), bnd) + unif((4 * hdim,), bnd)

    ns, ed = hp["num_symbols"], hp["text_embedding_dim"]
    std = math.sqrt(2.0 / (ns + ed))
    val = math.sqrt(3.0) * std
    p["embedding"] = jax.random.uniform(kg(), (ns, ed), minval=-val, maxval=val,
                                        dtype=jnp.float32)

    cin = ed
    for i in range(hp["encoder_num_convs"]):
        conv_bn(f"enc_conv{i}", cin, hp["encoder_conv_channels"],
                hp["encoder_conv_kernel_size"])
        cin = hp["encoder_conv_channels"]
    Hb = hp["encoder_blstm_units"] // 2
    lstm("enc_lstm_f", hp["encoder_conv_channels"], Hb)
    lstm("enc_lstm_b", hp["encoder_conv_channels"], Hb)

    E = hp["encoder_blstm_units"]
    A = hp["attention_dim"]
    p["memory_w"], _ = linear(E, A, bias=False)

    pd = hp["prenet_dims"]
    in_sizes = [hp["mel_dim"]] + pd[:-1]
    for li, (i_d, o_d) in enumerate(zip(in_sizes, pd)):
        p[f"prenet{li}_w"], p[f"prenet{li}_b"] = linear(i_d, o_d)

    lstm("attn_rnn", pd[-1] + E, hp["attention_rnn_units"])
    p["query_w"], _ = linear(hp["attention_rnn_units"], A, bias=False)
    filt, kloc = hp["attention_location_filters"], hp["attention_location_kernel_size"]
    p["loc_conv_w"] = unif((kloc, 1, filt), 1.0 / math.sqrt(kloc))
    p["loc_lin_w"], _ = linear(filt, A, bias=False)
    vw, _ = linear(A, 1, bias=False)
    p["v_w"] = vw.T  # (1, A)

    lstm("dec_rnn", hp["attention_rnn_units"] + E, hp["decoder_rnn_units"])
    p["mel_proj_w"], p["mel_proj_b"] = linear(hp["decoder_rnn_units"] + E,
                                              hp["mel_dim"] * hp["n_frames_per_step"])
    p["stop_proj_w"], p["stop_proj_b"] = linear(hp["decoder_rnn_units"] + E, 1)

    cin = hp["mel_dim"]
    chans = [hp["postnet_conv_channels"]] * (hp["postnet_num_convs"] - 1) + [hp["mel_dim"]]
    for i, cout in enumerate(chans):
        conv_bn(f"post_conv{i}", cin, cout, hp["postnet_conv_kernel_size"])
        cin = cout
    return p


def prepare_params(p, hp):
    """Fold / split / reshape raw params into the kernel-resident layout (done once)."""
    kp = {"embedding": p["embedding"]}

    def fold_conv(name):
        kp[f"{name}_w"] = p[f"{name}_w"] * p[f"{name}_scale"][None, None, :]
        kp[f"{name}_shift"] = p[f"{name}_shift"].reshape(1, -1)

    for i in range(hp["encoder_num_convs"]):
        fold_conv(f"enc_conv{i}")
    for i in range(hp["postnet_num_convs"]):
        fold_conv(f"post_conv{i}")

    for d in ("f", "b"):
        kp[f"enc_lstm_{d}_w"] = jnp.concatenate(
            [p[f"enc_lstm_{d}_wih"], p[f"enc_lstm_{d}_whh"]], axis=0)
        kp[f"enc_lstm_{d}_b"] = p[f"enc_lstm_{d}_b"].reshape(1, -1)

    kp["memory_w"] = p["memory_w"]

    for i in range(len(hp["prenet_dims"])):
        kp[f"prenet{i}_w"] = p[f"prenet{i}_w"]
        kp[f"prenet{i}_b"] = p[f"prenet{i}_b"].reshape(1, -1)

    P = hp["prenet_dims"][-1]
    Ha = hp["attention_rnn_units"]
    Hd = hp["decoder_rnn_units"]
    A = hp["attention_dim"]
    filt = hp["attention_location_filters"]
    kloc = hp["attention_location_kernel_size"]
    r = hp["n_frames_per_step"]
    mel_dim = hp["mel_dim"]

    # Attention RNN input [prenet_out | context]: split the input weight rows.
    kp["attn_w_x"] = p["attn_rnn_wih"][:P]
    kp["attn_w_ctx"] = p["attn_rnn_wih"][P:]
    kp["attn_w_h"] = p["attn_rnn_whh"]
    kp["attn_b"] = p["attn_rnn_b"].reshape(1, -1)

    kp["query_w"] = p["query_w"]
    # Location conv (1->filt) and linear (filt->A) are bias-free & linear: fold them.
    kp["loc_w"] = jnp.dot(p["loc_conv_w"].reshape(kloc, filt),
                          p["loc_lin_w"]).reshape(kloc, 1, A)
    kp["v_w"] = p["v_w"]                                     # (1, A)

    # Decoder RNN input [attn_h | context]: split rows.
    kp["dec_w_a"] = p["dec_rnn_wih"][:Ha]
    kp["dec_w_ctx"] = p["dec_rnn_wih"][Ha:]
    kp["dec_w_h"] = p["dec_rnn_whh"]
    kp["dec_b"] = p["dec_rnn_b"].reshape(1, -1)

    # mel + stop projections fused into one matmul; rows split for [dec_h | context].
    proj_w = jnp.concatenate([p["mel_proj_w"], p["stop_proj_w"]], axis=1)
    proj_b = jnp.concatenate([p["mel_proj_b"], p["stop_proj_b"]], axis=0)
    kp["proj_w_h"] = proj_w[:Hd]
    kp["proj_w_ctx"] = proj_w[Hd:]
    kp["proj_b"] = proj_b.reshape(1, r * mel_dim + 1)

    return kp


# ----------------------------------------------------------------------------
# Full forward pass
# ----------------------------------------------------------------------------

def tacotron2_forward(kp, text, text_lengths, mels, hp):
    B, T_enc = text.shape
    E = hp["encoder_blstm_units"]
    A = hp["attention_dim"]
    Hb = E // 2

    # Embedding (glue)
    x = jnp.take(kp["embedding"], text, axis=0)              # (B, T_enc, embed_dim)

    # Encoder: conv-BN-ReLU stack (fused conv kernels)
    h = x
    for i in range(hp["encoder_num_convs"]):
        h = conv1d_bn(h, kp[f"enc_conv{i}_w"], kp[f"enc_conv{i}_shift"], "relu")

    # Encoder: bidirectional LSTM (single fused recurrent kernel)
    enc = bilstm_encoder(h, kp["enc_lstm_f_w"], kp["enc_lstm_f_b"],
                         kp["enc_lstm_b_w"], kp["enc_lstm_b_b"], Hb)   # (B, T_enc, E)

    # Attention memory projection + memory-length mask
    pm = dense(enc.reshape(B * T_enc, E), kp["memory_w"]).reshape(B, T_enc, A)
    pos = jnp.arange(T_enc)[None, :]
    mask_bias = jnp.where(pos >= text_lengths[:, None], -1e9, 0.0).astype(jnp.float32)

    # Decoder (teacher forcing): one fused recurrent kernel over all steps
    mel_outputs, stop_tokens, attn_scores = decoder(kp, enc, pm, mask_bias, mels, hp)

    # Postnet
    hpn = mel_outputs
    n = hp["postnet_num_convs"]
    for i in range(n):
        act = "tanh" if i < n - 1 else "none"
        hpn = conv1d_bn(hpn, kp[f"post_conv{i}_w"], kp[f"post_conv{i}_shift"], act)
    mel_post = mel_outputs + hpn

    return mel_outputs, mel_post, stop_tokens, attn_scores


# ----------------------------------------------------------------------------
# Main
# ----------------------------------------------------------------------------

if __name__ == "__main__":
    hp = dict(
        num_symbols=20,
        text_embedding_dim=32,
        encoder_num_convs=3,
        encoder_conv_channels=32,
        encoder_conv_kernel_size=5,
        encoder_conv_dropout=0.5,
        encoder_blstm_units=32,
        mel_dim=8,
        n_frames_per_step=1,
        prenet_dims=[32, 16],
        prenet_dropout=0.5,
        attention_rnn_units=32,
        attention_dim=16,
        attention_location_filters=8,
        attention_location_kernel_size=5,
        attention_dropout=0.1,
        decoder_rnn_units=32,
        decoder_dropout=0.1,
        max_decoder_steps=1000,
        stop_threshold=0.5,
        postnet_num_convs=5,
        postnet_conv_channels=32,
        postnet_conv_kernel_size=5,
        postnet_conv_dropout=0.5,
    )

    root = jax.random.PRNGKey(0)
    k_params, k_text, k_mel = jax.random.split(root, 3)

    raw_params = init_params(k_params, hp)
    kparams = prepare_params(raw_params, hp)

    B, T_enc, T_dec = 2, 8, 6
    text = jax.random.randint(k_text, (B, T_enc), 0, hp["num_symbols"], dtype=jnp.int32)
    text_lengths = jnp.array([8, 6], dtype=jnp.int32)
    mels = jax.random.normal(k_mel, (B, T_dec, hp["mel_dim"]), dtype=jnp.float32)

    fwd = jax.jit(functools.partial(tacotron2_forward, hp=hp))
    mel_outputs, mel_post, stop_tokens, alignments = fwd(kparams, text, text_lengths, mels)
    jax.block_until_ready((mel_outputs, mel_post, stop_tokens, alignments))

    assert mel_outputs.shape == (B, T_dec, hp["mel_dim"])
    assert mel_post.shape == (B, T_dec, hp["mel_dim"])
    assert stop_tokens.shape == (B, T_dec)
    assert alignments.shape == (B, T_dec, T_enc)
    print("KERNEL_OK")
</pallas_src>

<mosaic_0001>
module attributes {stable_mosaic.version = 11 : i64} {
  func.func @_conv1d_kernel(%arg0: i32, %arg1: memref<1x12x32xf32, #tpu.memory_space<vmem>>, %arg2: memref<5x32x32xf32, #tpu.memory_space<vmem>>, %arg3: memref<1x32xf32, #tpu.memory_space<vmem>>, %arg4: memref<1x8x32xf32, #tpu.memory_space<vmem>>) attributes {dimension_semantics = [#tpu.dimension_semantics<parallel>], iteration_bounds = array<i64: 2>, scalar_prefetch = 0 : i64, scratch_operands = 0 : i64, tpu.core_type = #tpu.core_type<tc>, window_params = [{transform_indices = @transform_0, window_bounds = array<i64: 1, 12, 32>}, {pipeline_mode = #tpu.pipeline_mode<synchronous>, transform_indices = @transform_1, window_bounds = array<i64: 5, 32, 32>}, {pipeline_mode = #tpu.pipeline_mode<synchronous>, transform_indices = @transform_2, window_bounds = array<i64: 1, 32>}, {transform_indices = @transform_3, window_bounds = array<i64: 1, 8, 32>}]} {
    %c0 = arith.constant 0 : index
    %c0_0 = arith.constant 0 : index
    %c0_1 = arith.constant 0 : index
    %0 = vector.load %arg1[%c0, %c0_0, %c0_1] : memref<1x12x32xf32, #tpu.memory_space<vmem>>, vector<1x12x32xf32>
    %1 = vector.shape_cast %0 : vector<1x12x32xf32> to vector<12x32xf32>
    %cst = arith.constant 0.000000e+00 : f32
    %2 = vector.broadcast %cst : f32 to vector<8x32xf32>
    %c0_2 = arith.constant 0 : index
    %c0_3 = arith.constant 0 : index
    %3 = vector.load %arg3[%c0_2, %c0_3] : memref<1x32xf32, #tpu.memory_space<vmem>>, vector<1x32xf32>
    %4 = vector.broadcast %3 : vector<1x32xf32> to vector<8x32xf32>
    %5 = arith.addf %2, %4 : vector<8x32xf32>
    %6 = vector.extract_strided_slice %1 {offsets = [0, 0], sizes = [8, 32], strides = [1, 1]} : vector<12x32xf32> to vector<8x32xf32>
    %c0_4 = arith.constant 0 : index
    %c0_5 = arith.constant 0 : index
    %c0_6 = arith.constant 0 : index
    %7 = vector.load %arg2[%c0_4, %c0_5, %c0_6] : memref<5x32x32xf32, #tpu.memory_space<vmem>>, vector<1x32x32xf32>
    %8 = vector.shape_cast %7 : vector<1x32x32xf32> to vector<32x32xf32>
    %cst_7 = arith.constant dense<0.000000e+00> : vector<8x32xf32>
    %9 = tpu.matmul %6, %8, %cst_7 {dimension_numbers = #tpu.dot_dimension_numbers<[1], [0], [0], [1], [0, 0, 1, 1], [], []>} : vector<8x32xf32>, vector<32x32xf32>, vector<8x32xf32> -> vector<8x32xf32>
    %10 = arith.addf %5, %9 : vector<8x32xf32>
    %11 = vector.extract_strided_slice %1 {offsets = [1, 0], sizes = [8, 32], strides = [1, 1]} : vector<12x32xf32> to vector<8x32xf32>
    %c1 = arith.constant 1 : index
    %c0_8 = arith.constant 0 : index
    %c0_9 = arith.constant 0 : index
    %12 = vector.load %arg2[%c1, %c0_8, %c0_9] : memref<5x32x32xf32, #tpu.memory_space<vmem>>, vector<1x32x32xf32>
    %13 = vector.shape_cast %12 : vector<1x32x32xf32> to vector<32x32xf32>
    %cst_10 = arith.constant dense<0.000000e+00> : vector<8x32xf32>
    %14 = tpu.matmul %11, %13, %cst_10 {dimension_numbers = #tpu.dot_dimension_numbers<[1], [0], [0], [1], [0, 0, 1, 1], [], []>} : vector<8x32xf32>, vector<32x32xf32>, vector<8x32xf32> -> vector<8x32xf32>
    %15 = arith.addf %10, %14 : vector<8x32xf32>
    %16 = vector.extract_strided_slice %1 {offsets = [2, 0], sizes = [8, 32], strides = [1, 1]} : vector<12x32xf32> to vector<8x32xf32>
    %c2 = arith.constant 2 : index
    %c0_11 = arith.constant 0 : index
    %c0_12 = arith.constant 0 : index
    %17 = vector.load %arg2[%c2, %c0_11, %c0_12] : memref<5x32x32xf32, #tpu.memory_space<vmem>>, vector<1x32x32xf32>
    %18 = vector.shape_cast %17 : vector<1x32x32xf32> to vector<32x32xf32>
    %cst_13 = arith.constant dense<0.000000e+00> : vector<8x32xf32>
    %19 = tpu.matmul %16, %18, %cst_13 {dimension_numbers = #tpu.dot_dimension_numbers<[1], [0], [0], [1], [0, 0, 1, 1], [], []>} : vector<8x32xf32>, vector<32x32xf32>, vector<8x32xf32> -> vector<8x32xf32>
    %20 = arith.addf %15, %19 : vector<8x32xf32>
    %21 = vector.extract_strided_slice %1 {offsets = [3, 0], sizes = [8, 32], strides = [1, 1]} : vector<12x32xf32> to vector<8x32xf32>
    %c3 = arith.constant 3 : index
    %c0_14 = arith.constant 0 : index
    %c0_15 = arith.constant 0 : index
    %22 = vector.load %arg2[%c3, %c0_14, %c0_15] : memref<5x32x32xf32, #tpu.memory_space<vmem>>, vector<1x32x32xf32>
    %23 = vector.shape_cast %22 : vector<1x32x32xf32> to vector<32x32xf32>
    %cst_16 = arith.constant dense<0.000000e+00> : vector<8x32xf32>
    %24 = tpu.matmul %21, %23, %cst_16 {dimension_numbers = #tpu.dot_dimension_numbers<[1], [0], [0], [1], [0, 0, 1, 1], [], []>} : vector<8x32xf32>, vector<32x32xf32>, vector<8x32xf32> -> vector<8x32xf32>
    %25 = arith.addf %20, %24 : vector<8x32xf32>
    %26 = vector.extract_strided_slice %1 {offsets = [4, 0], sizes = [8, 32], strides = [1, 1]} : vector<12x32xf32> to vector<8x32xf32>
    %c4 = arith.constant 4 : index
    %c0_17 = arith.constant 0 : index
    %c0_18 = arith.constant 0 : index
    %27 = vector.load %arg2[%c4, %c0_17, %c0_18] : memref<5x32x32xf32, #tpu.memory_space<vmem>>, vector<1x32x32xf32>
    %28 = vector.shape_cast %27 : vector<1x32x32xf32> to vector<32x32xf32>
    %cst_19 = arith.constant dense<0.000000e+00> : vector<8x32xf32>
    %29 = tpu.matmul %26, %28, %cst_19 {dimension_numbers = #tpu.dot_dimension_numbers<[1], [0], [0], [1], [0, 0, 1, 1], [], []>} : vector<8x32xf32>, vector<32x32xf32>, vector<8x32xf32> -> vector<8x32xf32>
    %30 = arith.addf %25, %29 : vector<8x32xf32>
    %cst_20 = arith.constant 0.000000e+00 : f32
    %31 = vector.broadcast %cst_20 : f32 to vector<8x32xf32>
    %32 = arith.maximumf %30, %31 : vector<8x32xf32>
    %c0_21 = arith.constant 0 : index
    %c0_22 = arith.constant 0 : index
    %c0_23 = arith.constant 0 : index
    %33 = vector.load %arg4[%c0_21, %c0_22, %c0_23] : memref<1x8x32xf32, #tpu.memory_space<vmem>>, vector<1x8x32xf32>
    %34 = vector.shape_cast %33 : vector<1x8x32xf32> to vector<8x32xf32>
    %35 = vector.shape_cast %32 : vector<8x32xf32> to vector<1x8x32xf32>
    tpu.vector_store %arg4[%c0_21, %c0_22, %c0_23], %35 {strides = array<i32>} : memref<1x8x32xf32, #tpu.memory_space<vmem>>, vector<1x8x32xf32>,
    return
  }
  func.func @transform_0(%arg0: i32) -> (i32, i32, i32) {
    %c0_i32 = arith.constant 0 : i32
    %c0_i32_0 = arith.constant 0 : i32
    %c0_i32_1 = arith.constant 0 : i32
    return %arg0, %c0_i32, %c0_i32_0 : i32, i32, i32
  }
  func.func @transform_1(%arg0: i32) -> (i32, i32, i32) {
    %c0_i32 = arith.constant 0 : i32
    %c0_i32_0 = arith.constant 0 : i32
    %c0_i32_1 = arith.constant 0 : i32
    %c0_i32_2 = arith.constant 0 : i32
    return %c0_i32, %c0_i32_0, %c0_i32_1 : i32, i32, i32
  }
  func.func @transform_2(%arg0: i32) -> (i32, i32) {
    %c0_i32 = arith.constant 0 : i32
    %c0_i32_0 = arith.constant 0 : i32
    %c0_i32_1 = arith.constant 0 : i32
    return %c0_i32, %c0_i32_0 : i32, i32
  }
  func.func @transform_3(%arg0: i32) -> (i32, i32, i32) {
    %c0_i32 = arith.constant 0 : i32
    %c0_i32_0 = arith.constant 0 : i32
    %c0_i32_1 = arith.constant 0 : i32
    return %arg0, %c0_i32, %c0_i32_0 : i32, i32, i32
  }
}

module attributes {stable_mosaic.version = 11 : i64} {
  func.func @_conv1d_kernel(%arg0: i32, %arg1: memref<1x12x32xf32, #tpu.memory_space<vmem>>, %arg2: memref<5x32x32xf32, #tpu.memory_space<vmem>>, %arg3: memref<1x32xf32, #tpu.memory_space<vmem>>, %arg4: memref<1x8x32xf32, #tpu.memory_space<vmem>>) attributes {dimension_semantics = [#tpu.dimension_semantics<parallel>], iteration_bounds = array<i64: 2>, scalar_prefetch = 0 : i64, scratch_operands = 0 : i64, tpu.core_type = #tpu.core_type<tc>, window_params = [{transform_indices = @transform_0, window_bounds = array<i64: 1, 12, 32>}, {pipeline_mode = #tpu.pipeline_mode<synchronous>, transform_indices = @transform_1, window_bounds = array<i64: 5, 32, 32>}, {pipeline_mode = #tpu.pipeline_mode<synchronous>, transform_indices = @transform_2, window_bounds = array<i64: 1, 32>}, {transform_indices = @transform_3, window_bounds = array<i64: 1, 8, 32>}]} {
    %c0 = arith.constant 0 : index
    %c0_0 = arith.constant 0 : index
    %c0_1 = arith.constant 0 : index
    %0 = vector.load %arg1[%c0, %c0_0, %c0_1] : memref<1x12x32xf32, #tpu.memory_space<vmem>>, vector<1x12x32xf32>
    %1 = vector.shape_cast %0 : vector<1x12x32xf32> to vector<12x32xf32>
    %cst = arith.constant 0.000000e+00 : f32
    %2 = vector.broadcast %cst : f32 to vector<8x32xf32>
    %c0_2 = arith.constant 0 : index
    %c0_3 = arith.constant 0 : index
    %3 = vector.load %arg3[%c0_2, %c0_3] : memref<1x32xf32, #tpu.memory_space<vmem>>, vector<1x32xf32>
    %4 = vector.broadcast %3 : vector<1x32xf32> to vector<8x32xf32>
    %5 = arith.addf %2, %4 : vector<8x32xf32>
    %6 = vector.extract_strided_slice %1 {offsets = [0, 0], sizes = [8, 32], strides = [1, 1]} : vector<12x32xf32> to vector<8x32xf32>
    %c0_4 = arith.constant 0 : index
    %c0_5 = arith.constant 0 : index
    %c0_6 = arith.constant 0 : index
    %7 = vector.load %arg2[%c0_4, %c0_5, %c0_6] : memref<5x32x32xf32, #tpu.memory_space<vmem>>, vector<1x32x32xf32>
    %8 = vector.shape_cast %7 : vector<1x32x32xf32> to vector<32x32xf32>
    %cst_7 = arith.constant dense<0.000000e+00> : vector<8x32xf32>
    %9 = tpu.matmul %6, %8, %cst_7 {dimension_numbers = #tpu.dot_dimension_numbers<[1], [0], [0], [1], [0, 0, 1, 1], [], []>} : vector<8x32xf32>, vector<32x32xf32>, vector<8x32xf32> -> vector<8x32xf32>
    %10 = arith.addf %5, %9 : vector<8x32xf32>
    %11 = vector.extract_strided_slice %1 {offsets = [1, 0], sizes = [8, 32], strides = [1, 1]} : vector<12x32xf32> to vector<8x32xf32>
    %c1 = arith.constant 1 : index
    %c0_8 = arith.constant 0 : index
    %c0_9 = arith.constant 0 : index
    %12 = vector.load %arg2[%c1, %c0_8, %c0_9] : memref<5x32x32xf32, #tpu.memory_space<vmem>>, vector<1x32x32xf32>
    %13 = vector.shape_cast %12 : vector<1x32x32xf32> to vector<32x32xf32>
    %cst_10 = arith.constant dense<0.000000e+00> : vector<8x32xf32>
    %14 = tpu.matmul %11, %13, %cst_10 {dimension_numbers = #tpu.dot_dimension_numbers<[1], [0], [0], [1], [0, 0, 1, 1], [], []>} : vector<8x32xf32>, vector<32x32xf32>, vector<8x32xf32> -> vector<8x32xf32>
    %15 = arith.addf %10, %14 : vector<8x32xf32>
    %16 = vector.extract_strided_slice %1 {offsets = [2, 0], sizes = [8, 32], strides = [1, 1]} : vector<12x32xf32> to vector<8x32xf32>
    %c2 = arith.constant 2 : index
    %c0_11 = arith.constant 0 : index
    %c0_12 = arith.constant 0 : index
    %17 = vector.load %arg2[%c2, %c0_11, %c0_12] : memref<5x32x32xf32, #tpu.memory_space<vmem>>, vector<1x32x32xf32>
    %18 = vector.shape_cast %17 : vector<1x32x32xf32> to vector<32x32xf32>
    %cst_13 = arith.constant dense<0.000000e+00> : vector<8x32xf32>
    %19 = tpu.matmul %16, %18, %cst_13 {dimension_numbers = #tpu.dot_dimension_numbers<[1], [0], [0], [1], [0, 0, 1, 1], [], []>} : vector<8x32xf32>, vector<32x32xf32>, vector<8x32xf32> -> vector<8x32xf32>
    %20 = arith.addf %15, %19 : vector<8x32xf32>
    %21 = vector.extract_strided_slice %1 {offsets = [3, 0], sizes = [8, 32], strides = [1, 1]} : vector<12x32xf32> to vector<8x32xf32>
    %c3 = arith.constant 3 : index
    %c0_14 = arith.constant 0 : index
    %c0_15 = arith.constant 0 : index
    %22 = vector.load %arg2[%c3, %c0_14, %c0_15] : memref<5x32x32xf32, #tpu.memory_space<vmem>>, vector<1x32x32xf32>
    %23 = vector.shape_cast %22 : vector<1x32x32xf32> to vector<32x32xf32>
    %cst_16 = arith.constant dense<0.000000e+00> : vector<8x32xf32>
    %24 = tpu.matmul %21, %23, %cst_16 {dimension_numbers = #tpu.dot_dimension_numbers<[1], [0], [0], [1], [0, 0, 1, 1], [], []>} : vector<8x32xf32>, vector<32x32xf32>, vector<8x32xf32> -> vector<8x32xf32>
    %25 = arith.addf %20, %24 : vector<8x32xf32>
    %26 = vector.extract_strided_slice %1 {offsets = [4, 0], sizes = [8, 32], strides = [1, 1]} : vector<12x32xf32> to vector<8x32xf32>
    %c4 = arith.constant 4 : index
    %c0_17 = arith.constant 0 : index
    %c0_18 = arith.constant 0 : index
    %27 = vector.load %arg2[%c4, %c0_17, %c0_18] : memref<5x32x32xf32, #tpu.memory_space<vmem>>, vector<1x32x32xf32>
    %28 = vector.shape_cast %27 : vector<1x32x32xf32> to vector<32x32xf32>
    %cst_19 = arith.constant dense<0.000000e+00> : vector<8x32xf32>
    %29 = tpu.matmul %26, %28, %cst_19 {dimension_numbers = #tpu.dot_dimension_numbers<[1], [0], [0], [1], [0, 0, 1, 1], [], []>} : vector<8x32xf32>, vector<32x32xf32>, vector<8x32xf32> -> vector<8x32xf32>
    %30 = arith.addf %25, %29 : vector<8x32xf32>
    %cst_20 = arith.constant 0.000000e+00 : f32
    %31 = vector.broadcast %cst_20 : f32 to vector<8x32xf32>
    %32 = arith.maximumf %30, %31 : vector<8x32xf32>
    %c0_21 = arith.constant 0 : index
    %c0_22 = arith.constant 0 : index
    %c0_23 = arith.constant 0 : index
    %33 = vector.load %arg4[%c0_21, %c0_22, %c0_23] : memref<1x8x32xf32, #tpu.memory_space<vmem>>, vector<1x8x32xf32>
    %34 = vector.shape_cast %33 : vector<1x8x32xf32> to vector<8x32xf32>
    %35 = vector.shape_cast %32 : vector<8x32xf32> to vector<1x8x32xf32>
    tpu.vector_store %arg4[%c0_21, %c0_22, %c0_23], %35 {strides = array<i32>} : memref<1x8x32xf32, #tpu.memory_space<vmem>>, vector<1x8x32xf32>,
    return
  }
  func.func @transform_0(%arg0: i32) -> (i32, i32, i32) {
    %c0_i32 = arith.constant 0 : i32
    %c0_i32_0 = arith.constant 0 : i32
    %c0_i32_1 = arith.constant 0 : i32
    return %arg0, %c0_i32, %c0_i32_0 : i32, i32, i32
  }
  func.func @transform_1(%arg0: i32) -> (i32, i32, i32) {
    %c0_i32 = arith.constant 0 : i32
    %c0_i32_0 = arith.constant 0 : i32
    %c0_i32_1 = arith.constant 0 : i32
    %c0_i32_2 = arith.constant 0 : i32
    return %c0_i32, %c0_i32_0, %c0_i32_1 : i32, i32, i32
  }
  func.func @transform_2(%arg0: i32) -> (i32, i32) {
    %c0_i32 = arith.constant 0 : i32
    %c0_i32_0 = arith.constant 0 : i32
    %c0_i32_1 = arith.constant 0 : i32
    return %c0_i32, %c0_i32_0 : i32, i32
  }
  func.func @transform_3(%arg0: i32) -> (i32, i32, i32) {
    %c0_i32 = arith.constant 0 : i32
    %c0_i32_0 = arith.constant 0 : i32
    %c0_i32_1 = arith.constant 0 : i32
    return %arg0, %c0_i32, %c0_i32_0 : i32, i32, i32
  }
}

module attributes {stable_mosaic.version = 11 : i64} {
  func.func @_bilstm_kernel(%arg0: i32, %arg1: memref<1x2x32xf32, #tpu.memory_space<vmem>>, %arg2: memref<1x2x32xf32, #tpu.memory_space<vmem>>, %arg3: memref<48x64xf32, #tpu.memory_space<vmem>>, %arg4: memref<1x64xf32, #tpu.memory_space<vmem>>, %arg5: memref<48x64xf32, #tpu.memory_space<vmem>>, %arg6: memref<1x64xf32, #tpu.memory_space<vmem>>, %arg7: memref<1x2x16xf32, #tpu.memory_space<vmem>>, %arg8: memref<1x2x16xf32, #tpu.memory_space<vmem>>, %arg9: memref<2x16xf32, #tpu.memory_space<vmem>>, %arg10: memref<2x16xf32, #tpu.memory_space<vmem>>, %arg11: memref<2x16xf32, #tpu.memory_space<vmem>>, %arg12: memref<2x16xf32, #tpu.memory_space<vmem>>) attributes {dimension_semantics = [#tpu.dimension_semantics<arbitrary>], iteration_bounds = array<i64: 8>, scalar_prefetch = 0 : i64, scratch_operands = 4 : i64, tpu.core_type = #tpu.core_type<tc>, window_params = [{transform_indices = @transform_0, window_bounds = array<i64: 1, 2, 32>}, {transform_indices = @transform_1, window_bounds = array<i64: 1, 2, 32>}, {pipeline_mode = #tpu.pipeline_mode<synchronous>, transform_indices = @transform_2, window_bounds = array<i64: 48, 64>}, {pipeline_mode = #tpu.pipeline_mode<synchronous>, transform_indices = @transform_3, window_bounds = array<i64: 1, 64>}, {pipeline_mode = #tpu.pipeline_mode<synchronous>, transform_indices = @transform_4, window_bounds = array<i64: 48, 64>}, {pipeline_mode = #tpu.pipeline_mode<synchronous>, transform_indices = @transform_5, window_bounds = array<i64: 1, 64>}, {transform_indices = @transform_6, window_bounds = array<i64: 1, 2, 16>}, {transform_indices = @transform_7, window_bounds = array<i64: 1, 2, 16>}]} {
    %c0_i32 = arith.constant 0 : i32
    %0 = arith.cmpi eq, %arg0, %c0_i32 : i32
    %1 = arith.extui %0 : i1 to i32
    %c0_i32_0 = arith.constant 0 : i32
    %2 = arith.cmpi ne, %1, %c0_i32_0 : i32
    scf.if %2 {
      %cst_43 = arith.constant 0.000000e+00 : f32
      %83 = vector.broadcast %cst_43 : f32 to vector<2x16xf32>
      %c0_44 = arith.constant 0 : index
      %c0_45 = arith.constant 0 : index
      %84 = vector.load %arg9[%c0_44, %c0_45] : memref<2x16xf32, #tpu.memory_space<vmem>>, vector<2x16xf32>
      tpu.vector_store %arg9[%c0_44, %c0_45], %83 {strides = array<i32>} : memref<2x16xf32, #tpu.memory_space<vmem>>, vector<2x16xf32>,
      %cst_46 = arith.constant 0.000000e+00 : f32
      %85 = vector.broadcast %cst_46 : f32 to vector<2x16xf32>
      %c0_47 = arith.constant 0 : index
      %c0_48 = arith.constant 0 : index
      %86 = vector.load %arg10[%c0_47, %c0_48] : memref<2x16xf32, #tpu.memory_space<vmem>>, vector<2x16xf32>
      tpu.vector_store %arg10[%c0_47, %c0_48], %85 {strides = array<i32>} : memref<2x16xf32, #tpu.memory_space<vmem>>, vector<2x16xf32>,
      %cst_49 = arith.constant 0.000000e+00 : f32
      %87 = vector.broadcast %cst_49 : f32 to vector<2x16xf32>
      %c0_50 = arith.constant 0 : index
      %c0_51 = arith.constant 0 : index
      %88 = vector.load %arg11[%c0_50, %c0_51] : memref<2x16xf32, #tpu.memory_space<vmem>>, vector<2x16xf32>
      tpu.vector_store %arg11[%c0_50, %c0_51], %87 {strides = array<i32>} : memref<2x16xf32, #tpu.memory_space<vmem>>, vector<2x16xf32>,
      %cst_52 = arith.constant 0.000000e+00 : f32
      %89 = vector.broadcast %cst_52 : f32 to vector<2x16xf32>
      %c0_53 = arith.constant 0 : index
      %c0_54 = arith.constant 0 : index
      %90 = vector.load %arg12[%c0_53, %c0_54] : memref<2x16xf32, #tpu.memory_space<vmem>>, vector<2x16xf32>
      tpu.vector_store %arg12[%c0_53, %c0_54], %89 {strides = array<i32>} : memref<2x16xf32, #tpu.memory_space<vmem>>, vector<2x16xf32>,
    } else {
    }
    %c0 = arith.constant 0 : index
    %c0_1 = arith.constant 0 : index
    %c0_2 = arith.constant 0 : index
    %3 = vector.load %arg1[%c0, %c0_1, %c0_2] : memref<1x2x32xf32, #tpu.memory_space<vmem>>, vector<1x2x32xf32>
    %4 = vector.shape_cast %3 : vector<1x2x32xf32> to vector<2x32xf32>
    %c0_3 = arith.constant 0 : index
    %c0_4 = arith.constant 0 : index
    %5 = vector.load %arg9[%c0_3, %c0_4] : memref<2x16xf32, #tpu.memory_space<vmem>>, vector<2x16xf32>
    %6 = tpu.concatenate %4, %5 in 1 : vector<2x32xf32>, vector<2x16xf32> -> vector<2x48xf32>
    %c0_5 = arith.constant 0 : index
    %c0_6 = arith.constant 0 : index
    %7 = vector.load %arg10[%c0_5, %c0_6] : memref<2x16xf32, #tpu.memory_space<vmem>>, vector<2x16xf32>
    %c0_7 = arith.constant 0 : index
    %c0_8 = arith.constant 0 : index
    %8 = vector.load %arg3[%c0_7, %c0_8] : memref<48x64xf32, #tpu.memory_space<vmem>>, vector<48x64xf32>
    %cst = arith.constant dense<0.000000e+00> : vector<2x64xf32>
    %9 = tpu.matmul %6, %8, %cst {dimension_numbers = #tpu.dot_dimension_numbers<[1], [0], [0], [1], [0, 0, 1, 1], [], []>} : vector<2x48xf32>, vector<48x64xf32>, vector<2x64xf32> -> vector<2x64xf32>
    %c0_9 = arith.constant 0 : index
    %c0_10 = arith.constant 0 : index
    %10 = vector.load %arg4[%c0_9, %c0_10] : memref<1x64xf32, #tpu.memory_space<vmem>>, vector<1x64xf32>
    %11 = vector.broadcast %10 : vector<1x64xf32> to vector<2x64xf32>
    %12 = arith.addf %9, %11 : vector<2x64xf32>
    %13 = vector.extract_strided_slice %12 {offsets = [0, 0], sizes = [2, 16], strides = [1, 1]} : vector<2x64xf32> to vector<2x16xf32>
    %14 = arith.negf %13 : vector<2x16xf32>
    %15 = math.exp %14 : vector<2x16xf32>
    %cst_11 = arith.constant 1.000000e+00 : f32
    %16 = vector.broadcast %cst_11 : f32 to vector<2x16xf32>
    %17 = arith.addf %16, %15 : vector<2x16xf32>
    %18 = arith.divf %16, %17 : vector<2x16xf32>
    %19 = vector.extract_strided_slice %12 {offsets = [0, 16], sizes = [2, 16], strides = [1, 1]} : vector<2x64xf32> to vector<2x16xf32>
    %20 = arith.negf %19 : vector<2x16xf32>
    %21 = math.exp %20 : vector<2x16xf32>
    %cst_12 = arith.constant 1.000000e+00 : f32
    %22 = vector.broadcast %cst_12 : f32 to vector<2x16xf32>
    %23 = arith.addf %22, %21 : vector<2x16xf32>
    %24 = arith.divf %22, %23 : vector<2x16xf32>
    %25 = vector.extract_strided_slice %12 {offsets = [0, 32], sizes = [2, 16], strides = [1, 1]} : vector<2x64xf32> to vector<2x16xf32>
    %26 = math.tanh %25 : vector<2x16xf32>
    %27 = vector.extract_strided_slice %12 {offsets = [0, 48], sizes = [2, 16], strides = [1, 1]} : vector<2x64xf32> to vector<2x16xf32>
    %28 = arith.negf %27 : vector<2x16xf32>
    %29 = math.exp %28 : vector<2x16xf32>
    %cst_13 = arith.constant 1.000000e+00 : f32
    %30 = vector.broadcast %cst_13 : f32 to vector<2x16xf32>
    %31 = arith.addf %30, %29 : vector<2x16xf32>
    %32 = arith.divf %30, %31 : vector<2x16xf32>
    %33 = arith.mulf %24, %7 : vector<2x16xf32>
    %34 = arith.mulf %18, %26 : vector<2x16xf32>
    %35 = arith.addf %33, %34 : vector<2x16xf32>
    %36 = math.tanh %35 : vector<2x16xf32>
    %37 = arith.mulf %32, %36 : vector<2x16xf32>
    %c0_14 = arith.constant 0 : index
    %c0_15 = arith.constant 0 : index
    %38 = vector.load %arg9[%c0_14, %c0_15] : memref<2x16xf32, #tpu.memory_space<vmem>>, vector<2x16xf32>
    tpu.vector_store %arg9[%c0_14, %c0_15], %37 {strides = array<i32>} : memref<2x16xf32, #tpu.memory_space<vmem>>, vector<2x16xf32>,
    %c0_16 = arith.constant 0 : index
    %c0_17 = arith.constant 0 : index
    %39 = vector.load %arg10[%c0_16, %c0_17] : memref<2x16xf32, #tpu.memory_space<vmem>>, vector<2x16xf32>
    tpu.vector_store %arg10[%c0_16, %c0_17], %35 {strides = array<i32>} : memref<2x16xf32, #tpu.memory_space<vmem>>, vector<2x16xf32>,
    %c0_18 = arith.constant 0 : index
    %c0_19 = arith.constant 0 : index
    %c0_20 = arith.constant 0 : index
    %40 = vector.load %arg7[%c0_18, %c0_19, %c0_20] : memref<1x2x16xf32, #tpu.memory_space<vmem>>, vector<1x2x16xf32>
    %41 = vector.shape_cast %40 : vector<1x2x16xf32> to vector<2x16xf32>
    %42 = vector.shape_cast %37 : vector<2x16xf32> to vector<1x2x16xf32>
    tpu.vector_store %arg7[%c0_18, %c0_19, %c0_20], %42 {strides = array<i32>} : memref<1x2x16xf32, #tpu.memory_space<vmem>>, vector<1x2x16xf32>,
    %c0_21 = arith.constant 0 : index
    %c0_22 = arith.constant 0 : index
    %c0_23 = arith.constant 0 : index
    %43 = vector.load %arg2[%c0_21, %c0_22, %c0_23] : memref<1x2x32xf32, #tpu.memory_space<vmem>>, vector<1x2x32xf32>
    %44 = vector.shape_cast %43 : vector<1x2x32xf32> to vector<2x32xf32>
    %c0_24 = arith.constant 0 : index
    %c0_25 = arith.constant 0 : index
    %45 = vector.load %arg11[%c0_24, %c0_25] : memref<2x16xf32, #tpu.memory_space<vmem>>, vector<2x16xf32>
    %46 = tpu.concatenate %44, %45 in 1 : vector<2x32xf32>, vector<2x16xf32> -> vector<2x48xf32>
    %c0_26 = arith.constant 0 : index
    %c0_27 = arith.constant 0 : index
    %47 = vector.load %arg12[%c0_26, %c0_27] : memref<2x16xf32, #tpu.memory_space<vmem>>, vector<2x16xf32>
    %c0_28 = arith.constant 0 : index
    %c0_29 = arith.constant 0 : index
    %48 = vector.load %arg5[%c0_28, %c0_29] : memref<48x64xf32, #tpu.memory_space<vmem>>, vector<48x64xf32>
    %cst_30 = arith.constant dense<0.000000e+00> : vector<2x64xf32>
    %49 = tpu.matmul %46, %48, %cst_30 {dimension_numbers = #tpu.dot_dimension_numbers<[1], [0], [0], [1], [0, 0, 1, 1], [], []>} : vector<2x48xf32>, vector<48x64xf32>, vector<2x64xf32> -> vector<2x64xf32>
    %c0_31 = arith.constant 0 : index
    %c0_32 = arith.constant 0 : index
    %50 = vector.load %arg6[%c0_31, %c0_32] : memref<1x64xf32, #tpu.memory_space<vmem>>, vector<1x64xf32>
    %51 = vector.broadcast %50 : vector<1x64xf32> to vector<2x64xf32>
    %52 = arith.addf %49, %51 : vector<2x64xf32>
    %53 = vector.extract_strided_slice %52 {offsets = [0, 0], sizes = [2, 16], strides = [1, 1]} : vector<2x64xf32> to vector<2x16xf32>
    %54 = arith.negf %53 : vector<2x16xf32>
    %55 = math.exp %54 : vector<2x16xf32>
    %cst_33 = arith.constant 1.000000e+00 : f32
    %56 = vector.broadcast %cst_33 : f32 to vector<2x16xf32>
    %57 = arith.addf %56, %55 : vector<2x16xf32>
    %58 = arith.divf %56, %57 : vector<2x16xf32>
    %59 = vector.extract_strided_slice %52 {offsets = [0, 16], sizes = [2, 16], strides = [1, 1]} : vector<2x64xf32> to vector<2x16xf32>
    %60 = arith.negf %59 : vector<2x16xf32>
    %61 = math.exp %60 : vector<2x16xf32>
    %cst_34 = arith.constant 1.000000e+00 : f32
    %62 = vector.broadcast %cst_34 : f32 to vector<2x16xf32>
    %63 = arith.addf %62, %61 : vector<2x16xf32>
    %64 = arith.divf %62, %63 : vector<2x16xf32>
    %65 = vector.extract_strided_slice %52 {offsets = [0, 32], sizes = [2, 16], strides = [1, 1]} : vector<2x64xf32> to vector<2x16xf32>
    %66 = math.tanh %65 : vector<2x16xf32>
    %67 = vector.extract_strided_slice %52 {offsets = [0, 48], sizes = [2, 16], strides = [1, 1]} : vector<2x64xf32> to vector<2x16xf32>
    %68 = arith.negf %67 : vector<2x16xf32>
    %69 = math.exp %68 : vector<2x16xf32>
    %cst_35 = arith.constant 1.000000e+00 : f32
    %70 = vector.broadcast %cst_35 : f32 to vector<2x16xf32>
    %71 = arith.addf %70, %69 : vector<2x16xf32>
    %72 = arith.divf %70, %71 : vector<2x16xf32>
    %73 = arith.mulf %64, %47 : vector<2x16xf32>
    %74 = arith.mulf %58, %66 : vector<2x16xf32>
    %75 = arith.addf %73, %74 : vector<2x16xf32>
    %76 = math.tanh %75 : vector<2x16xf32>
    %77 = arith.mulf %72, %76 : vector<2x16xf32>
    %c0_36 = arith.constant 0 : index
    %c0_37 = arith.constant 0 : index
    %78 = vector.load %arg11[%c0_36, %c0_37] : memref<2x16xf32, #tpu.memory_space<vmem>>, vector<2x16xf32>
    tpu.vector_store %arg11[%c0_36, %c0_37], %77 {strides = array<i32>} : memref<2x16xf32, #tpu.memory_space<vmem>>, vector<2x16xf32>,
    %c0_38 = arith.constant 0 : index
    %c0_39 = arith.constant 0 : index
    %79 = vector.load %arg12[%c0_38, %c0_39] : memref<2x16xf32, #tpu.memory_space<vmem>>, vector<2x16xf32>
    tpu.vector_store %arg12[%c0_38, %c0_39], %75 {strides = array<i32>} : memref<2x16xf32, #tpu.memory_space<vmem>>, vector<2x16xf32>,
    %c0_40 = arith.constant 0 : index
    %c0_41 = arith.constant 0 : index
    %c0_42 = arith.constant 0 : index
    %80 = vector.load %arg8[%c0_40, %c0_41, %c0_42] : memref<1x2x16xf32, #tpu.memory_space<vmem>>, vector<1x2x16xf32>
    %81 = vector.shape_cast %80 : vector<1x2x16xf32> to vector<2x16xf32>
    %82 = vector.shape_cast %77 : vector<2x16xf32> to vector<1x2x16xf32>
    tpu.vector_store %arg8[%c0_40, %c0_41, %c0_42], %82 {strides = array<i32>} : memref<1x2x16xf32, #tpu.memory_space<vmem>>, vector<1x2x16xf32>,
    return
  }
  func.func @transform_0(%arg0: i32) -> (i32, i32, i32) {
    %c0_i32 = arith.constant 0 : i32
    %c0_i32_0 = arith.constant 0 : i32
    %c0_i32_1 = arith.constant 0 : i32
    return %arg0, %c0_i32, %c0_i32_0 : i32, i32, i32
  }
  func.func @transform_1(%arg0: i32) -> (i32, i32, i32) {
    %c7_i32 = arith.constant 7 : i32
    %0 = arith.subi %c7_i32, %arg0 : i32
    %c0_i32 = arith.constant 0 : i32
    %c0_i32_0 = arith.constant 0 : i32
    %c0_i32_1 = arith.constant 0 : i32
    return %0, %c0_i32, %c0_i32_0 : i32, i32, i32
  }
  func.func @transform_2(%arg0: i32) -> (i32, i32) {
    %c0_i32 = arith.constant 0 : i32
    %c0_i32_0 = arith.constant 0 : i32
    %c0_i32_1 = arith.constant 0 : i32
    return %c0_i32, %c0_i32_0 : i32, i32
  }
  func.func @transform_3(%arg0: i32) -> (i32, i32) {
    %c0_i32 = arith.constant 0 : i32
    %c0_i32_0 = arith.constant 0 : i32
    %c0_i32_1 = arith.constant 0 : i32
    return %c0_i32, %c0_i32_0 : i32, i32
  }
  func.func @transform_4(%arg0: i32) -> (i32, i32) {
    %c0_i32 = arith.constant 0 : i32
    %c0_i32_0 = arith.constant 0 : i32
    %c0_i32_1 = arith.constant 0 : i32
    return %c0_i32, %c0_i32_0 : i32, i32
  }
  func.func @transform_5(%arg0: i32) -> (i32, i32) {
    %c0_i32 = arith.constant 0 : i32
    %c0_i32_0 = arith.constant 0 : i32
    %c0_i32_1 = arith.constant 0 : i32
    return %c0_i32, %c0_i32_0 : i32, i32
  }
  func.func @transform_6(%arg0: i32) -> (i32, i32, i32) {
    %c0_i32 = arith.constant 0 : i32
    %c0_i32_0 = arith.constant 0 : i32
    %c0_i32_1 = arith.constant 0 : i32
    return %arg0, %c0_i32, %c0_i32_0 : i32, i32, i32
  }
  func.func @transform_7(%arg0: i32) -> (i32, i32, i32) {
    %c7_i32 = arith.constant 7 : i32
    %0 = arith.subi %c7_i32, %arg0 : i32
    %c0_i32 = arith.constant 0 : i32
    %c0_i32_0 = arith.constant 0 : i32
    %c0_i32_1 = arith.constant 0 : i32
    return %0, %c0_i32, %c0_i32_0 : i32, i32, i32
  }
}

module attributes {stable_mosaic.version = 11 : i64} {
  func.func @_matmul_kernel(%arg0: i32, %arg1: memref<16x32xf32, #tpu.memory_space<vmem>>, %arg2: memref<32x16xf32, #tpu.memory_space<vmem>>, %arg3: memref<16x16xf32, #tpu.memory_space<vmem>>) attributes {dimension_semantics = [#tpu.dimension_semantics<arbitrary>], iteration_bounds = array<i64: 1>, scalar_prefetch = 0 : i64, scratch_operands = 0 : i64, tpu.core_type = #tpu.core_type<tc>, window_params = [{pipeline_mode = #tpu.pipeline_mode<synchronous>, transform_indices = @transform_0, window_bounds = array<i64: 16, 32>}, {pipeline_mode = #tpu.pipeline_mode<synchronous>, transform_indices = @transform_1, window_bounds = array<i64: 32, 16>}, {pipeline_mode = #tpu.pipeline_mode<synchronous>, transform_indices = @transform_2, window_bounds = array<i64: 16, 16>}]} {
    %c0 = arith.constant 0 : index
    %c0_0 = arith.constant 0 : index
    %0 = vector.load %arg1[%c0, %c0_0] : memref<16x32xf32, #tpu.memory_space<vmem>>, vector<16x32xf32>
    %c0_1 = arith.constant 0 : index
    %c0_2 = arith.constant 0 : index
    %1 = vector.load %arg2[%c0_1, %c0_2] : memref<32x16xf32, #tpu.memory_space<vmem>>, vector<32x16xf32>
    %cst = arith.constant dense<0.000000e+00> : vector<16x16xf32>
    %2 = tpu.matmul %0, %1, %cst {dimension_numbers = #tpu.dot_dimension_numbers<[1], [0], [0], [1], [0, 0, 1, 1], [], []>} : vector<16x32xf32>, vector<32x16xf32>, vector<16x16xf32> -> vector<16x16xf32>
    %c0_3 = arith.constant 0 : index
    %c0_4 = arith.constant 0 : index
    %3 = vector.load %arg3[%c0_3, %c0_4] : memref<16x16xf32, #tpu.memory_space<vmem>>, vector<16x16xf32>
    tpu.vector_store %arg3[%c0_3, %c0_4], %2 {strides = array<i32>} : memref<16x16xf32, #tpu.memory_space<vmem>>, vector<16x16xf32>,
    return
  }
  func.func @transform_0(%arg0: i32) -> (i32, i32) {
    %c0_i32 = arith.constant 0 : i32
    %c0_i32_0 = arith.constant 0 : i32
    %c0_i32_1 = arith.constant 0 : i32
    return %c0_i32, %c0_i32_0 : i32, i32
  }
  func.func @transform_1(%arg0: i32) -> (i32, i32) {
    %c0_i32 = arith.constant 0 : i32
    %c0_i32_0 = arith.constant 0 : i32
    %c0_i32_1 = arith.constant 0 : i32
    return %c0_i32, %c0_i32_0 : i32, i32
  }
  func.func @transform_2(%arg0: i32) -> (i32, i32) {
    %c0_i32 = arith.constant 0 : i32
    %c0_i32_0 = arith.constant 0 : i32
    %c0_i32_1 = arith.constant 0 : i32
    return %c0_i32, %c0_i32_0 : i32, i32
  }
}

module attributes {stable_mosaic.version = 11 : i64} {
  func.func @_conv1d_kernel(%arg0: i32, %arg1: memref<1x10x8xf32, #tpu.memory_space<vmem>>, %arg2: memref<5x8x32xf32, #tpu.memory_space<vmem>>, %arg3: memref<1x32xf32, #tpu.memory_space<vmem>>, %arg4: memref<1x6x32xf32, #tpu.memory_space<vmem>>) attributes {dimension_semantics = [#tpu.dimension_semantics<parallel>], iteration_bounds = array<i64: 2>, scalar_prefetch = 0 : i64, scratch_operands = 0 : i64, tpu.core_type = #tpu.core_type<tc>, window_params = [{transform_indices = @transform_0, window_bounds = array<i64: 1, 10, 8>}, {pipeline_mode = #tpu.pipeline_mode<synchronous>, transform_indices = @transform_1, window_bounds = array<i64: 5, 8, 32>}, {pipeline_mode = #tpu.pipeline_mode<synchronous>, transform_indices = @transform_2, window_bounds = array<i64: 1, 32>}, {transform_indices = @transform_3, window_bounds = array<i64: 1, 6, 32>}]} {
    %c0 = arith.constant 0 : index
    %c0_0 = arith.constant 0 : index
    %c0_1 = arith.constant 0 : index
    %0 = vector.load %arg1[%c0, %c0_0, %c0_1] : memref<1x10x8xf32, #tpu.memory_space<vmem>>, vector<1x10x8xf32>
    %1 = vector.shape_cast %0 : vector<1x10x8xf32> to vector<10x8xf32>
    %cst = arith.constant 0.000000e+00 : f32
    %2 = vector.broadcast %cst : f32 to vector<6x32xf32>
    %c0_2 = arith.constant 0 : index
    %c0_3 = arith.constant 0 : index
    %3 = vector.load %arg3[%c0_2, %c0_3] : memref<1x32xf32, #tpu.memory_space<vmem>>, vector<1x32xf32>
    %4 = vector.broadcast %3 : vector<1x32xf32> to vector<6x32xf32>
    %5 = arith.addf %2, %4 : vector<6x32xf32>
    %6 = vector.extract_strided_slice %1 {offsets = [0, 0], sizes = [6, 8], strides = [1, 1]} : vector<10x8xf32> to vector<6x8xf32>
    %c0_4 = arith.constant 0 : index
    %c0_5 = arith.constant 0 : index
    %c0_6 = arith.constant 0 : index
    %7 = vector.load %arg2[%c0_4, %c0_5, %c0_6] : memref<5x8x32xf32, #tpu.memory_space<vmem>>, vector<1x8x32xf32>
    %8 = vector.shape_cast %7 : vector<1x8x32xf32> to vector<8x32xf32>
    %cst_7 = arith.constant dense<0.000000e+00> : vector<6x32xf32>
    %9 = tpu.matmul %6, %8, %cst_7 {dimension_numbers = #tpu.dot_dimension_numbers<[1], [0], [0], [1], [0, 0, 1, 1], [], []>} : vector<6x8xf32>, vector<8x32xf32>, vector<6x32xf32> -> vector<6x32xf32>
    %10 = arith.addf %5, %9 : vector<6x32xf32>
    %11 = vector.extract_strided_slice %1 {offsets = [1, 0], sizes = [6, 8], strides = [1, 1]} : vector<10x8xf32> to vector<6x8xf32>
    %c1 = arith.constant 1 : index
    %c0_8 = arith.constant 0 : index
    %c0_9 = arith.constant 0 : index
    %12 = vector.load %arg2[%c1, %c0_8, %c0_9] : memref<5x8x32xf32, #tpu.memory_space<vmem>>, vector<1x8x32xf32>
    %13 = vector.shape_cast %12 : vector<1x8x32xf32> to vector<8x32xf32>
    %cst_10 = arith.constant dense<0.000000e+00> : vector<6x32xf32>
    %14 = tpu.matmul %11, %13, %cst_10 {dimension_numbers = #tpu.dot_dimension_numbers<[1], [0], [0], [1], [0, 0, 1, 1], [], []>} : vector<6x8xf32>, vector<8x32xf32>, vector<6x32xf32> -> vector<6x32xf32>
    %15 = arith.addf %10, %14 : vector<6x32xf32>
    %16 = vector.extract_strided_slice %1 {offsets = [2, 0], sizes = [6, 8], strides = [1, 1]} : vector<10x8xf32> to vector<6x8xf32>
    %c2 = arith.constant 2 : index
    %c0_11 = arith.constant 0 : index
    %c0_12 = arith.constant 0 : index
    %17 = vector.load %arg2[%c2, %c0_11, %c0_12] : memref<5x8x32xf32, #tpu.memory_space<vmem>>, vector<1x8x32xf32>
    %18 = vector.shape_cast %17 : vector<1x8x32xf32> to vector<8x32xf32>
    %cst_13 = arith.constant dense<0.000000e+00> : vector<6x32xf32>
    %19 = tpu.matmul %16, %18, %cst_13 {dimension_numbers = #tpu.dot_dimension_numbers<[1], [0], [0], [1], [0, 0, 1, 1], [], []>} : vector<6x8xf32>, vector<8x32xf32>, vector<6x32xf32> -> vector<6x32xf32>
    %20 = arith.addf %15, %19 : vector<6x32xf32>
    %21 = vector.extract_strided_slice %1 {offsets = [3, 0], sizes = [6, 8], strides = [1, 1]} : vector<10x8xf32> to vector<6x8xf32>
    %c3 = arith.constant 3 : index
    %c0_14 = arith.constant 0 : index
    %c0_15 = arith.constant 0 : index
    %22 = vector.load %arg2[%c3, %c0_14, %c0_15] : memref<5x8x32xf32, #tpu.memory_space<vmem>>, vector<1x8x32xf32>
    %23 = vector.shape_cast %22 : vector<1x8x32xf32> to vector<8x32xf32>
    %cst_16 = arith.constant dense<0.000000e+00> : vector<6x32xf32>
    %24 = tpu.matmul %21, %23, %cst_16 {dimension_numbers = #tpu.dot_dimension_numbers<[1], [0], [0], [1], [0, 0, 1, 1], [], []>} : vector<6x8xf32>, vector<8x32xf32>, vector<6x32xf32> -> vector<6x32xf32>
    %25 = arith.addf %20, %24 : vector<6x32xf32>
    %26 = vector.extract_strided_slice %1 {offsets = [4, 0], sizes = [6, 8], strides = [1, 1]} : vector<10x8xf32> to vector<6x8xf32>
    %c4 = arith.constant 4 : index
    %c0_17 = arith.constant 0 : index
    %c0_18 = arith.constant 0 : index
    %27 = vector.load %arg2[%c4, %c0_17, %c0_18] : memref<5x8x32xf32, #tpu.memory_space<vmem>>, vector<1x8x32xf32>
    %28 = vector.shape_cast %27 : vector<1x8x32xf32> to vector<8x32xf32>
    %cst_19 = arith.constant dense<0.000000e+00> : vector<6x32xf32>
    %29 = tpu.matmul %26, %28, %cst_19 {dimension_numbers = #tpu.dot_dimension_numbers<[1], [0], [0], [1], [0, 0, 1, 1], [], []>} : vector<6x8xf32>, vector<8x32xf32>, vector<6x32xf32> -> vector<6x32xf32>
    %30 = arith.addf %25, %29 : vector<6x32xf32>
    %31 = math.tanh %30 : vector<6x32xf32>
    %c0_20 = arith.constant 0 : index
    %c0_21 = arith.constant 0 : index
    %c0_22 = arith.constant 0 : index
    %32 = vector.load %arg4[%c0_20, %c0_21, %c0_22] : memref<1x6x32xf32, #tpu.memory_space<vmem>>, vector<1x6x32xf32>
    %33 = vector.shape_cast %32 : vector<1x6x32xf32> to vector<6x32xf32>
    %34 = vector.shape_cast %31 : vector<6x32xf32> to vector<1x6x32xf32>
    tpu.vector_store %arg4[%c0_20, %c0_21, %c0_22], %34 {strides = array<i32>} : memref<1x6x32xf32, #tpu.memory_space<vmem>>, vector<1x6x32xf32>,
    return
  }
  func.func @transform_0(%arg0: i32) -> (i32, i32, i32) {
    %c0_i32 = arith.constant 0 : i32
    %c0_i32_0 = arith.constant 0 : i32
    %c0_i32_1 = arith.constant 0 : i32
    return %arg0, %c0_i32, %c0_i32_0 : i32, i32, i32
  }
  func.func @transform_1(%arg0: i32) -> (i32, i32, i32) {
    %c0_i32 = arith.constant 0 : i32
    %c0_i32_0 = arith.constant 0 : i32
    %c0_i32_1 = arith.constant 0 : i32
    %c0_i32_2 = arith.constant 0 : i32
    return %c0_i32, %c0_i32_0, %c0_i32_1 : i32, i32, i32
  }
  func.func @transform_2(%arg0: i32) -> (i32, i32) {
    %c0_i32 = arith.constant 0 : i32
    %c0_i32_0 = arith.constant 0 : i32
    %c0_i32_1 = arith.constant 0 : i32
    return %c0_i32, %c0_i32_0 : i32, i32
  }
  func.func @transform_3(%arg0: i32) -> (i32, i32, i32) {
    %c0_i32 = arith.constant 0 : i32
    %c0_i32_0 = arith.constant 0 : i32
    %c0_i32_1 = arith.constant 0 : i32
    return %arg0, %c0_i32, %c0_i32_0 : i32, i32, i32
  }
}

module attributes {stable_mosaic.version = 11 : i64} {
  func.func @_conv1d_kernel(%arg0: i32, %arg1: memref<1x10x32xf32, #tpu.memory_space<vmem>>, %arg2: memref<5x32x32xf32, #tpu.memory_space<vmem>>, %arg3: memref<1x32xf32, #tpu.memory_space<vmem>>, %arg4: memref<1x6x32xf32, #tpu.memory_space<vmem>>) attributes {dimension_semantics = [#tpu.dimension_semantics<parallel>], iteration_bounds = array<i64: 2>, scalar_prefetch = 0 : i64, scratch_operands = 0 : i64, tpu.core_type = #tpu.core_type<tc>, window_params = [{transform_indices = @transform_0, window_bounds = array<i64: 1, 10, 32>}, {pipeline_mode = #tpu.pipeline_mode<synchronous>, transform_indices = @transform_1, window_bounds = array<i64: 5, 32, 32>}, {pipeline_mode = #tpu.pipeline_mode<synchronous>, transform_indices = @transform_2, window_bounds = array<i64: 1, 32>}, {transform_indices = @transform_3, window_bounds = array<i64: 1, 6, 32>}]} {
    %c0 = arith.constant 0 : index
    %c0_0 = arith.constant 0 : index
    %c0_1 = arith.constant 0 : index
    %0 = vector.load %arg1[%c0, %c0_0, %c0_1] : memref<1x10x32xf32, #tpu.memory_space<vmem>>, vector<1x10x32xf32>
    %1 = vector.shape_cast %0 : vector<1x10x32xf32> to vector<10x32xf32>
    %cst = arith.constant 0.000000e+00 : f32
    %2 = vector.broadcast %cst : f32 to vector<6x32xf32>
    %c0_2 = arith.constant 0 : index
    %c0_3 = arith.constant 0 : index
    %3 = vector.load %arg3[%c0_2, %c0_3] : memref<1x32xf32, #tpu.memory_space<vmem>>, vector<1x32xf32>
    %4 = vector.broadcast %3 : vector<1x32xf32> to vector<6x32xf32>
    %5 = arith.addf %2, %4 : vector<6x32xf32>
    %6 = vector.extract_strided_slice %1 {offsets = [0, 0], sizes = [6, 32], strides = [1, 1]} : vector<10x32xf32> to vector<6x32xf32>
    %c0_4 = arith.constant 0 : index
    %c0_5 = arith.constant 0 : index
    %c0_6 = arith.constant 0 : index
    %7 = vector.load %arg2[%c0_4, %c0_5, %c0_6] : memref<5x32x32xf32, #tpu.memory_space<vmem>>, vector<1x32x32xf32>
    %8 = vector.shape_cast %7 : vector<1x32x32xf32> to vector<32x32xf32>
    %cst_7 = arith.constant dense<0.000000e+00> : vector<6x32xf32>
    %9 = tpu.matmul %6, %8, %cst_7 {dimension_numbers = #tpu.dot_dimension_numbers<[1], [0], [0], [1], [0, 0, 1, 1], [], []>} : vector<6x32xf32>, vector<32x32xf32>, vector<6x32xf32> -> vector<6x32xf32>
    %10 = arith.addf %5, %9 : vector<6x32xf32>
    %11 = vector.extract_strided_slice %1 {offsets = [1, 0], sizes = [6, 32], strides = [1, 1]} : vector<10x32xf32> to vector<6x32xf32>
    %c1 = arith.constant 1 : index
    %c0_8 = arith.constant 0 : index
    %c0_9 = arith.constant 0 : index
    %12 = vector.load %arg2[%c1, %c0_8, %c0_9] : memref<5x32x32xf32, #tpu.memory_space<vmem>>, vector<1x32x32xf32>
    %13 = vector.shape_cast %12 : vector<1x32x32xf32> to vector<32x32xf32>
    %cst_10 = arith.constant dense<0.000000e+00> : vector<6x32xf32>
    %14 = tpu.matmul %11, %13, %cst_10 {dimension_numbers = #tpu.dot_dimension_numbers<[1], [0], [0], [1], [0, 0, 1, 1], [], []>} : vector<6x32xf32>, vector<32x32xf32>, vector<6x32xf32> -> vector<6x32xf32>
    %15 = arith.addf %10, %14 : vector<6x32xf32>
    %16 = vector.extract_strided_slice %1 {offsets = [2, 0], sizes = [6, 32], strides = [1, 1]} : vector<10x32xf32> to vector<6x32xf32>
    %c2 = arith.constant 2 : index
    %c0_11 = arith.constant 0 : index
    %c0_12 = arith.constant 0 : index
    %17 = vector.load %arg2[%c2, %c0_11, %c0_12] : memref<5x32x32xf32, #tpu.memory_space<vmem>>, vector<1x32x32xf32>
    %18 = vector.shape_cast %17 : vector<1x32x32xf32> to vector<32x32xf32>
    %cst_13 = arith.constant dense<0.000000e+00> : vector<6x32xf32>
    %19 = tpu.matmul %16, %18, %cst_13 {dimension_numbers = #tpu.dot_dimension_numbers<[1], [0], [0], [1], [0, 0, 1, 1], [], []>} : vector<6x32xf32>, vector<32x32xf32>, vector<6x32xf32> -> vector<6x32xf32>
    %20 = arith.addf %15, %19 : vector<6x32xf32>
    %21 = vector.extract_strided_slice %1 {offsets = [3, 0], sizes = [6, 32], strides = [1, 1]} : vector<10x32xf32> to vector<6x32xf32>
    %c3 = arith.constant 3 : index
    %c0_14 = arith.constant 0 : index
    %c0_15 = arith.constant 0 : index
    %22 = vector.load %arg2[%c3, %c0_14, %c0_15] : memref<5x32x32xf32, #tpu.memory_space<vmem>>, vector<1x32x32xf32>
    %23 = vector.shape_cast %22 : vector<1x32x32xf32> to vector<32x32xf32>
    %cst_16 = arith.constant dense<0.000000e+00> : vector<6x32xf32>
    %24 = tpu.matmul %21, %23, %cst_16 {dimension_numbers = #tpu.dot_dimension_numbers<[1], [0], [0], [1], [0, 0, 1, 1], [], []>} : vector<6x32xf32>, vector<32x32xf32>, vector<6x32xf32> -> vector<6x32xf32>
    %25 = arith.addf %20, %24 : vector<6x32xf32>
    %26 = vector.extract_strided_slice %1 {offsets = [4, 0], sizes = [6, 32], strides = [1, 1]} : vector<10x32xf32> to vector<6x32xf32>
    %c4 = arith.constant 4 : index
    %c0_17 = arith.constant 0 : index
    %c0_18 = arith.constant 0 : index
    %27 = vector.load %arg2[%c4, %c0_17, %c0_18] : memref<5x32x32xf32, #tpu.memory_space<vmem>>, vector<1x32x32xf32>
    %28 = vector.shape_cast %27 : vector<1x32x32xf32> to vector<32x32xf32>
    %cst_19 = arith.constant dense<0.000000e+00> : vector<6x32xf32>
    %29 = tpu.matmul %26, %28, %cst_19 {dimension_numbers = #tpu.dot_dimension_numbers<[1], [0], [0], [1], [0, 0, 1, 1], [], []>} : vector<6x32xf32>, vector<32x32xf32>, vector<6x32xf32> -> vector<6x32xf32>
    %30 = arith.addf %25, %29 : vector<6x32xf32>
    %31 = math.tanh %30 : vector<6x32xf32>
    %c0_20 = arith.constant 0 : index
    %c0_21 = arith.constant 0 : index
    %c0_22 = arith.constant 0 : index
    %32 = vector.load %arg4[%c0_20, %c0_21, %c0_22] : memref<1x6x32xf32, #tpu.memory_space<vmem>>, vector<1x6x32xf32>
    %33 = vector.shape_cast %32 : vector<1x6x32xf32> to vector<6x32xf32>
    %34 = vector.shape_cast %31 : vector<6x32xf32> to vector<1x6x32xf32>
    tpu.vector_store %arg4[%c0_20, %c0_21, %c0_22], %34 {strides = array<i32>} : memref<1x6x32xf32, #tpu.memory_space<vmem>>, vector<1x6x32xf32>,
    return
  }
  func.func @transform_0(%arg0: i32) -> (i32, i32, i32) {
    %c0_i32 = arith.constant 0 : i32
    %c0_i32_0 = arith.constant 0 : i32
    %c0_i32_1 = arith.constant 0 : i32
    return %arg0, %c0_i32, %c0_i32_0 : i32, i32, i32
  }
  func.func @transform_1(%arg0: i32) -> (i32, i32, i32) {
    %c0_i32 = arith.constant 0 : i32
    %c0_i32_0 = arith.constant 0 : i32
    %c0_i32_1 = arith.constant 0 : i32
    %c0_i32_2 = arith.constant 0 : i32
    return %c0_i32, %c0_i32_0, %c0_i32_1 : i32, i32, i32
  }
  func.func @transform_2(%arg0: i32) -> (i32, i32) {
    %c0_i32 = arith.constant 0 : i32
    %c0_i32_0 = arith.constant 0 : i32
    %c0_i32_1 = arith.constant 0 : i32
    return %c0_i32, %c0_i32_0 : i32, i32
  }
  func.func @transform_3(%arg0: i32) -> (i32, i32, i32) {
    %c0_i32 = arith.constant 0 : i32
    %c0_i32_0 = arith.constant 0 : i32
    %c0_i32_1 = arith.constant 0 : i32
    return %arg0, %c0_i32, %c0_i32_0 : i32, i32, i32
  }
}

module attributes {stable_mosaic.version = 11 : i64} {
  func.func @_conv1d_kernel(%arg0: i32, %arg1: memref<1x10x32xf32, #tpu.memory_space<vmem>>, %arg2: memref<5x32x8xf32, #tpu.memory_space<vmem>>, %arg3: memref<1x8xf32, #tpu.memory_space<vmem>>, %arg4: memref<1x6x8xf32, #tpu.memory_space<vmem>>) attributes {dimension_semantics = [#tpu.dimension_semantics<parallel>], iteration_bounds = array<i64: 2>, scalar_prefetch = 0 : i64, scratch_operands = 0 : i64, tpu.core_type = #tpu.core_type<tc>, window_params = [{transform_indices = @transform_0, window_bounds = array<i64: 1, 10, 32>}, {pipeline_mode = #tpu.pipeline_mode<synchronous>, transform_indices = @transform_1, window_bounds = array<i64: 5, 32, 8>}, {pipeline_mode = #tpu.pipeline_mode<synchronous>, transform_indices = @transform_2, window_bounds = array<i64: 1, 8>}, {transform_indices = @transform_3, window_bounds = array<i64: 1, 6, 8>}]} {
    %c0 = arith.constant 0 : index
    %c0_0 = arith.constant 0 : index
    %c0_1 = arith.constant 0 : index
    %0 = vector.load %arg1[%c0, %c0_0, %c0_1] : memref<1x10x32xf32, #tpu.memory_space<vmem>>, vector<1x10x32xf32>
    %1 = vector.shape_cast %0 : vector<1x10x32xf32> to vector<10x32xf32>
    %cst = arith.constant 0.000000e+00 : f32
    %2 = vector.broadcast %cst : f32 to vector<6x8xf32>
    %c0_2 = arith.constant 0 : index
    %c0_3 = arith.constant 0 : index
    %3 = vector.load %arg3[%c0_2, %c0_3] : memref<1x8xf32, #tpu.memory_space<vmem>>, vector<1x8xf32>
    %4 = vector.broadcast %3 : vector<1x8xf32> to vector<6x8xf32>
    %5 = arith.addf %2, %4 : vector<6x8xf32>
    %6 = vector.extract_strided_slice %1 {offsets = [0, 0], sizes = [6, 32], strides = [1, 1]} : vector<10x32xf32> to vector<6x32xf32>
    %c0_4 = arith.constant 0 : index
    %c0_5 = arith.constant 0 : index
    %c0_6 = arith.constant 0 : index
    %7 = vector.load %arg2[%c0_4, %c0_5, %c0_6] : memref<5x32x8xf32, #tpu.memory_space<vmem>>, vector<1x32x8xf32>
    %8 = vector.shape_cast %7 : vector<1x32x8xf32> to vector<32x8xf32>
    %cst_7 = arith.constant dense<0.000000e+00> : vector<6x8xf32>
    %9 = tpu.matmul %6, %8, %cst_7 {dimension_numbers = #tpu.dot_dimension_numbers<[1], [0], [0], [1], [0, 0, 1, 1], [], []>} : vector<6x32xf32>, vector<32x8xf32>, vector<6x8xf32> -> vector<6x8xf32>
    %10 = arith.addf %5, %9 : vector<6x8xf32>
    %11 = vector.extract_strided_slice %1 {offsets = [1, 0], sizes = [6, 32], strides = [1, 1]} : vector<10x32xf32> to vector<6x32xf32>
    %c1 = arith.constant 1 : index
    %c0_8 = arith.constant 0 : index
    %c0_9 = arith.constant 0 : index
    %12 = vector.load %arg2[%c1, %c0_8, %c0_9] : memref<5x32x8xf32, #tpu.memory_space<vmem>>, vector<1x32x8xf32>
    %13 = vector.shape_cast %12 : vector<1x32x8xf32> to vector<32x8xf32>
    %cst_10 = arith.constant dense<0.000000e+00> : vector<6x8xf32>
    %14 = tpu.matmul %11, %13, %cst_10 {dimension_numbers = #tpu.dot_dimension_numbers<[1], [0], [0], [1], [0, 0, 1, 1], [], []>} : vector<6x32xf32>, vector<32x8xf32>, vector<6x8xf32> -> vector<6x8xf32>
    %15 = arith.addf %10, %14 : vector<6x8xf32>
    %16 = vector.extract_strided_slice %1 {offsets = [2, 0], sizes = [6, 32], strides = [1, 1]} : vector<10x32xf32> to vector<6x32xf32>
    %c2 = arith.constant 2 : index
    %c0_11 = arith.constant 0 : index
    %c0_12 = arith.constant 0 : index
    %17 = vector.load %arg2[%c2, %c0_11, %c0_12] : memref<5x32x8xf32, #tpu.memory_space<vmem>>, vector<1x32x8xf32>
    %18 = vector.shape_cast %17 : vector<1x32x8xf32> to vector<32x8xf32>
    %cst_13 = arith.constant dense<0.000000e+00> : vector<6x8xf32>
    %19 = tpu.matmul %16, %18, %cst_13 {dimension_numbers = #tpu.dot_dimension_numbers<[1], [0], [0], [1], [0, 0, 1, 1], [], []>} : vector<6x32xf32>, vector<32x8xf32>, vector<6x8xf32> -> vector<6x8xf32>
    %20 = arith.addf %15, %19 : vector<6x8xf32>
    %21 = vector.extract_strided_slice %1 {offsets = [3, 0], sizes = [6, 32], strides = [1, 1]} : vector<10x32xf32> to vector<6x32xf32>
    %c3 = arith.constant 3 : index
    %c0_14 = arith.constant 0 : index
    %c0_15 = arith.constant 0 : index
    %22 = vector.load %arg2[%c3, %c0_14, %c0_15] : memref<5x32x8xf32, #tpu.memory_space<vmem>>, vector<1x32x8xf32>
    %23 = vector.shape_cast %22 : vector<1x32x8xf32> to vector<32x8xf32>
    %cst_16 = arith.constant dense<0.000000e+00> : vector<6x8xf32>
    %24 = tpu.matmul %21, %23, %cst_16 {dimension_numbers = #tpu.dot_dimension_numbers<[1], [0], [0], [1], [0, 0, 1, 1], [], []>} : vector<6x32xf32>, vector<32x8xf32>, vector<6x8xf32> -> vector<6x8xf32>
    %25 = arith.addf %20, %24 : vector<6x8xf32>
    %26 = vector.extract_strided_slice %1 {offsets = [4, 0], sizes = [6, 32], strides = [1, 1]} : vector<10x32xf32> to vector<6x32xf32>
    %c4 = arith.constant 4 : index
    %c0_17 = arith.constant 0 : index
    %c0_18 = arith.constant 0 : index
    %27 = vector.load %arg2[%c4, %c0_17, %c0_18] : memref<5x32x8xf32, #tpu.memory_space<vmem>>, vector<1x32x8xf32>
    %28 = vector.shape_cast %27 : vector<1x32x8xf32> to vector<32x8xf32>
    %cst_19 = arith.constant dense<0.000000e+00> : vector<6x8xf32>
    %29 = tpu.matmul %26, %28, %cst_19 {dimension_numbers = #tpu.dot_dimension_numbers<[1], [0], [0], [1], [0, 0, 1, 1], [], []>} : vector<6x32xf32>, vector<32x8xf32>, vector<6x8xf32> -> vector<6x8xf32>
    %30 = arith.addf %25, %29 : vector<6x8xf32>
    %c0_20 = arith.constant 0 : index
    %c0_21 = arith.constant 0 : index
    %c0_22 = arith.constant 0 : index
    %31 = vector.load %arg4[%c0_20, %c0_21, %c0_22] : memref<1x6x8xf32, #tpu.memory_space<vmem>>, vector<1x6x8xf32>
    %32 = vector.shape_cast %31 : vector<1x6x8xf32> to vector<6x8xf32>
    %33 = vector.shape_cast %30 : vector<6x8xf32> to vector<1x6x8xf32>
    tpu.vector_store %arg4[%c0_20, %c0_21, %c0_22], %33 {strides = array<i32>} : memref<1x6x8xf32, #tpu.memory_space<vmem>>, vector<1x6x8xf32>,
    return
  }
  func.func @transform_0(%arg0: i32) -> (i32, i32, i32) {
    %c0_i32 = arith.constant 0 : i32
    %c0_i32_0 = arith.constant 0 : i32
    %c0_i32_1 = arith.constant 0 : i32
    return %arg0, %c0_i32, %c0_i32_0 : i32, i32, i32
  }
  func.func @transform_1(%arg0: i32) -> (i32, i32, i32) {
    %c0_i32 = arith.constant 0 : i32
    %c0_i32_0 = arith.constant 0 : i32
    %c0_i32_1 = arith.constant 0 : i32
    %c0_i32_2 = arith.constant 0 : i32
    return %c0_i32, %c0_i32_0, %c0_i32_1 : i32, i32, i32
  }
  func.func @transform_2(%arg0: i32) -> (i32, i32) {
    %c0_i32 = arith.constant 0 : i32
    %c0_i32_0 = arith.constant 0 : i32
    %c0_i32_1 = arith.constant 0 : i32
    return %c0_i32, %c0_i32_0 : i32, i32
  }
  func.func @transform_3(%arg0: i32) -> (i32, i32, i32) {
    %c0_i32 = arith.constant 0 : i32
    %c0_i32_0 = arith.constant 0 : i32
    %c0_i32_1 = arith.constant 0 : i32
    return %arg0, %c0_i32, %c0_i32_0 : i32, i32, i32
  }
}

module attributes {stable_mosaic.version = 11 : i64} {
  func.func @kernel(%arg0: i32, %arg1: memref<1x2x8xf32, #tpu.memory_space<vmem>>, %arg2: memref<2x8x32xf32, #tpu.memory_space<vmem>>, %arg3: memref<2x8x16xf32, #tpu.memory_space<vmem>>, %arg4: memref<2x8xf32, #tpu.memory_space<vmem>>, %arg5: memref<8x32xf32, #tpu.memory_space<vmem>>, %arg6: memref<32x16xf32, #tpu.memory_space<vmem>>, %arg7: memref<1x32xf32, #tpu.memory_space<vmem>>, %arg8: memref<1x16xf32, #tpu.memory_space<vmem>>, %arg9: memref<16x128xf32, #tpu.memory_space<vmem>>, %arg10: memref<32x128xf32, #tpu.memory_space<vmem>>, %arg11: memref<32x128xf32, #tpu.memory_space<vmem>>, %arg12: memref<1x128xf32, #tpu.memory_space<vmem>>, %arg13: memref<32x16xf32, #tpu.memory_space<vmem>>, %arg14: memref<5x1x16xf32, #tpu.memory_space<vmem>>, %arg15: memref<1x16xf32, #tpu.memory_space<vmem>>, %arg16: memref<32x128xf32, #tpu.memory_space<vmem>>, %arg17: memref<32x128xf32, #tpu.memory_space<vmem>>, %arg18: memref<32x128xf32, #tpu.memory_space<vmem>>, %arg19: memref<1x128xf32, #tpu.memory_space<vmem>>, %arg20: memref<32x9xf32, #tpu.memory_space<vmem>>, %arg21: memref<32x9xf32, #tpu.memory_space<vmem>>, %arg22: memref<1x9xf32, #tpu.memory_space<vmem>>, %arg23: memref<1x2x8xf32, #tpu.memory_space<vmem>>, %arg24: memref<1x2x1xf32, #tpu.memory_space<vmem>>, %arg25: memref<1x2x8xf32, #tpu.memory_space<vmem>>, %arg26: memref<2x32xf32, #tpu.memory_space<vmem>>, %arg27: memref<2x32xf32, #tpu.memory_space<vmem>>, %arg28: memref<2x32xf32, #tpu.memory_space<vmem>>, %arg29: memref<2x32xf32, #tpu.memory_space<vmem>>, %arg30: memref<2x32xf32, #tpu.memory_space<vmem>>, %arg31: memref<2x8xf32, #tpu.memory_space<vmem>>) attributes {dimension_semantics = [#tpu.dimension_semantics<arbitrary>], iteration_bounds = array<i64: 6>, scalar_prefetch = 0 : i64, scratch_operands = 6 : i64, tpu.core_type = #tpu.core_type<tc>, window_params = [{transform_indices = @transform_0, window_bounds = array<i64: 1, 2, 8>}, {pipeline_mode = #tpu.pipeline_mode<synchronous>, transform_indices = @transform_1, window_bounds = array<i64: 2, 8, 32>}, {pipeline_mode = #tpu.pipeline_mode<synchronous>, transform_indices = @transform_2, window_bounds = array<i64: 2, 8, 16>}, {pipeline_mode = #tpu.pipeline_mode<synchronous>, transform_indices = @transform_3, window_bounds = array<i64: 2, 8>}, {pipeline_mode = #tpu.pipeline_mode<synchronous>, transform_indices = @transform_4, window_bounds = array<i64: 8, 32>}, {pipeline_mode = #tpu.pipeline_mode<synchronous>, transform_indices = @transform_5, window_bounds = array<i64: 32, 16>}, {pipeline_mode = #tpu.pipeline_mode<synchronous>, transform_indices = @transform_6, window_bounds = array<i64: 1, 32>}, {pipeline_mode = #tpu.pipeline_mode<synchronous>, transform_indices = @transform_7, window_bounds = array<i64: 1, 16>}, {pipeline_mode = #tpu.pipeline_mode<synchronous>, transform_indices = @transform_8, window_bounds = array<i64: 16, 128>}, {pipeline_mode = #tpu.pipeline_mode<synchronous>, transform_indices = @transform_9, window_bounds = array<i64: 32, 128>}, {pipeline_mode = #tpu.pipeline_mode<synchronous>, transform_indices = @transform_10, window_bounds = array<i64: 32, 128>}, {pipeline_mode = #tpu.pipeline_mode<synchronous>, transform_indices = @transform_11, window_bounds = array<i64: 1, 128>}, {pipeline_mode = #tpu.pipeline_mode<synchronous>, transform_indices = @transform_12, window_bounds = array<i64: 32, 16>}, {pipeline_mode = #tpu.pipeline_mode<synchronous>, transform_indices = @transform_13, window_bounds = array<i64: 5, 1, 16>}, {pipeline_mode = #tpu.pipeline_mode<synchronous>, transform_indices = @transform_14, window_bounds = array<i64: 1, 16>}, {pipeline_mode = #tpu.pipeline_mode<synchronous>, transform_indices = @transform_15, window_bounds = array<i64: 32, 128>}, {pipeline_mode = #tpu.pipeline_mode<synchronous>, transform_indices = @transform_16, window_bounds = array<i64: 32, 128>}, {pipeline_mode = #tpu.pipeline_mode<synchronous>, transform_indices = @transform_17, window_bounds = array<i64: 32, 128>}, {pipeline_mode = #tpu.pipeline_mode<synchronous>, transform_indices = @transform_18, window_bounds = array<i64: 1, 128>}, {pipeline_mode = #tpu.pipeline_mode<synchronous>, transform_indices = @transform_19, window_bounds = array<i64: 32, 9>}, {pipeline_mode = #tpu.pipeline_mode<synchronous>, transform_indices = @transform_20, window_bounds = array<i64: 32, 9>}, {pipeline_mode = #tpu.pipeline_mode<synchronous>, transform_indices = @transform_21, window_bounds = array<i64: 1, 9>}, {transform_indices = @transform_22, window_bounds = array<i64: 1, 2, 8>}, {transform_indices = @transform_23, window_bounds = array<i64: 1, 2, 1>}, {transform_indices = @transform_24, window_bounds = array<i64: 1, 2, 8>}]} {
    %c0_i32 = arith.constant 0 : i32
    %0 = arith.cmpi eq, %arg0, %c0_i32 : i32
    %1 = arith.extui %0 : i1 to i32
    %c0_i32_0 = arith.constant 0 : i32
    %2 = arith.cmpi ne, %1, %c0_i32_0 : i32
    scf.if %2 {
      %cst_114 = arith.constant 0.000000e+00 : f32
      %205 = vector.broadcast %cst_114 : f32 to vector<2x32xf32>
      %c0_115 = arith.constant 0 : index
      %c0_116 = arith.constant 0 : index
      %206 = vector.load %arg26[%c0_115, %c0_116] : memref<2x32xf32, #tpu.memory_space<vmem>>, vector<2x32xf32>
      tpu.vector_store %arg26[%c0_115, %c0_116], %205 {strides = array<i32>} : memref<2x32xf32, #tpu.memory_space<vmem>>, vector<2x32xf32>,
      %cst_117 = arith.constant 0.000000e+00 : f32
      %207 = vector.broadcast %cst_117 : f32 to vector<2x32xf32>
      %c0_118 = arith.constant 0 : index
      %c0_119 = arith.constant 0 : index
      %208 = vector.load %arg27[%c0_118, %c0_119] : memref<2x32xf32, #tpu.memory_space<vmem>>, vector<2x32xf32>
      tpu.vector_store %arg27[%c0_118, %c0_119], %207 {strides = array<i32>} : memref<2x32xf32, #tpu.memory_space<vmem>>, vector<2x32xf32>,
      %cst_120 = arith.constant 0.000000e+00 : f32
      %209 = vector.broadcast %cst_120 : f32 to vector<2x32xf32>
      %c0_121 = arith.constant 0 : index
      %c0_122 = arith.constant 0 : index
      %210 = vector.load %arg28[%c0_121, %c0_122] : memref<2x32xf32, #tpu.memory_space<vmem>>, vector<2x32xf32>
      tpu.vector_store %arg28[%c0_121, %c0_122], %209 {strides = array<i32>} : memref<2x32xf32, #tpu.memory_space<vmem>>, vector<2x32xf32>,
      %cst_123 = arith.constant 0.000000e+00 : f32
      %211 = vector.broadcast %cst_123 : f32 to vector<2x32xf32>
      %c0_124 = arith.constant 0 : index
      %c0_125 = arith.constant 0 : index
      %212 = vector.load %arg29[%c0_124, %c0_125] : memref<2x32xf32, #tpu.memory_space<vmem>>, vector<2x32xf32>
      tpu.vector_store %arg29[%c0_124, %c0_125], %211 {strides = array<i32>} : memref<2x32xf32, #tpu.memory_space<vmem>>, vector<2x32xf32>,
      %cst_126 = arith.constant 0.000000e+00 : f32
      %213 = vector.broadcast %cst_126 : f32 to vector<2x32xf32>
      %c0_127 = arith.constant 0 : index
      %c0_128 = arith.constant 0 : index
      %214 = vector.load %arg30[%c0_127, %c0_128] : memref<2x32xf32, #tpu.memory_space<vmem>>, vector<2x32xf32>
      tpu.vector_store %arg30[%c0_127, %c0_128], %213 {strides = array<i32>} : memref<2x32xf32, #tpu.memory_space<vmem>>, vector<2x32xf32>,
      %cst_129 = arith.constant 0.000000e+00 : f32
      %215 = vector.broadcast %cst_129 : f32 to vector<2x8xf32>
      %c0_130 = arith.constant 0 : index
      %c0_131 = arith.constant 0 : index
      %216 = vector.load %arg31[%c0_130, %c0_131] : memref<2x8xf32, #tpu.memory_space<vmem>>, vector<2x8xf32>
      tpu.vector_store %arg31[%c0_130, %c0_131], %215 {strides = array<i32>} : memref<2x8xf32, #tpu.memory_space<vmem>>, vector<2x8xf32>,
    } else {
    }
    %c0 = arith.constant 0 : index
    %c0_1 = arith.constant 0 : index
    %c0_2 = arith.constant 0 : index
    %3 = vector.load %arg1[%c0, %c0_1, %c0_2] : memref<1x2x8xf32, #tpu.memory_space<vmem>>, vector<1x2x8xf32>
    %4 = vector.shape_cast %3 : vector<1x2x8xf32> to vector<2x8xf32>
    %c0_3 = arith.constant 0 : index
    %c0_4 = arith.constant 0 : index
    %5 = vector.load %arg5[%c0_3, %c0_4] : memref<8x32xf32, #tpu.memory_space<vmem>>, vector<8x32xf32>
    %cst = arith.constant dense<0.000000e+00> : vector<2x32xf32>
    %6 = tpu.matmul %4, %5, %cst {dimension_numbers = #tpu.dot_dimension_numbers<[1], [0], [0], [1], [0, 0, 1, 1], [], []>} : vector<2x8xf32>, vector<8x32xf32>, vector<2x32xf32> -> vector<2x32xf32>
    %c0_5 = arith.constant 0 : index
    %c0_6 = arith.constant 0 : index
    %7 = vector.load %arg7[%c0_5, %c0_6] : memref<1x32xf32, #tpu.memory_space<vmem>>, vector<1x32xf32>
    %8 = vector.broadcast %7 : vector<1x32xf32> to vector<2x32xf32>
    %9 = arith.addf %6, %8 : vector<2x32xf32>
    %cst_7 = arith.constant 0.000000e+00 : f32
    %10 = vector.broadcast %cst_7 : f32 to vector<2x32xf32>
    %11 = arith.maximumf %9, %10 : vector<2x32xf32>
    %c0_8 = arith.constant 0 : index
    %c0_9 = arith.constant 0 : index
    %12 = vector.load %arg6[%c0_8, %c0_9] : memref<32x16xf32, #tpu.memory_space<vmem>>, vector<32x16xf32>
    %cst_10 = arith.constant dense<0.000000e+00> : vector<2x16xf32>
    %13 = tpu.matmul %11, %12, %cst_10 {dimension_numbers = #tpu.dot_dimension_numbers<[1], [0], [0], [1], [0, 0, 1, 1], [], []>} : vector<2x32xf32>, vector<32x16xf32>, vector<2x16xf32> -> vector<2x16xf32>
    %c0_11 = arith.constant 0 : index
    %c0_12 = arith.constant 0 : index
    %14 = vector.load %arg8[%c0_11, %c0_12] : memref<1x16xf32, #tpu.memory_space<vmem>>, vector<1x16xf32>
    %15 = vector.broadcast %14 : vector<1x16xf32> to vector<2x16xf32>
    %16 = arith.addf %13, %15 : vector<2x16xf32>
    %cst_13 = arith.constant 0.000000e+00 : f32
    %17 = vector.broadcast %cst_13 : f32 to vector<2x16xf32>
    %18 = arith.maximumf %16, %17 : vector<2x16xf32>
    %c0_14 = arith.constant 0 : index
    %c0_15 = arith.constant 0 : index
    %19 = vector.load %arg30[%c0_14, %c0_15] : memref<2x32xf32, #tpu.memory_space<vmem>>, vector<2x32xf32>
    %c0_16 = arith.constant 0 : index
    %c0_17 = arith.constant 0 : index
    %20 = vector.load %arg26[%c0_16, %c0_17] : memref<2x32xf32, #tpu.memory_space<vmem>>, vector<2x32xf32>
    %c0_18 = arith.constant 0 : index
    %c0_19 = arith.constant 0 : index
    %21 = vector.load %arg9[%c0_18, %c0_19] : memref<16x128xf32, #tpu.memory_space<vmem>>, vector<16x128xf32>
    %cst_20 = arith.constant dense<0.000000e+00> : vector<2x128xf32>
    %22 = tpu.matmul %18, %21, %cst_20 {dimension_numbers = #tpu.dot_dimension_numbers<[1], [0], [0], [1], [0, 0, 1, 1], [], []>} : vector<2x16xf32>, vector<16x128xf32>, vector<2x128xf32> -> vector<2x128xf32>
    %c0_21 = arith.constant 0 : index
    %c0_22 = arith.constant 0 : index
    %23 = vector.load %arg10[%c0_21, %c0_22] : memref<32x128xf32, #tpu.memory_space<vmem>>, vector<32x128xf32>
    %cst_23 = arith.constant dense<0.000000e+00> : vector<2x128xf32>
    %24 = tpu.matmul %19, %23, %cst_23 {dimension_numbers = #tpu.dot_dimension_numbers<[1], [0], [0], [1], [0, 0, 1, 1], [], []>} : vector<2x32xf32>, vector<32x128xf32>, vector<2x128xf32> -> vector<2x128xf32>
    %25 = arith.addf %22, %24 : vector<2x128xf32>
    %c0_24 = arith.constant 0 : index
    %c0_25 = arith.constant 0 : index
    %26 = vector.load %arg11[%c0_24, %c0_25] : memref<32x128xf32, #tpu.memory_space<vmem>>, vector<32x128xf32>
    %cst_26 = arith.constant dense<0.000000e+00> : vector<2x128xf32>
    %27 = tpu.matmul %20, %26, %cst_26 {dimension_numbers = #tpu.dot_dimension_numbers<[1], [0], [0], [1], [0, 0, 1, 1], [], []>} : vector<2x32xf32>, vector<32x128xf32>, vector<2x128xf32> -> vector<2x128xf32>
    %28 = arith.addf %25, %27 : vector<2x128xf32>
    %c0_27 = arith.constant 0 : index
    %c0_28 = arith.constant 0 : index
    %29 = vector.load %arg12[%c0_27, %c0_28] : memref<1x128xf32, #tpu.memory_space<vmem>>, vector<1x128xf32>
    %30 = vector.broadcast %29 : vector<1x128xf32> to vector<2x128xf32>
    %31 = arith.addf %28, %30 : vector<2x128xf32>
    %32 = vector.extract_strided_slice %31 {offsets = [0, 0], sizes = [2, 32], strides = [1, 1]} : vector<2x128xf32> to vector<2x32xf32>
    %33 = arith.negf %32 : vector<2x32xf32>
    %34 = math.exp %33 : vector<2x32xf32>
    %cst_29 = arith.constant 1.000000e+00 : f32
    %35 = vector.broadcast %cst_29 : f32 to vector<2x32xf32>
    %36 = arith.addf %35, %34 : vector<2x32xf32>
    %37 = arith.divf %35, %36 : vector<2x32xf32>
    %38 = vector.extract_strided_slice %31 {offsets = [0, 32], sizes = [2, 32], strides = [1, 1]} : vector<2x128xf32> to vector<2x32xf32>
    %39 = arith.negf %38 : vector<2x32xf32>
    %40 = math.exp %39 : vector<2x32xf32>
    %cst_30 = arith.constant 1.000000e+00 : f32
    %41 = vector.broadcast %cst_30 : f32 to vector<2x32xf32>
    %42 = arith.addf %41, %40 : vector<2x32xf32>
    %43 = arith.divf %41, %42 : vector<2x32xf32>
    %44 = vector.extract_strided_slice %31 {offsets = [0, 64], sizes = [2, 32], strides = [1, 1]} : vector<2x128xf32> to vector<2x32xf32>
    %45 = math.tanh %44 : vector<2x32xf32>
    %46 = vector.extract_strided_slice %31 {offsets = [0, 96], sizes = [2, 32], strides = [1, 1]} : vector<2x128xf32> to vector<2x32xf32>
    %47 = arith.negf %46 : vector<2x32xf32>
    %48 = math.exp %47 : vector<2x32xf32>
    %cst_31 = arith.constant 1.000000e+00 : f32
    %49 = vector.broadcast %cst_31 : f32 to vector<2x32xf32>
    %50 = arith.addf %49, %48 : vector<2x32xf32>
    %51 = arith.divf %49, %50 : vector<2x32xf32>
    %c0_32 = arith.constant 0 : index
    %c0_33 = arith.constant 0 : index
    %52 = vector.load %arg27[%c0_32, %c0_33] : memref<2x32xf32, #tpu.memory_space<vmem>>, vector<2x32xf32>
    %53 = arith.mulf %43, %52 : vector<2x32xf32>
    %54 = arith.mulf %37, %45 : vector<2x32xf32>
    %55 = arith.addf %53, %54 : vector<2x32xf32>
    %56 = math.tanh %55 : vector<2x32xf32>
    %57 = arith.mulf %51, %56 : vector<2x32xf32>
    %c0_34 = arith.constant 0 : index
    %c0_35 = arith.constant 0 : index
    %58 = vector.load %arg26[%c0_34, %c0_35] : memref<2x32xf32, #tpu.memory_space<vmem>>, vector<2x32xf32>
    tpu.vector_store %arg26[%c0_34, %c0_35], %57 {strides = array<i32>} : memref<2x32xf32, #tpu.memory_space<vmem>>, vector<2x32xf32>,
    %c0_36 = arith.constant 0 : index
    %c0_37 = arith.constant 0 : index
    %59 = vector.load %arg27[%c0_36, %c0_37] : memref<2x32xf32, #tpu.memory_space<vmem>>, vector<2x32xf32>
    tpu.vector_store %arg27[%c0_36, %c0_37], %55 {strides = array<i32>} : memref<2x32xf32, #tpu.memory_space<vmem>>, vector<2x32xf32>,
    %c0_38 = arith.constant 0 : index
    %c0_39 = arith.constant 0 : index
    %60 = vector.load %arg13[%c0_38, %c0_39] : memref<32x16xf32, #tpu.memory_space<vmem>>, vector<32x16xf32>
    %cst_40 = arith.constant dense<0.000000e+00> : vector<2x16xf32>
    %61 = tpu.matmul %57, %60, %cst_40 {dimension_numbers = #tpu.dot_dimension_numbers<[1], [0], [0], [1], [0, 0, 1, 1], [], []>} : vector<2x32xf32>, vector<32x16xf32>, vector<2x16xf32> -> vector<2x16xf32>
    %c0_41 = arith.constant 0 : index
    %c0_42 = arith.constant 0 : index
    %62 = vector.load %arg31[%c0_41, %c0_42] : memref<2x8xf32, #tpu.memory_space<vmem>>, vector<2x8xf32>
    %cst_43 = arith.constant 0.000000e+00 : f32
    %63 = vector.broadcast %cst_43 : f32 to vector<2x2xf32>
    %64 = tpu.concatenate %63, %62, %63 in 1 : vector<2x2xf32>, vector<2x8xf32>, vector<2x2xf32> -> vector<2x12xf32>
    %cst_44 = arith.constant 0.000000e+00 : f32
    %65 = vector.broadcast %cst_44 : f32 to vector<2x8x16xf32>
    %66 = vector.extract_strided_slice %64 {offsets = [0, 0], sizes = [2, 8], strides = [1, 1]} : vector<2x12xf32> to vector<2x8xf32>
    %67 = vector.shape_cast %66 : vector<2x8xf32> to vector<2x8x1xf32>
    %c0_45 = arith.constant 0 : index
    %c0_46 = arith.constant 0 : index
    %c0_47 = arith.constant 0 : index
    %68 = vector.load %arg14[%c0_45, %c0_46, %c0_47] : memref<5x1x16xf32, #tpu.memory_space<vmem>>, vector<1x1x16xf32>
    %69 = vector.shape_cast %68 : vector<1x1x16xf32> to vector<1x16xf32>
    %70 = vector.shape_cast %69 : vector<1x16xf32> to vector<1x1x16xf32>
    %71 = vector.broadcast %67 : vector<2x8x1xf32> to vector<2x8x16xf32>
    %72 = vector.broadcast %70 : vector<1x1x16xf32> to vector<2x8x16xf32>
    %73 = arith.mulf %71, %72 : vector<2x8x16xf32>
    %74 = arith.addf %65, %73 : vector<2x8x16xf32>
    %75 = vector.extract_strided_slice %64 {offsets = [0, 1], sizes = [2, 8], strides = [1, 1]} : vector<2x12xf32> to vector<2x8xf32>
    %76 = vector.shape_cast %75 : vector<2x8xf32> to vector<2x8x1xf32>
    %c1 = arith.constant 1 : index
    %c0_48 = arith.constant 0 : index
    %c0_49 = arith.constant 0 : index
    %77 = vector.load %arg14[%c1, %c0_48, %c0_49] : memref<5x1x16xf32, #tpu.memory_space<vmem>>, vector<1x1x16xf32>
    %78 = vector.shape_cast %77 : vector<1x1x16xf32> to vector<1x16xf32>
    %79 = vector.shape_cast %78 : vector<1x16xf32> to vector<1x1x16xf32>
    %80 = vector.broadcast %76 : vector<2x8x1xf32> to vector<2x8x16xf32>
    %81 = vector.broadcast %79 : vector<1x1x16xf32> to vector<2x8x16xf32>
    %82 = arith.mulf %80, %81 : vector<2x8x16xf32>
    %83 = arith.addf %74, %82 : vector<2x8x16xf32>
    %84 = vector.extract_strided_slice %64 {offsets = [0, 2], sizes = [2, 8], strides = [1, 1]} : vector<2x12xf32> to vector<2x8xf32>
    %85 = vector.shape_cast %84 : vector<2x8xf32> to vector<2x8x1xf32>
    %c2 = arith.constant 2 : index
    %c0_50 = arith.constant 0 : index
    %c0_51 = arith.constant 0 : index
    %86 = vector.load %arg14[%c2, %c0_50, %c0_51] : memref<5x1x16xf32, #tpu.memory_space<vmem>>, vector<1x1x16xf32>
    %87 = vector.shape_cast %86 : vector<1x1x16xf32> to vector<1x16xf32>
    %88 = vector.shape_cast %87 : vector<1x16xf32> to vector<1x1x16xf32>
    %89 = vector.broadcast %85 : vector<2x8x1xf32> to vector<2x8x16xf32>
    %90 = vector.broadcast %88 : vector<1x1x16xf32> to vector<2x8x16xf32>
    %91 = arith.mulf %89, %90 : vector<2x8x16xf32>
    %92 = arith.addf %83, %91 : vector<2x8x16xf32>
    %93 = vector.extract_strided_slice %64 {offsets = [0, 3], sizes = [2, 8], strides = [1, 1]} : vector<2x12xf32> to vector<2x8xf32>
    %94 = vector.shape_cast %93 : vector<2x8xf32> to vector<2x8x1xf32>
    %c3 = arith.constant 3 : index
    %c0_52 = arith.constant 0 : index
    %c0_53 = arith.constant 0 : index
    %95 = vector.load %arg14[%c3, %c0_52, %c0_53] : memref<5x1x16xf32, #tpu.memory_space<vmem>>, vector<1x1x16xf32>
    %96 = vector.shape_cast %95 : vector<1x1x16xf32> to vector<1x16xf32>
    %97 = vector.shape_cast %96 : vector<1x16xf32> to vector<1x1x16xf32>
    %98 = vector.broadcast %94 : vector<2x8x1xf32> to vector<2x8x16xf32>
    %99 = vector.broadcast %97 : vector<1x1x16xf32> to vector<2x8x16xf32>
    %100 = arith.mulf %98, %99 : vector<2x8x16xf32>
    %101 = arith.addf %92, %100 : vector<2x8x16xf32>
    %102 = vector.extract_strided_slice %64 {offsets = [0, 4], sizes = [2, 8], strides = [1, 1]} : vector<2x12xf32> to vector<2x8xf32>
    %103 = vector.shape_cast %102 : vector<2x8xf32> to vector<2x8x1xf32>
    %c4 = arith.constant 4 : index
    %c0_54 = arith.constant 0 : index
    %c0_55 = arith.constant 0 : index
    %104 = vector.load %arg14[%c4, %c0_54, %c0_55] : memref<5x1x16xf32, #tpu.memory_space<vmem>>, vector<1x1x16xf32>
    %105 = vector.shape_cast %104 : vector<1x1x16xf32> to vector<1x16xf32>
    %106 = vector.shape_cast %105 : vector<1x16xf32> to vector<1x1x16xf32>
    %107 = vector.broadcast %103 : vector<2x8x1xf32> to vector<2x8x16xf32>
    %108 = vector.broadcast %106 : vector<1x1x16xf32> to vector<2x8x16xf32>
    %109 = arith.mulf %107, %108 : vector<2x8x16xf32>
    %110 = arith.addf %101, %109 : vector<2x8x16xf32>
    %111 = vector.shape_cast %61 : vector<2x16xf32> to vector<2x1x16xf32>
    %c0_56 = arith.constant 0 : index
    %c0_57 = arith.constant 0 : index
    %c0_58 = arith.constant 0 : index
    %112 = vector.load %arg3[%c0_56, %c0_57, %c0_58] : memref<2x8x16xf32, #tpu.memory_space<vmem>>, vector<2x8x16xf32>
    %113 = vector.broadcast %111 : vector<2x1x16xf32> to vector<2x8x16xf32>
    %114 = arith.addf %113, %112 : vector<2x8x16xf32>
    %115 = arith.addf %114, %110 : vector<2x8x16xf32>
    %116 = math.tanh %115 : vector<2x8x16xf32>
    %c0_59 = arith.constant 0 : index
    %c0_60 = arith.constant 0 : index
    %117 = vector.load %arg15[%c0_59, %c0_60] : memref<1x16xf32, #tpu.memory_space<vmem>>, vector<1x16xf32>
    %118 = vector.shape_cast %117 : vector<1x16xf32> to vector<1x1x16xf32>
    %119 = vector.broadcast %118 : vector<1x1x16xf32> to vector<2x8x16xf32>
    %120 = arith.mulf %116, %119 : vector<2x8x16xf32>
    %cst_61 = arith.constant dense<0.000000e+00> : vector<2x8xf32>
    %121 = vector.multi_reduction <add>, %120, %cst_61 [2] : vector<2x8x16xf32> to vector<2x8xf32>
    %c0_62 = arith.constant 0 : index
    %c0_63 = arith.constant 0 : index
    %122 = vector.load %arg4[%c0_62, %c0_63] : memref<2x8xf32, #tpu.memory_space<vmem>>, vector<2x8xf32>
    %123 = arith.addf %121, %122 : vector<2x8xf32>
    %cst_64 = arith.constant dense<0xFF800000> : vector<2xf32>
    %124 = vector.multi_reduction <maximumf>, %123, %cst_64 [1] : vector<2x8xf32> to vector<2xf32>
    %125 = vector.shape_cast %124 : vector<2xf32> to vector<2x1xf32>
    %126 = vector.broadcast %125 : vector<2x1xf32> to vector<2x8xf32>
    %127 = arith.subf %123, %126 : vector<2x8xf32>
    %128 = math.exp %127 : vector<2x8xf32>
    %cst_65 = arith.constant dense<0.000000e+00> : vector<2xf32>
    %129 = vector.multi_reduction <add>, %128, %cst_65 [1] : vector<2x8xf32> to vector<2xf32>
    %130 = vector.shape_cast %129 : vector<2xf32> to vector<2x1xf32>
    %131 = vector.broadcast %130 : vector<2x1xf32> to vector<2x8xf32>
    %132 = arith.divf %128, %131 : vector<2x8xf32>
    %133 = vector.shape_cast %132 : vector<2x8xf32> to vector<2x8x1xf32>
    %c0_66 = arith.constant 0 : index
    %c0_67 = arith.constant 0 : index
    %c0_68 = arith.constant 0 : index
    %134 = vector.load %arg2[%c0_66, %c0_67, %c0_68] : memref<2x8x32xf32, #tpu.memory_space<vmem>>, vector<2x8x32xf32>
    %135 = vector.broadcast %133 : vector<2x8x1xf32> to vector<2x8x32xf32>
    %136 = arith.mulf %135, %134 : vector<2x8x32xf32>
    %cst_69 = arith.constant dense<0.000000e+00> : vector<2x32xf32>
    %137 = vector.multi_reduction <add>, %136, %cst_69 [1] : vector<2x8x32xf32> to vector<2x32xf32>
    %c0_70 = arith.constant 0 : index
    %c0_71 = arith.constant 0 : index
    %138 = vector.load %arg30[%c0_70, %c0_71] : memref<2x32xf32, #tpu.memory_space<vmem>>, vector<2x32xf32>
    tpu.vector_store %arg30[%c0_70, %c0_71], %137 {strides = array<i32>} : memref<2x32xf32, #tpu.memory_space<vmem>>, vector<2x32xf32>,
    %139 = arith.addf %62, %132 : vector<2x8xf32>
    %c0_72 = arith.constant 0 : index
    %c0_73 = arith.constant 0 : index
    %140 = vector.load %arg31[%c0_72, %c0_73] : memref<2x8xf32, #tpu.memory_space<vmem>>, vector<2x8xf32>
    tpu.vector_store %arg31[%c0_72, %c0_73], %139 {strides = array<i32>} : memref<2x8xf32, #tpu.memory_space<vmem>>, vector<2x8xf32>,
    %c0_74 = arith.constant 0 : index
    %c0_75 = arith.constant 0 : index
    %141 = vector.load %arg28[%c0_74, %c0_75] : memref<2x32xf32, #tpu.memory_space<vmem>>, vector<2x32xf32>
    %c0_76 = arith.constant 0 : index
    %c0_77 = arith.constant 0 : index
    %142 = vector.load %arg16[%c0_76, %c0_77] : memref<32x128xf32, #tpu.memory_space<vmem>>, vector<32x128xf32>
    %cst_78 = arith.constant dense<0.000000e+00> : vector<2x128xf32>
    %143 = tpu.matmul %57, %142, %cst_78 {dimension_numbers = #tpu.dot_dimension_numbers<[1], [0], [0], [1], [0, 0, 1, 1], [], []>} : vector<2x32xf32>, vector<32x128xf32>, vector<2x128xf32> -> vector<2x128xf32>
    %c0_79 = arith.constant 0 : index
    %c0_80 = arith.constant 0 : index
    %144 = vector.load %arg17[%c0_79, %c0_80] : memref<32x128xf32, #tpu.memory_space<vmem>>, vector<32x128xf32>
    %cst_81 = arith.constant dense<0.000000e+00> : vector<2x128xf32>
    %145 = tpu.matmul %137, %144, %cst_81 {dimension_numbers = #tpu.dot_dimension_numbers<[1], [0], [0], [1], [0, 0, 1, 1], [], []>} : vector<2x32xf32>, vector<32x128xf32>, vector<2x128xf32> -> vector<2x128xf32>
    %146 = arith.addf %143, %145 : vector<2x128xf32>
    %c0_82 = arith.constant 0 : index
    %c0_83 = arith.constant 0 : index
    %147 = vector.load %arg18[%c0_82, %c0_83] : memref<32x128xf32, #tpu.memory_space<vmem>>, vector<32x128xf32>
    %cst_84 = arith.constant dense<0.000000e+00> : vector<2x128xf32>
    %148 = tpu.matmul %141, %147, %cst_84 {dimension_numbers = #tpu.dot_dimension_numbers<[1], [0], [0], [1], [0, 0, 1, 1], [], []>} : vector<2x32xf32>, vector<32x128xf32>, vector<2x128xf32> -> vector<2x128xf32>
    %149 = arith.addf %146, %148 : vector<2x128xf32>
    %c0_85 = arith.constant 0 : index
    %c0_86 = arith.constant 0 : index
    %150 = vector.load %arg19[%c0_85, %c0_86] : memref<1x128xf32, #tpu.memory_space<vmem>>, vector<1x128xf32>
    %151 = vector.broadcast %150 : vector<1x128xf32> to vector<2x128xf32>
    %152 = arith.addf %149, %151 : vector<2x128xf32>
    %153 = vector.extract_strided_slice %152 {offsets = [0, 0], sizes = [2, 32], strides = [1, 1]} : vector<2x128xf32> to vector<2x32xf32>
    %154 = arith.negf %153 : vector<2x32xf32>
    %155 = math.exp %154 : vector<2x32xf32>
    %cst_87 = arith.constant 1.000000e+00 : f32
    %156 = vector.broadcast %cst_87 : f32 to vector<2x32xf32>
    %157 = arith.addf %156, %155 : vector<2x32xf32>
    %158 = arith.divf %156, %157 : vector<2x32xf32>
    %159 = vector.extract_strided_slice %152 {offsets = [0, 32], sizes = [2, 32], strides = [1, 1]} : vector<2x128xf32> to vector<2x32xf32>
    %160 = arith.negf %159 : vector<2x32xf32>
    %161 = math.exp %160 : vector<2x32xf32>
    %cst_88 = arith.constant 1.000000e+00 : f32
    %162 = vector.broadcast %cst_88 : f32 to vector<2x32xf32>
    %163 = arith.addf %162, %161 : vector<2x32xf32>
    %164 = arith.divf %162, %163 : vector<2x32xf32>
    %165 = vector.extract_strided_slice %152 {offsets = [0, 64], sizes = [2, 32], strides = [1, 1]} : vector<2x128xf32> to vector<2x32xf32>
    %166 = math.tanh %165 : vector<2x32xf32>
    %167 = vector.extract_strided_slice %152 {offsets = [0, 96], sizes = [2, 32], strides = [1, 1]} : vector<2x128xf32> to vector<2x32xf32>
    %168 = arith.negf %167 : vector<2x32xf32>
    %169 = math.exp %168 : vector<2x32xf32>
    %cst_89 = arith.constant 1.000000e+00 : f32
    %170 = vector.broadcast %cst_89 : f32 to vector<2x32xf32>
    %171 = arith.addf %170, %169 : vector<2x32xf32>
    %172 = arith.divf %170, %171 : vector<2x32xf32>
    %c0_90 = arith.constant 0 : index
    %c0_91 = arith.constant 0 : index
    %173 = vector.load %arg29[%c0_90, %c0_91] : memref<2x32xf32, #tpu.memory_space<vmem>>, vector<2x32xf32>
    %174 = arith.mulf %164, %173 : vector<2x32xf32>
    %175 = arith.mulf %158, %166 : vector<2x32xf32>
    %176 = arith.addf %174, %175 : vector<2x32xf32>
    %177 = math.tanh %176 : vector<2x32xf32>
    %178 = arith.mulf %172, %177 : vector<2x32xf32>
    %c0_92 = arith.constant 0 : index
    %c0_93 = arith.constant 0 : index
    %179 = vector.load %arg28[%c0_92, %c0_93] : memref<2x32xf32, #tpu.memory_space<vmem>>, vector<2x32xf32>
    tpu.vector_store %arg28[%c0_92, %c0_93], %178 {strides = array<i32>} : memref<2x32xf32, #tpu.memory_space<vmem>>, vector<2x32xf32>,
    %c0_94 = arith.constant 0 : index
    %c0_95 = arith.constant 0 : index
    %180 = vector.load %arg29[%c0_94, %c0_95] : memref<2x32xf32, #tpu.memory_space<vmem>>, vector<2x32xf32>
    tpu.vector_store %arg29[%c0_94, %c0_95], %176 {strides = array<i32>} : memref<2x32xf32, #tpu.memory_space<vmem>>, vector<2x32xf32>,
    %c0_96 = arith.constant 0 : index
    %c0_97 = arith.constant 0 : index
    %181 = vector.load %arg20[%c0_96, %c0_97] : memref<32x9xf32, #tpu.memory_space<vmem>>, vector<32x9xf32>
    %cst_98 = arith.constant dense<0.000000e+00> : vector<2x9xf32>
    %182 = tpu.matmul %178, %181, %cst_98 {dimension_numbers = #tpu.dot_dimension_numbers<[1], [0], [0], [1], [0, 0, 1, 1], [], []>} : vector<2x32xf32>, vector<32x9xf32>, vector<2x9xf32> -> vector<2x9xf32>
    %c0_99 = arith.constant 0 : index
    %c0_100 = arith.constant 0 : index
    %183 = vector.load %arg21[%c0_99, %c0_100] : memref<32x9xf32, #tpu.memory_space<vmem>>, vector<32x9xf32>
    %cst_101 = arith.constant dense<0.000000e+00> : vector<2x9xf32>
    %184 = tpu.matmul %137, %183, %cst_101 {dimension_numbers = #tpu.dot_dimension_numbers<[1], [0], [0], [1], [0, 0, 1, 1], [], []>} : vector<2x32xf32>, vector<32x9xf32>, vector<2x9xf32> -> vector<2x9xf32>
    %185 = arith.addf %182, %184 : vector<2x9xf32>
    %c0_102 = arith.constant 0 : index
    %c0_103 = arith.constant 0 : index
    %186 = vector.load %arg22[%c0_102, %c0_103] : memref<1x9xf32, #tpu.memory_space<vmem>>, vector<1x9xf32>
    %187 = vector.broadcast %186 : vector<1x9xf32> to vector<2x9xf32>
    %188 = arith.addf %185, %187 : vector<2x9xf32>
    %189 = vector.extract_strided_slice %188 {offsets = [0, 0], sizes = [2, 8], strides = [1, 1]} : vector<2x9xf32> to vector<2x8xf32>
    %c0_104 = arith.constant 0 : index
    %c0_105 = arith.constant 0 : index
    %c0_106 = arith.constant 0 : index
    %190 = vector.load %arg23[%c0_104, %c0_105, %c0_106] : memref<1x2x8xf32, #tpu.memory_space<vmem>>, vector<1x2x8xf32>
    %191 = vector.shape_cast %190 : vector<1x2x8xf32> to vector<2x8xf32>
    %192 = vector.shape_cast %189 : vector<2x8xf32> to vector<1x2x8xf32>
    tpu.vector_store %arg23[%c0_104, %c0_105, %c0_106], %192 {strides = array<i32>} : memref<1x2x8xf32, #tpu.memory_space<vmem>>, vector<1x2x8xf32>,
    %193 = vector.extract_strided_slice %188 {offsets = [0, 8], sizes = [2, 1], strides = [1, 1]} : vector<2x9xf32> to vector<2x1xf32>
    %194 = arith.negf %193 : vector<2x1xf32>
    %195 = math.exp %194 : vector<2x1xf32>
    %cst_107 = arith.constant 1.000000e+00 : f32
    %196 = vector.broadcast %cst_107 : f32 to vector<2x1xf32>
    %197 = arith.addf %196, %195 : vector<2x1xf32>
    %198 = arith.divf %196, %197 : vector<2x1xf32>
    %c0_108 = arith.constant 0 : index
    %c0_109 = arith.constant 0 : index
    %c0_110 = arith.constant 0 : index
    %199 = vector.load %arg24[%c0_108, %c0_109, %c0_110] : memref<1x2x1xf32, #tpu.memory_space<vmem>>, vector<1x2x1xf32>
    %200 = vector.shape_cast %199 : vector<1x2x1xf32> to vector<2x1xf32>
    %201 = vector.shape_cast %198 : vector<2x1xf32> to vector<1x2x1xf32>
    tpu.vector_store %arg24[%c0_108, %c0_109, %c0_110], %201 {strides = array<i32>} : memref<1x2x1xf32, #tpu.memory_space<vmem>>, vector<1x2x1xf32>,
    %c0_111 = arith.constant 0 : index
    %c0_112 = arith.constant 0 : index
    %c0_113 = arith.constant 0 : index
    %202 = vector.load %arg25[%c0_111, %c0_112, %c0_113] : memref<1x2x8xf32, #tpu.memory_space<vmem>>, vector<1x2x8xf32>
    %203 = vector.shape_cast %202 : vector<1x2x8xf32> to vector<2x8xf32>
    %204 = vector.shape_cast %132 : vector<2x8xf32> to vector<1x2x8xf32>
    tpu.vector_store %arg25[%c0_111, %c0_112, %c0_113], %204 {strides = array<i32>} : memref<1x2x8xf32, #tpu.memory_space<vmem>>, vector<1x2x8xf32>,
    return
  }
  func.func @transform_0(%arg0: i32) -> (i32, i32, i32) {
    %c0_i32 = arith.constant 0 : i32
    %c0_i32_0 = arith.constant 0 : i32
    %c0_i32_1 = arith.constant 0 : i32
    return %arg0, %c0_i32, %c0_i32_0 : i32, i32, i32
  }
  func.func @transform_1(%arg0: i32) -> (i32, i32, i32) {
    %c0_i32 = arith.constant 0 : i32
    %c0_i32_0 = arith.constant 0 : i32
    %c0_i32_1 = arith.constant 0 : i32
    %c0_i32_2 = arith.constant 0 : i32
    return %c0_i32, %c0_i32_0, %c0_i32_1 : i32, i32, i32
  }
  func.func @transform_2(%arg0: i32) -> (i32, i32, i32) {
    %c0_i32 = arith.constant 0 : i32
    %c0_i32_0 = arith.constant 0 : i32
    %c0_i32_1 = arith.constant 0 : i32
    %c0_i32_2 = arith.constant 0 : i32
    return %c0_i32, %c0_i32_0, %c0_i32_1 : i32, i32, i32
  }
  func.func @transform_3(%arg0: i32) -> (i32, i32) {
    %c0_i32 = arith.constant 0 : i32
    %c0_i32_0 = arith.constant 0 : i32
    %c0_i32_1 = arith.constant 0 : i32
    return %c0_i32, %c0_i32_0 : i32, i32
  }
  func.func @transform_4(%arg0: i32) -> (i32, i32) {
    %c0_i32 = arith.constant 0 : i32
    %c0_i32_0 = arith.constant 0 : i32
    %c0_i32_1 = arith.constant 0 : i32
    return %c0_i32, %c0_i32_0 : i32, i32
  }
  func.func @transform_5(%arg0: i32) -> (i32, i32) {
    %c0_i32 = arith.constant 0 : i32
    %c0_i32_0 = arith.constant 0 : i32
    %c0_i32_1 = arith.constant 0 : i32
    return %c0_i32, %c0_i32_0 : i32, i32
  }
  func.func @transform_6(%arg0: i32) -> (i32, i32) {
    %c0_i32 = arith.constant 0 : i32
    %c0_i32_0 = arith.constant 0 : i32
    %c0_i32_1 = arith.constant 0 : i32
    return %c0_i32, %c0_i32_0 : i32, i32
  }
  func.func @transform_7(%arg0: i32) -> (i32, i32) {
    %c0_i32 = arith.constant 0 : i32
    %c0_i32_0 = arith.constant 0 : i32
    %c0_i32_1 = arith.constant 0 : i32
    return %c0_i32, %c0_i32_0 : i32, i32
  }
  func.func @transform_8(%arg0: i32) -> (i32, i32) {
    %c0_i32 = arith.constant 0 : i32
    %c0_i32_0 = arith.constant 0 : i32
    %c0_i32_1 = arith.constant 0 : i32
    return %c0_i32, %c0_i32_0 : i32, i32
  }
  func.func @transform_9(%arg0: i32) -> (i32, i32) {
    %c0_i32 = arith.constant 0 : i32
    %c0_i32_0 = arith.constant 0 : i32
    %c0_i32_1 = arith.constant 0 : i32
    return %c0_i32, %c0_i32_0 : i32, i32
  }
  func.func @transform_10(%arg0: i32) -> (i32, i32) {
    %c0_i32 = arith.constant 0 : i32
    %c0_i32_0 = arith.constant 0 : i32
    %c0_i32_1 = arith.constant 0 : i32
    return %c0_i32, %c0_i32_0 : i32, i32
  }
  func.func @transform_11(%arg0: i32) -> (i32, i32) {
    %c0_i32 = arith.constant 0 : i32
    %c0_i32_0 = arith.constant 0 : i32
    %c0_i32_1 = arith.constant 0 : i32
    return %c0_i32, %c0_i32_0 : i32, i32
  }
  func.func @transform_12(%arg0: i32) -> (i32, i32) {
    %c0_i32 = arith.constant 0 : i32
    %c0_i32_0 = arith.constant 0 : i32
    %c0_i32_1 = arith.constant 0 : i32
    return %c0_i32, %c0_i32_0 : i32, i32
  }
  func.func @transform_13(%arg0: i32) -> (i32, i32, i32) {
    %c0_i32 = arith.constant 0 : i32
    %c0_i32_0 = arith.constant 0 : i32
    %c0_i32_1 = arith.constant 0 : i32
    %c0_i32_2 = arith.constant 0 : i32
    return %c0_i32, %c0_i32_0, %c0_i32_1 : i32, i32, i32
  }
  func.func @transform_14(%arg0: i32) -> (i32, i32) {
    %c0_i32 = arith.constant 0 : i32
    %c0_i32_0 = arith.constant 0 : i32
    %c0_i32_1 = arith.constant 0 : i32
    return %c0_i32, %c0_i32_0 : i32, i32
  }
  func.func @transform_15(%arg0: i32) -> (i32, i32) {
    %c0_i32 = arith.constant 0 : i32
    %c0_i32_0 = arith.constant 0 : i32
    %c0_i32_1 = arith.constant 0 : i32
    return %c0_i32, %c0_i32_0 : i32, i32
  }
  func.func @transform_16(%arg0: i32) -> (i32, i32) {
    %c0_i32 = arith.constant 0 : i32
    %c0_i32_0 = arith.constant 0 : i32
    %c0_i32_1 = arith.constant 0 : i32
    return %c0_i32, %c0_i32_0 : i32, i32
  }
  func.func @transform_17(%arg0: i32) -> (i32, i32) {
    %c0_i32 = arith.constant 0 : i32
    %c0_i32_0 = arith.constant 0 : i32
    %c0_i32_1 = arith.constant 0 : i32
    return %c0_i32, %c0_i32_0 : i32, i32
  }
  func.func @transform_18(%arg0: i32) -> (i32, i32) {
    %c0_i32 = arith.constant 0 : i32
    %c0_i32_0 = arith.constant 0 : i32
    %c0_i32_1 = arith.constant 0 : i32
    return %c0_i32, %c0_i32_0 : i32, i32
  }
  func.func @transform_19(%arg0: i32) -> (i32, i32) {
    %c0_i32 = arith.constant 0 : i32
    %c0_i32_0 = arith.constant 0 : i32
    %c0_i32_1 = arith.constant 0 : i32
    return %c0_i32, %c0_i32_0 : i32, i32
  }
  func.func @transform_20(%arg0: i32) -> (i32, i32) {
    %c0_i32 = arith.constant 0 : i32
    %c0_i32_0 = arith.constant 0 : i32
    %c0_i32_1 = arith.constant 0 : i32
    return %c0_i32, %c0_i32_0 : i32, i32
  }
  func.func @transform_21(%arg0: i32) -> (i32, i32) {
    %c0_i32 = arith.constant 0 : i32
    %c0_i32_0 = arith.constant 0 : i32
    %c0_i32_1 = arith.constant 0 : i32
    return %c0_i32, %c0_i32_0 : i32, i32
  }
  func.func @transform_22(%arg0: i32) -> (i32, i32, i32) {
    %c0_i32 = arith.constant 0 : i32
    %c0_i32_0 = arith.constant 0 : i32
    %c0_i32_1 = arith.constant 0 : i32
    return %arg0, %c0_i32, %c0_i32_0 : i32, i32, i32
  }
  func.func @transform_23(%arg0: i32) -> (i32, i32, i32) {
    %c0_i32 = arith.constant 0 : i32
    %c0_i32_0 = arith.constant 0 : i32
    %c0_i32_1 = arith.constant 0 : i32
    return %arg0, %c0_i32, %c0_i32_0 : i32, i32, i32
  }
  func.func @transform_24(%arg0: i32) -> (i32, i32, i32) {
    %c0_i32 = arith.constant 0 : i32
    %c0_i32_0 = arith.constant 0 : i32
    %c0_i32_1 = arith.constant 0 : i32
    return %arg0, %c0_i32, %c0_i32_0 : i32, i32, i32
  }
}

</mosaic_0001>

<bundles_post_ra>
// kernel: tacotron2_forward.13
= control target key start
LH: loop header
LB: loop body
LE: loop exit
PB: predicated region body
PF: predicated region fallthrough
CT: control target
= control target key end

     0   :  { %8 = vsyncpa [#allocation3], 0  ;;  %s523_s12 = smov 0   ;;  %s559_s0 = inlined_call_operand.vmem [shape: f32[2,12,32], index: 0, kind: input, shape index: {}]   ;;  %s560_s1 = inlined_call_operand.hbm [shape: f32[5,32,32], index: 1, kind: input, shape index: {}]   ;;  %s561_s2 = inlined_call_operand.vmem [shape: f32[1,32], index: 2, kind: input, shape index: {}]   ;;  %s562_s3 = inlined_call_operand.vmem [shape: f32[2,8,32], index: 3, kind: output, shape index: {}]  }
   0x1 LB: > { %s124_s15 = sshll.u32 %s560_s1, 4  ;;  %s418_s16 = sadd.s32 4294967295, %s498_s12   ;;  %s498_s12 = sphi %s523_s12, %s14_s12   ;;  %s125_s15 = int_to_ptr.hbm [resolvable:$true] %s124_s15 }
   0x2   : > { %p420_p0 = scmp.ge.s32.totalorder %s498_s12, 1  ;;  %p113_p1 = scmp.lt.s32.totalorder %s498_s12, 3 }
   0x3   : > { %p444_p2 = scmp.eq.s32.totalorder %s418_s16, 0  ;;  %s500_s17 = smov [#allocation2]  }
   0x4   : > { %p114_p3 = pnand %p420_p0, %p113_p1  ;;  %s126_s18 = sshll.u32 %s500_s17, 4  ;;  %s127_s18 = int_to_ptr.vmem [resolvable:$true] %s126_s18 }
   0x5   : > { %s501_s19 = smov 128   ;;  %s502_s20 = smov 8  }
   0x6   : > { %p440_p4 = pneg %p114_p3  ;;  %153 = sbr.rel (%p114_p3) target bundleno = 162 (0xa2), region = 32 }
   0x8   : > { %p441_p5 = pnand %p444_p2, %p440_p4 }
   0xa   : > { %443 = dma.hbm_to_vmem [thread:$0]  (!%p441_p5), %s125_s15, 2560, %s127_s18, [#allocation3], %s501_s19, %s501_s19, %s502_s20  }
   0xb   : > { %493 = dma.done.wait (%p444_p2), [#allocation3], 2560  }
   0xc   : > { %495 = vsyncadd (%p444_p2), [#allocation3], 4294964736  ;;  %p177_p6 = scmp.lt.s32.totalorder %s418_s16, 1  ;;  %v259_v0 = vld [vmem:[#allocation2 + $0x58] sm:$0xff]  ;;  %v258_v2 = vld [vmem:[#allocation2 + $0x50] sm:$0xff]  ;;  %vm197_vm0 = vcmask 261120  }
   0xd   : > { %v196_v1 = vld [vmem:[#allocation2 + $0x18] sm:$0xff]  ;;  %278 = vmatpush.msra.mxu2 %v259_v0  ;;  %v195_v4 = vld [vmem:[#allocation2 + $0x10] sm:$0xff]  ;;  %v257_v6 = vld [vmem:[#allocation2 + $0x48] sm:$0xff]  ;;  %vm260_vm1 = vcmask 1045504   ;;  %vm292_vm2 = vcmask 1044480   ;;  %vm228_vm3 = vcmask 1046528  }
   0xe   : > { %s564_s16 = smov (!%p177_p6, %s418_s16), 1  ;;  %213 = vmatpush.msra.mxu0 %v196_v1  ;;  %v291_v3 = vld [vmem:[#allocation2 + $0x78] sm:$0xff]  ;;  %v290_v7 = vld [vmem:[#allocation2 + $0x70] sm:$0xff]  ;;  %v194_v8 = vld [vmem:[#allocation2 + $0x8] sm:$0xff]  ;;  %vm324_vm4 = vcmask 1043456  }
   0xf   : > { %s435_s21 = sshll.u32 %s564_s16, 4  ;;  %v226_v5 = vld [vmem:[#allocation2 + $0x38] sm:$0xff]  ;;  %310 = vmatpush.msra.mxu3 %v291_v3  ;;  %279 = vmatpush.msra.mxu2 %v258_v2  ;;  %v225_v9 = vld [vmem:[#allocation2 + $0x30] sm:$0xff]  ;;  %v256_v10 = vld [vmem:[#allocation2 + $0x40] sm:$0xff]  ;;  %s427_s27 = sshll.u32 %s564_s16, 3 }
  0x10   : > { %s181_s24 = scalar_lea.vmem %s559_s0, %s435_s21  ;;  %246 = vmatpush.msra.mxu1 %v226_v5  ;;  %214 = vmatpush.msra.mxu0 %v195_v4  ;;  %v289_v11 = vld [vmem:[#allocation2 + $0x68] sm:$0xff]  ;;  %v193_v14 = vld [vmem:[#allocation2] sm:$0xff]  ;;  %v323_v25 = vld [vmem:[#allocation2 + $0x98] sm:$0xff]  ;;  %s185_s30 = scalar_lea.vmem %s562_s3, %s427_s27 }
  0x11   : > { %311 = vmatpush.msra.mxu3 %v290_v7  ;;  %v186_v12 = vld [vmem:[%s181_s24] sm:$0xff]  ;;  %v187_v13 = vld [vmem:[%s181_s24 + $0x8] sm:$0xf]  ;;  %280 = vmatpush.msra.mxu2 %v257_v6  ;;  %v322_v28 = vld [vmem:[#allocation2 + $0x90] sm:$0xff] }
  0x12   : > { %247 = vmatpush.msra.mxu1 %v225_v9  ;;  %215 = vmatpush.msra.mxu0 %v194_v8  ;;  %v261_v15 = vrot.slane %v186_v12, 2  ;;  %v262_v16 = vrot.slane %v187_v13, 2  ;;  %v224_v17 = vld [vmem:[#allocation2 + $0x28] sm:$0xff]  ;;  %v288_v18 = vld [vmem:[#allocation2 + $0x60] sm:$0xff]  ;;  %v293_v19 = vrot.slane %v186_v12, 3  ;;  %v294_v20 = vrot.slane %v187_v13, 3 }
  0x13   : > { %312 = vmatpush.msra.mxu3 %v289_v11  ;;  %v229_v21 = vrot.slane %v186_v12, 1  ;;  %v230_v22 = vrot.slane %v187_v13, 1  ;;  %281 = vmatpush.msra.mxu2 %v256_v10  ;;  %v223_v26 = vld [vmem:[#allocation2 + $0x20] sm:$0xff]  ;;  %v325_v29 = vrot.slane %v186_v12, 4  ;;  %v326_v30 = vrot.slane %v187_v13, 4  ;;  %v321_v31 = vld [vmem:[#allocation2 + $0x88] sm:$0xff] }
  0x14   : > { %248 = vmatpush.msra.mxu1 %v224_v17  ;;  %v263_v23 = vsel %vm260_vm1, %v261_v15, %v262_v16  ;;  %216 = vmatpush.msra.mxu0 %v193_v14  ;;  %v295_v24 = vsel %vm292_vm2, %v293_v19, %v294_v20  ;;  %v320_v32 = vld [vmem:[#allocation2 + $0x80] sm:$0xff] }
  0x15   : > { %430 = vmatmul.msk.f32.vlgmr.msra.gmra.mxu2 %vm197_vm0, %v263_v23  ;;  %313 = vmatpush.msra.mxu3 %v288_v18  ;;  %v231_v27 = vsel %vm228_vm3, %v229_v21, %v230_v22  ;;  %v327_v33 = vsel %vm324_vm4, %v325_v29, %v326_v30  ;;  %v457_v34 = vld [vmem:[%s561_s2] ss:$0 sm:$0xff] }
  0x16   : > { %428 = vmatmul.msk.f32.vlgmr.msra.gmra.mxu0 %vm197_vm0, %v186_v12  ;;  %431 = vmatmul.msk.f32.vlgmr.msra.gmra.mxu3 %vm197_vm0, %v295_v24 }
  0x17   : > { %342 = vmatpush.msrb.mxu0 %v323_v25  ;;  %249 = vmatpush.msra.mxu1 %v223_v26 }
  0x18   : > { %429 = vmatmul.msk.f32.vlgmr.msra.gmra.mxu1 %vm197_vm0, %v231_v27 }
  0x19   : > { %343 = vmatpush.msrb.mxu0 %v322_v28 }
  0x1b   : > { %344 = vmatpush.msrb.mxu0 %v321_v31 }
  0x1d   : > { %345 = vmatpush.msrb.mxu0 %v320_v32 }
  0x1e   : > { %432 = vmatmul.msk.f32.vlgmr.msrb.gmra.mxu0 %vm197_vm0, %v327_v33 }
  0x93   : > { %v218_v35 = vpop.f32.mrf.mxu0 }
  0x94   : > { %v221_v36 = vadd.f32 %v457_v34, %v218_v35 }
  0x95   : > { %v251_v37 = vpop.f32.mrf.mxu1 }
  0x96   : > { %v254_v38 = vadd.f32 %v251_v37, %v221_v36 }
  0x98   : > { %v283_v39 = vpop.f32.mrf.mxu2 }
  0x99   : > { %v286_v40 = vadd.f32 %v283_v39, %v254_v38  ;;  %v315_v41 = vpop.f32.mrf.mxu3 }
  0x9b   : > { %v318_v42 = vadd.f32 %v315_v41, %v286_v40  ;;  %v347_v43 = vpop.f32.mrf.mxu0 }
  0x9d   : > { %v350_v44 = vadd.f32 %v347_v43, %v318_v42 }
  0x9f   : > { %v351_v45 = vmax.f32 %v350_v44, 0.0 }
  0xa1   : > { %352 = vst.msk [vmem:[%s185_s30] sm:$0xff] %vm197_vm0, %v351_v45 }
  0xa2 PF: > { %s14_s12 = sadd.s32 1, %s498_s12  }
  0xa3   : > { %p11_p7 = scmp.ge.s32.totalorder %s14_s12, 4  }
  0xa5   :  { %13 = sbr.rel (!%p11_p7) target bundleno = 1 (0x1), region = 71 }
  0xaa   :  { %372 = vsyncpa [#allocation3], 1 }
  0xab   :  { %374 = vsyncpa [#allocation3 + $0x1], 1 }

// kernel: tacotron2_forward.15
= control target key start
LH: loop header
LB: loop body
LE: loop exit
PB: predicated region body
PF: predicated region fallthrough
CT: control target
= control target key end

     0   :  { %vm17_vm0 = vcmask 261120   ;;  %vm47_vm1 = vcmask 130048   ;;  %s99_s1 = inlined_call_operand.vmem [shape: f32[32,16], index: 1, kind: input, shape index: {}]   ;;  %s100_s0 = inlined_call_operand.vmem [shape: f32[16,32], index: 0, kind: input, shape index: {}]   ;;  %s101_s2 = inlined_call_operand.vmem [shape: f32[16,16], index: 2, kind: output, shape index: {}]  }
   0x1   :  { %v16_v0 = vld [vmem:[%s99_s1 + $0x18] sm:$0xff]  ;;  %v15_v1 = vld [vmem:[%s99_s1 + $0x10] sm:$0xff]  ;;  %v14_v2 = vld [vmem:[%s99_s1 + $0x8] sm:$0xff] }
   0x2   :  { %36 = vmatpush.msra.mxu0 %v16_v0  ;;  %56 = vmatpush.msra.mxu1 %v16_v0  ;;  %v13_v3 = vld [vmem:[%s99_s1] sm:$0xff]  ;;  %v12_v5 = vld [vmem:[%s100_s0 + $0x8] sm:$0xff] }
   0x3   :  { %v11_v4 = vld [vmem:[%s100_s0] sm:$0xff] }
   0x4   :  { %37 = vmatpush.msra.mxu0 %v15_v1  ;;  %57 = vmatpush.msra.mxu1 %v15_v1 }
   0x6   :  { %38 = vmatpush.msra.mxu0 %v14_v2  ;;  %58 = vmatpush.msra.mxu1 %v14_v2 }
   0x8   :  { %39 = vmatpush.msra.mxu0 %v13_v3  ;;  %59 = vmatpush.msra.mxu1 %v13_v3 }
   0x9   :  { %54 = vmatmul.msk.f32.vlgmr.msra.gmra.mxu0 %vm17_vm0, %v11_v4  ;;  %55 = vmatmul.msk.f32.vlgmr.msra.gmra.mxu1 %vm17_vm0, %v12_v5 }
  0x86   :  { %v41_v6 = vpop.f32.mrf.mxu0  ;;  %v44_v7 = vpop.f32.mrf.mxu1 }
  0x87   :  { %48 = vst.msk [vmem:[%s101_s2] sm:$0xff] %vm47_vm1, %v41_v6 }
  0x88   :  { %49 = vst.msk [vmem:[%s101_s2 + $0x8] sm:$0xff] %vm47_vm1, %v44_v7 }

// kernel: tacotron2_forward.11
= control target key start
LH: loop header
LB: loop body
LE: loop exit
PB: predicated region body
PF: predicated region fallthrough
CT: control target
= control target key end

     0   :  { %s458_s12 = smov 0   ;;  %s550_s0 = inlined_call_operand.vmem [shape: f32[2,12,32], index: 0, kind: input, shape index: {}]   ;;  %s551_s1 = inlined_call_operand.vmem [shape: f32[5,32,32], index: 1, kind: input, shape index: {}]   ;;  %s552_s2 = inlined_call_operand.vmem [shape: f32[1,32], index: 2, kind: input, shape index: {}]   ;;  %s553_s3 = inlined_call_operand.vmem [shape: f32[2,8,32], index: 3, kind: output, shape index: {}]  }
   0x1 LB: > { %s389_s13 = sadd.s32 4294967295, %s436_s12   ;;  %p393_p0 = scmp.ge.s32.totalorder %s436_s12, 1  ;;  %s436_s12 = sphi %s458_s12, %s13_s12  }
   0x2   : > { %p137_p1 = scmp.lt.s32.totalorder %s436_s12, 3 }
   0x4   : > { %p138_p2 = pnand %p393_p0, %p137_p1 }
   0x5   : > { %p160_p3 = scmp.lt.s32.totalorder (!%p138_p2), %s389_s13, 1 }
   0x6   : > { %141 = sbr.rel (%p138_p2) target bundleno = 163 (0xa3), region = 32 }
   0xb   : > { %v406_v0 = vld [vmem:[%s551_s1 + $0x58] sm:$0xff]  ;;  %v405_v2 = vld [vmem:[%s551_s1 + $0x50] sm:$0xff]  ;;  %v404_v6 = vld [vmem:[%s551_s1 + $0x48] sm:$0xff]  ;;  %s555_s13 = smov (!%p160_p3, %s389_s13), 1  ;;  %vm180_vm0 = vcmask 261120   ;;  %vm243_vm1 = vcmask 1045504  }
   0xc   : > { %v179_v1 = vld [vmem:[%s551_s1 + $0x18] sm:$0xff]  ;;  %261 = vmatpush.msra.mxu2 %v406_v0  ;;  %v178_v4 = vld [vmem:[%s551_s1 + $0x10] sm:$0xff]  ;;  %v177_v8 = vld [vmem:[%s551_s1 + $0x8] sm:$0xff]  ;;  %s420_s11 = sshll.u32 %s555_s13, 4  ;;  %vm275_vm2 = vcmask 1044480   ;;  %vm211_vm3 = vcmask 1046528  }
   0xd   : > { %196 = vmatpush.msra.mxu0 %v179_v1  ;;  %v411_v3 = vld [vmem:[%s551_s1 + $0x78] sm:$0xff]  ;;  %v410_v7 = vld [vmem:[%s551_s1 + $0x70] sm:$0xff]  ;;  %v409_v10 = vld [vmem:[%s551_s1 + $0x68] sm:$0xff]  ;;  %s164_s20 = scalar_lea.vmem %s550_s0, %s420_s11  ;;  %vm307_vm4 = vcmask 1043456   ;;  %s396_s8 = sshll.u32 %s555_s13, 3 }
   0xe   : > { %v401_v5 = vld [vmem:[%s551_s1 + $0x38] sm:$0xff]  ;;  %293 = vmatpush.msra.mxu3 %v411_v3  ;;  %262 = vmatpush.msra.mxu2 %v405_v2  ;;  %v400_v9 = vld [vmem:[%s551_s1 + $0x30] sm:$0xff]  ;;  %v403_v11 = vld [vmem:[%s551_s1 + $0x40] sm:$0xff]  ;;  %s168_s11 = scalar_lea.vmem %s553_s3, %s396_s8 }
   0xf   : > { %229 = vmatpush.msra.mxu1 %v401_v5  ;;  %197 = vmatpush.msra.mxu0 %v178_v4  ;;  %v176_v12 = vld [vmem:[%s551_s1] sm:$0xff]  ;;  %v399_v13 = vld [vmem:[%s551_s1 + $0x28] sm:$0xff]  ;;  %v416_v15 = vld [vmem:[%s551_s1 + $0x98] sm:$0xff] }
  0x10   : > { %294 = vmatpush.msra.mxu3 %v410_v7  ;;  %263 = vmatpush.msra.mxu2 %v404_v6  ;;  %v408_v14 = vld [vmem:[%s551_s1 + $0x60] sm:$0xff]  ;;  %v170_v17 = vld [vmem:[%s164_s20 + $0x8] sm:$0xf]  ;;  %v415_v25 = vld [vmem:[%s551_s1 + $0x90] sm:$0xff] }
  0x11   : > { %230 = vmatpush.msra.mxu1 %v400_v9  ;;  %198 = vmatpush.msra.mxu0 %v177_v8  ;;  %v169_v16 = vld [vmem:[%s164_s20] sm:$0xff]  ;;  %v245_v20 = vrot.slane %v170_v17, 2  ;;  %v277_v22 = vrot.slane %v170_v17, 3  ;;  %v213_v24 = vrot.slane %v170_v17, 1  ;;  %v309_v29 = vrot.slane %v170_v17, 4  ;;  %v414_v31 = vld [vmem:[%s551_s1 + $0x88] sm:$0xff] }
  0x12   : > { %295 = vmatpush.msra.mxu3 %v409_v10  ;;  %v398_v18 = vld [vmem:[%s551_s1 + $0x20] sm:$0xff]  ;;  %264 = vmatpush.msra.mxu2 %v403_v11  ;;  %v244_v19 = vrot.slane %v169_v16, 2  ;;  %v276_v21 = vrot.slane %v169_v16, 3  ;;  %v212_v23 = vrot.slane %v169_v16, 1  ;;  %v308_v28 = vrot.slane %v169_v16, 4 }
  0x13   : > { %231 = vmatpush.msra.mxu1 %v399_v13  ;;  %199 = vmatpush.msra.mxu0 %v176_v12  ;;  %v413_v32 = vld [vmem:[%s551_s1 + $0x80] sm:$0xff] }
  0x14   : > { %296 = vmatpush.msra.mxu3 %v408_v14  ;;  %397 = vmatmul.msk.f32.vlgmr.msra.gmra.mxu0 %vm180_vm0, %v169_v16  ;;  %v246_v26 = vsel %vm243_vm1, %v244_v19, %v245_v20  ;;  %v278_v27 = vsel %vm275_vm2, %v276_v21, %v277_v22  ;;  %v214_v30 = vsel %vm211_vm3, %v212_v23, %v213_v24  ;;  %v429_v34 = vld [vmem:[%s552_s2] ss:$0 sm:$0xff] }
  0x15   : > { %325 = vmatpush.msrb.mxu0 %v416_v15  ;;  %232 = vmatpush.msra.mxu1 %v398_v18  ;;  %v310_v33 = vsel %vm307_vm4, %v308_v28, %v309_v29 }
  0x16   : > { %407 = vmatmul.msk.f32.vlgmr.msra.gmra.mxu2 %vm180_vm0, %v246_v26  ;;  %412 = vmatmul.msk.f32.vlgmr.msra.gmra.mxu3 %vm180_vm0, %v278_v27 }
  0x17   : > { %402 = vmatmul.msk.f32.vlgmr.msra.gmra.mxu1 %vm180_vm0, %v214_v30  ;;  %326 = vmatpush.msrb.mxu0 %v415_v25 }
  0x19   : > { %327 = vmatpush.msrb.mxu0 %v414_v31 }
  0x1b   : > { %328 = vmatpush.msrb.mxu0 %v413_v32 }
  0x1c   : > { %417 = vmatmul.msk.f32.vlgmr.msrb.gmra.mxu0 %vm180_vm0, %v310_v33 }
  0x91   : > { %v201_v35 = vpop.f32.mrf.mxu0 }
  0x92   : > { %v204_v36 = vadd.f32 %v429_v34, %v201_v35 }
  0x94   : > { %v234_v37 = vpop.f32.mrf.mxu1 }
  0x95   : > { %v237_v38 = vadd.f32 %v234_v37, %v204_v36 }
  0x99   : > { %v266_v39 = vpop.f32.mrf.mxu2  ;;  %v298_v40 = vpop.f32.mrf.mxu3 }
  0x9a   : > { %v269_v41 = vadd.f32 %v266_v39, %v237_v38  ;;  %v330_v42 = vpop.f32.mrf.mxu0 }
  0x9c   : > { %v301_v43 = vadd.f32 %v298_v40, %v269_v41 }
  0x9e   : > { %v333_v44 = vadd.f32 %v330_v42, %v301_v43 }
  0xa0   : > { %v334_v45 = vmax.f32 %v333_v44, 0.0 }
  0xa2   : > { %335 = vst.msk [vmem:[%s168_s11] sm:$0xff] %vm180_vm0, %v334_v45 }
  0xa3 PF: > { %s13_s12 = sadd.s32 1, %s436_s12  }
  0xa4   : > { %p10_p4 = scmp.ge.s32.totalorder %s13_s12, 4  }
  0xa6   :  { %12 = sbr.rel (!%p10_p4) target bundleno = 1 (0x1), region = 66 }

// kernel: tacotron2_forward.14
= control target key start
LH: loop header
LB: loop body
LE: loop exit
PB: predicated region body
PF: predicated region fallthrough
CT: control target
= control target key end

     0   :  { %13 = vsyncpa [#allocation7], 0  ;;  %s794_s24 = smov 0   ;;  %s873_s0 = inlined_call_operand.vmem [shape: f32[8,2,32], index: 0, kind: input, shape index: {}, may-alias: {0,1}]   ;;  %s874_s1 = inlined_call_operand.vmem [shape: f32[8,2,32], index: 1, kind: input, shape index: {}, may-alias: {0,1}]   ;;  %s875_s2 = inlined_call_operand.vmem [shape: f32[48,64], index: 2, kind: input, shape index: {}]   ;;  %s876_s3 = inlined_call_operand.vmem [shape: f32[1,64], index: 3, kind: input, shape index: {}]   ;;  %s877_s4 = inlined_call_operand.hbm [shape: f32[48,64], index: 4, kind: input, shape index: {}]   ;;  %s878_s5 = inlined_call_operand.vmem [shape: f32[1,64], index: 5, kind: input, shape index: {}]   ;;  %s879_s6 = inlined_call_operand.vmem [shape: f32[8,2,16], index: 6, kind: output, shape index: {0}]   ;;  %s880_s7 = inlined_call_operand.vmem [shape: f32[8,2,16], index: 7, kind: output, shape index: {1}]  }
   0x1 LB: > { %s233_s27 = sshll.u32 %s877_s4, 4  ;;  %s803_s28 = sadd.s32 4294967295, %s743_s24   ;;  %s743_s24 = sphi %s794_s24, %s19_s24   ;;  %s234_s27 = int_to_ptr.hbm [resolvable:$true] %s233_s27 }
   0x2   : > { %p642_p0 = scmp.ge.s32.totalorder %s743_s24, 1  ;;  %p216_p1 = scmp.lt.s32.totalorder %s743_s24, 9 }
   0x3   : > { %p643_p2 = scmp.ne.s32.totalorder %s803_s28, 0  ;;  %p666_p3 = scmp.eq.s32.totalorder %s803_s28, 0 }
   0x4   : > { %p217_p4 = pnand %p642_p0, %p216_p1  ;;  %s745_s29 = smov [#allocation6]  }
   0x5   : > { %s235_s30 = sshll.u32 %s745_s29, 4  ;;  %s746_s8 = smov 128   ;;  %s236_s30 = int_to_ptr.vmem [resolvable:$true] %s235_s30 }
   0x6   : > { %p662_p5 = pneg %p217_p4  ;;  %s747_s9 = smov 8  }
   0x7   : > { %270 = sbr.rel (%p217_p4) target bundleno = 764 (0x2fc), region = 44 }
   0x8   : > { %p663_p6 = pnand %p666_p3, %p662_p5 }
   0xa   : > { %665 = dma.hbm_to_vmem [thread:$0]  (!%p663_p6), %s234_s27, 768, %s236_s30, [#allocation7], %s746_s8, %s746_s8, %s747_s9  }
   0xc   : > { %738 = dma.done.wait (%p666_p3), [#allocation7], 768  }
   0xd   : > { %740 = vsyncadd (%p666_p3), [#allocation7], 4294966528  ;;  %p311_p7 = scmp.lt.s32.totalorder %s803_s28, 7  ;;  %s315_s10 = ssub.s32 7, %s803_s28 }
   0xe   : > { %p316_p8 = scmp.lt.s32.totalorder %s315_s10, 7 }
   0xf   : > { %s312_s11 = scalar_select %p311_p7, %s803_s28, 7 }
  0x10   : > { %s882_s10 = smov (!%p316_p8, %s315_s10), 7  ;;  %334 = sbr.rel (%p643_p2) target bundleno = 26 (0x1a), region = 52 }
  0x11   : > { %s647_s12 = sshll.u32 %s312_s11, 1  ;;  %s648_s16 = sshll.u32 %s882_s10, 1 }
  0x12   : > { %s815_s15 = scalar_lea.vmem %s873_s0, %s647_s12  ;;  %s820_s19 = scalar_lea.vmem %s874_s1, %s648_s16 }
  0x13   : > { %s825_s22 = scalar_lea.vmem %s879_s6, %s647_s12  ;;  %s830_s26 = scalar_lea.vmem %s880_s7, %s648_s16 }
  0x15   : > { %vm335_vm0 = vcmask 123904   ;;  %v748_v0 = vmov 0.0  }
  0x16   : > { %336 = vst.msk [vmem:[#allocation2] sm:$0x3] %vm335_vm0, %v748_v0 }
  0x17   : > { %337 = vst.msk [vmem:[#allocation3] sm:$0x3] %vm335_vm0, %v748_v0 }
  0x18   : > { %338 = vst.msk [vmem:[#allocation4] sm:$0x3] %vm335_vm0, %v748_v0 }
  0x19   : > { %339 = vst.msk [vmem:[#allocation5] sm:$0x3] %vm335_vm0, %v748_v0 }
  0x1a PF: > { %v354_v2 = vld [vmem:[%s875_s2 + $0x28] sm:$0xff]  ;;  %s749_s30 = smov 32   ;;  %v353_v3 = vld [vmem:[%s875_s2 + $0x20] sm:$0xff]  ;;  %v352_v4 = vld [vmem:[%s875_s2 + $0x18] sm:$0xff]  ;;  %s750_s18 = smov 16   ;;  %vm346_vm1 = vcmask 261120  }
  0x1b   : > { %373 = vmatpush.msra.mxu0 %v354_v2  ;;  %v449_v5 = vld [vmem:[#allocation6 + $0x28] sm:$0xff]  ;;  %v350_v8 = vld [vmem:[%s875_s2 + $0x8] sm:$0xff]  ;;  %v349_v9 = vld [vmem:[%s875_s2] sm:$0xff]  ;;  %vm359_vm2 = vcmask 392192   ;;  %s753_s27 = smov 80   ;;  %vm428_vm11 = vcmask 123904  }
  0x1c   : > { %467 = vmatpush.msra.mxu1 %v449_v5  ;;  %v351_v6 = vld [vmem:[%s875_s2 + $0x10] sm:$0xff]  ;;  %v448_v10 = vld [vmem:[#allocation6 + $0x20] sm:$0xff]  ;;  %v447_v11 = vld [vmem:[#allocation6 + $0x18] sm:$0xff] }
  0x1d   : > { %v341_v1 = vld [vmem:[#allocation2] sm:$0x3]  ;;  %374 = vmatpush.msra.mxu0 %v353_v3  ;;  %v446_v12 = vld [vmem:[#allocation6 + $0x10] sm:$0xff]  ;;  %v445_v13 = vld [vmem:[#allocation6 + $0x8] sm:$0xff] }
  0x1e   : > { %343 = vrot.lane.b32.xlu0 %v341_v1, %s749_s30  ;;  %468 = vmatpush.msra.mxu1 %v448_v10  ;;  %v444_v14 = vld [vmem:[#allocation6] sm:$0xff]  ;;  %v348_v15 = vld [vmem:[#allocation3] sm:$0x3]  ;;  %v340_v17 = vld [vmem:[%s815_s15] sm:$0x3]  ;;  %s751_s15 = smov 96  }
  0x1f   : > { %375 = vmatpush.msra.mxu0 %v352_v4  ;;  %v437_v7 = vld [vmem:[#allocation4] sm:$0x3]  ;;  %404 = vrot.lane.b32.xlu2 %v348_v15, %s750_s18  ;;  %v436_v20 = vld [vmem:[%s820_s19] sm:$0x3]  ;;  %s752_s19 = smov 112  }
  0x20   : > { %469 = vmatpush.msra.mxu1 %v447_v11  ;;  %v443_v16 = vld [vmem:[#allocation5] sm:$0x3]  ;;  %v685_v23 = vld [vmem:[%s876_s3] ss:$0 sm:$0xff] }
  0x21   : > { %376 = vmatpush.msra.mxu0 %v351_v6  ;;  %v686_v26 = vld [vmem:[%s878_s5] ss:$0 sm:$0xff] }
  0x22   : > { %470 = vmatpush.msra.mxu1 %v446_v12 }
  0x23   : > { %377 = vmatpush.msra.mxu0 %v350_v8 }
  0x24   : > { %471 = vmatpush.msra.mxu1 %v445_v13 }
  0x25   : > { %378 = vmatpush.msra.mxu0 %v349_v9 }
  0x26   : > { %439 = vrot.lane.b32.xlu0 %v437_v7, %s749_s30  ;;  %472 = vmatpush.msra.mxu1 %v444_v14 }
  0x27   : > { %498 = vrot.lane.b32.xlu2 %v443_v16, %s750_s18 }
  0x79   : > { %v405_v61 = vpop.permute.xlu2 %404 }
  0x81   : > { %v499_v1 = vpop.permute.xlu2 %498 }
  0x90   : > { %v344_v18 = vpop.permute.xlu0 %343 }
  0x91   : > { %v347_v19 = vsel %vm346_vm1, %v340_v17, %v344_v18 }
  0x92   : > { %652 = vmatmul.msk.f32.vlgmr.msra.gmra.mxu0 %vm359_vm2, %v347_v19 }
  0x98   : > { %v440_v21 = vpop.permute.xlu0 %439 }
  0x99   : > { %v442_v22 = vsel %vm346_vm1, %v436_v20, %v440_v21 }
  0x9a   : > { %654 = vmatmul.msk.f32.vlgmr.msra.gmra.mxu1 %vm359_vm2, %v442_v22 }
 0x10f   : > { %v380_v24 = vpop.f32.mrf.mxu0 }
 0x110   : > { %v381_v25 = vadd.f32 %v685_v23, %v380_v24 }
 0x112   : > { %687 = vtanh.f32 %v381_v25  ;;  %v653_v31 = vmul.f32 -1.442695, %v381_v25 }
 0x117   : > { %v474_v27 = vpop.f32.mrf.mxu1 }
 0x118   : > { %v688_v28 = vpop.eup %687  ;;  %v475_v29 = vadd.f32 %v686_v26, %v474_v27 }
 0x119   : > { %409 = vrot.lane.b32.xlu1 %v688_v28, %s751_s15 }
 0x11a   : > { %689 = vtanh.f32 %v475_v29  ;;  %v655_v32 = vmul.f32 -1.442695, %v475_v29 }
 0x11b   : > { %691 = vpow2.f32 %v653_v31 }
 0x11c   : > { %693 = vpow2.f32 %v655_v32 }
 0x120   : > { %v690_v30 = vpop.eup %689 }
 0x121   : > { %503 = vrot.lane.b32.xlu1 %v690_v30, %s751_s15  ;;  %v692_v33 = vpop.eup %691 }
 0x122   : > { %v386_v34 = vadd.f32 1.0, %v692_v33  ;;  %v694_v35 = vpop.eup %693 }
 0x123   : > { %v480_v36 = vadd.f32 1.0, %v694_v35 }
 0x124   : > { %695 = vrcp.f32 %v386_v34  ;;  %v398_v45 = vand.u32 2147483648, %v386_v34  ;;  %vm392_vm4 = vweird.f32 %v386_v34  ;;  %v396_v46 = vand.u32 2147483647, %v386_v34 }
 0x125   : > { %697 = vrcp.f32 %v480_v36  ;;  %v492_v54 = vand.u32 2147483648, %v480_v36  ;;  %vm486_vm8 = vweird.f32 %v480_v36  ;;  %v490_v55 = vand.u32 2147483647, %v480_v36 }
 0x126   : > { %v399_v49 = vor.u32 1.1754944e-38, %v398_v45  ;;  %vm397_vm6 = vcmp.eq.f32.partialorder %v396_v46, 8.507059e+37 }
 0x127   : > { %v493_v57 = vor.u32 1.1754944e-38, %v492_v54  ;;  %vm491_vm10 = vcmp.eq.f32.partialorder %v490_v55, 8.507059e+37 }
 0x12a   : > { %v696_v37 = vpop.eup %695 }
 0x12b   : > { %v388_v38 = vmul.f32 %v696_v37, %v386_v34  ;;  %v698_v40 = vpop.eup %697  ;;  %vm393_vm3 = vweird.f32 %v696_v37 }
 0x12c   : > { %v482_v42 = vmul.f32 %v698_v40, %v480_v36  ;;  %vm394_vm5 = vmor %vm392_vm4, %vm393_vm3  ;;  %vm487_vm7 = vweird.f32 %v698_v40 }
 0x12d   : > { %v389_v39 = vsub.f32 1.0, %v388_v38  ;;  %vm488_vm9 = vmor %vm486_vm8, %vm487_vm7 }
 0x12e   : > { %v483_v44 = vsub.f32 1.0, %v482_v42 }
 0x12f   : > { %v390_v41 = vmul.f32 %v696_v37, %v389_v39 }
 0x130   : > { %v484_v48 = vmul.f32 %v698_v40, %v483_v44 }
 0x131   : > { %v391_v43 = vadd.f32 %v696_v37, %v390_v41 }
 0x132   : > { %v485_v52 = vadd.f32 %v698_v40, %v484_v48 }
 0x133   : > { %v395_v47 = vsel %vm394_vm5, %v696_v37, %v391_v43 }
 0x134   : > { %v400_v50 = vsel %vm397_vm6, %v399_v49, %v395_v47  ;;  %v489_v56 = vsel %vm488_vm9, %v698_v40, %v485_v52 }
 0x135   : > { %v494_v58 = vsel %vm491_vm10, %v493_v57, %v489_v56  ;;  %v407_v62 = vmul.f32 %v405_v61, %v400_v50 }
 0x136   : > { %v501_v2 = vmul.f32 %v499_v1, %v494_v58 }
 0x18b   : > { %v410_v51 = vpop.permute.xlu1 %409 }
 0x18c   : > { %v412_v53 = vmul.f32 %v410_v51, %v400_v50 }
 0x18e   : > { %414 = vrot.lane.b32.xlu0 %v412_v53, %s750_s18 }
 0x193   : > { %v504_v59 = vpop.permute.xlu1 %503 }
 0x194   : > { %v506_v60 = vmul.f32 %v504_v59, %v494_v58 }
 0x196   : > { %508 = vrot.lane.b32.xlu1 %v506_v60, %s750_s18 }
 0x200   : > { %v415_v63 = vpop.permute.xlu0 %414 }
 0x201   : > { %v417_v0 = vadd.f32 %v415_v63, %v407_v62 }
 0x203   : > { %699 = vtanh.f32 %v417_v0 }
 0x208   : > { %v509_v3 = vpop.permute.xlu1 %508 }
 0x209   : > { %v700_v4 = vpop.eup %699  ;;  %v511_v5 = vadd.f32 %v509_v3, %v501_v2 }
 0x20a   : > { %420 = vrot.lane.b32.xlu2 %v700_v4, %s749_s30 }
 0x20b   : > { %701 = vtanh.f32 %v511_v5 }
 0x211   : > { %v702_v6 = vpop.eup %701 }
 0x212   : > { %514 = vrot.lane.b32.xlu0 %v702_v6, %s749_s30  ;;  %431 = vrot.lane.b32.xlu2 %v417_v0, %s752_s19 }
 0x264   : > { %v421_v7 = vpop.permute.xlu2 %420 }
 0x265   : > { %v423_v8 = vmul.f32 %v421_v7, %v400_v50 }
 0x267   : > { %425 = vrot.lane.b32.xlu1 %v423_v8, %s753_s27 }
 0x26c   : > { %v432_v9 = vpop.permute.xlu2 %431 }
 0x26d   : > { %434 = vst.msk [vmem:[#allocation3] sm:$0x3] %vm428_vm11, %v432_v9 }
 0x26f   : > { %524 = vrot.lane.b32.xlu1 %v511_v5, %s752_s19 }
 0x284   : > { %v515_v10 = vpop.permute.xlu0 %514 }
 0x285   : > { %v517_v11 = vmul.f32 %v515_v10, %v494_v58 }
 0x287   : > { %519 = vrot.lane.b32.xlu0 %v517_v11, %s753_s27 }
 0x2d9   : > { %v426_v12 = vpop.permute.xlu1 %425 }
 0x2da   : > { %429 = vst.msk [vmem:[#allocation2] sm:$0x3] %vm428_vm11, %v426_v12 }
 0x2db   : > { %435 = vst.msk [vmem:[%s825_s22] sm:$0x3] %vm428_vm11, %v426_v12 }
 0x2e1   : > { %v525_v13 = vpop.permute.xlu1 %524 }
 0x2e2   : > { %527 = vst.msk [vmem:[#allocation5] sm:$0x3] %vm428_vm11, %v525_v13 }
 0x2f9   : > { %v520_v14 = vpop.permute.xlu0 %519 }
 0x2fa   : > { %522 = vst.msk [vmem:[#allocation4] sm:$0x3] %vm428_vm11, %v520_v14 }
 0x2fb   : > { %528 = vst.msk [vmem:[%s830_s26] sm:$0x3] %vm428_vm11, %v520_v14 }
 0x2fc PF: > { %s19_s24 = sadd.s32 1, %s743_s24  }
 0x2fd   : > { %p16_p9 = scmp.ge.s32.totalorder %s19_s24, 10  }
 0x2ff   :  { %18 = sbr.rel (!%p16_p9) target bundleno = 1 (0x1), region = 98 }
 0x304   :  { %565 = vsyncpa [#allocation7], 1 }
 0x305   :  { %567 = vsyncpa [#allocation7 + $0x1], 1 }

// kernel: tacotron2_forward.17
= control target key start
LH: loop header
LB: loop body
LE: loop exit
PB: predicated region body
PF: predicated region fallthrough
CT: control target
= control target key end

     0   :  { %s428_s12 = smov 0   ;;  %s472_s0 = inlined_call_operand.vmem [shape: f32[2,10,8], index: 0, kind: input, shape index: {}]   ;;  %s473_s1 = inlined_call_operand.vmem [shape: f32[5,8,32], index: 1, kind: input, shape index: {}]   ;;  %s474_s2 = inlined_call_operand.vmem [shape: f32[1,32], index: 2, kind: input, shape index: {}]   ;;  %s475_s3 = inlined_call_operand.vmem [shape: f32[2,6,32], index: 3, kind: output, shape index: {}]  }
   0x1 LB: > { %s369_s13 = sadd.s32 4294967295, %s406_s12   ;;  %p373_p0 = scmp.ge.s32.totalorder %s406_s12, 1  ;;  %s406_s12 = sphi %s428_s12, %s13_s12  }
   0x2   : > { %p137_p1 = scmp.lt.s32.totalorder %s406_s12, 3 }
   0x4   : > { %p138_p2 = pnand %p373_p0, %p137_p1 }
   0x5   : > { %p160_p3 = scmp.lt.s32.totalorder (!%p138_p2), %s369_s13, 1 }
   0x6   : > { %141 = sbr.rel (%p138_p2) target bundleno = 163 (0xa3), region = 32 }
   0xb   : > { %v380_v0 = vld [vmem:[%s473_s1 + $0x10] sm:$0xff]  ;;  %v176_v1 = vld [vmem:[%s473_s1] sm:$0xff]  ;;  %v382_v2 = vld [vmem:[%s473_s1 + $0x18] sm:$0xff]  ;;  %s477_s13 = smov (!%p160_p3, %s369_s13), 1  ;;  %vm177_vm0 = vcmask 64512   ;;  %vm257_vm1 = vcmask 1044480  }
   0xc   : > { %248 = vmatpush.msra.mxu2 %v380_v0  ;;  %196 = vmatpush.msra.mxu0 %v176_v1  ;;  %v384_v3 = vld [vmem:[%s473_s1 + $0x20] sm:$0xff]  ;;  %v378_v4 = vld [vmem:[%s473_s1 + $0x8] sm:$0xff]  ;;  %s388_s24 = sshll.u32 %s477_s13, 4  ;;  %vm286_vm2 = vcmask 1043456   ;;  %s376_s30 = sshll.u32 %s477_s13, 3  ;;  %vm314_vm3 = vcmask 259072  }
   0xd   : > { %278 = vmatpush.msra.mxu3 %v382_v2  ;;  %222 = vmatpush.msra.mxu1 %v378_v4  ;;  %s164_s27 = scalar_lea.vmem %s472_s0, %s388_s24  ;;  %v397_v15 = vld [vmem:[%s474_s2] ss:$0 sm:$0xff]  ;;  %s168_s6 = scalar_lea.vmem %s475_s3, %s376_s30 }
   0xe   : > { %307 = vmatpush.msrb.mxu0 %v384_v3  ;;  %v169_v5 = vld [vmem:[%s164_s27] sm:$0xff]  ;;  %v170_v6 = vld [vmem:[%s164_s27 + $0x8] sm:$0x3] }
   0xf   : > { %v230_v7 = vrot.slane %v169_v5, 2  ;;  %377 = vmatmul.msk.f32.vlgmr.msra.gmra.mxu0 %vm177_vm0, %v169_v5  ;;  %v258_v8 = vrot.slane %v169_v5, 3  ;;  %v259_v9 = vrot.slane %v170_v6, 3  ;;  %v204_v10 = vrot.slane %v169_v5, 1 }
  0x10   : > { %v287_v11 = vrot.slane %v169_v5, 4  ;;  %v288_v12 = vrot.slane %v170_v6, 4 }
  0x11   : > { %381 = vmatmul.msk.f32.vlgmr.msra.gmra.mxu2 %vm177_vm0, %v230_v7  ;;  %v260_v13 = vsel %vm257_vm1, %v258_v8, %v259_v9  ;;  %379 = vmatmul.msk.f32.vlgmr.msra.gmra.mxu1 %vm177_vm0, %v204_v10 }
  0x12   : > { %383 = vmatmul.msk.f32.vlgmr.msra.gmra.mxu3 %vm177_vm0, %v260_v13  ;;  %v289_v14 = vsel %vm286_vm2, %v287_v11, %v288_v12 }
  0x17   : > { %385 = vmatmul.msk.f32.vlgmr.msrb.gmra.mxu0 %vm177_vm0, %v289_v14 }
  0x8c   : > { %v198_v16 = vpop.f32.mrf.mxu0 }
  0x8d   : > { %v201_v17 = vadd.f32 %v397_v15, %v198_v16 }
  0x8e   : > { %v224_v18 = vpop.f32.mrf.mxu1 }
  0x8f   : > { %v227_v19 = vadd.f32 %v224_v18, %v201_v17 }
  0x94   : > { %v250_v20 = vpop.f32.mrf.mxu2  ;;  %v309_v23 = vpop.f32.mrf.mxu0 }
  0x95   : > { %v253_v21 = vadd.f32 %v250_v20, %v227_v19  ;;  %v280_v22 = vpop.f32.mrf.mxu3 }
  0x97   : > { %v283_v24 = vadd.f32 %v280_v22, %v253_v21 }
  0x99   : > { %v312_v25 = vadd.f32 %v309_v23, %v283_v24 }
  0x9b   : > { %398 = vtanh.f32 %v312_v25 }
  0xa1   : > { %v399_v26 = vpop.eup %398 }
  0xa2   : > { %315 = vst.msk [vmem:[%s168_s6] sm:$0x3f] %vm314_vm3, %v399_v26 }
  0xa3 PF: > { %s13_s12 = sadd.s32 1, %s406_s12  }
  0xa4   : > { %p10_p4 = scmp.ge.s32.totalorder %s13_s12, 4  }
  0xa6   :  { %12 = sbr.rel (!%p10_p4) target bundleno = 1 (0x1), region = 66 }

// kernel: tacotron2_forward.18
= control target key start
LH: loop header
LB: loop body
LE: loop exit
PB: predicated region body
PF: predicated region fallthrough
CT: control target
= control target key end

     0   :  { %s455_s12 = smov 0   ;;  %s544_s0 = inlined_call_operand.vmem [shape: f32[2,10,32], index: 0, kind: input, shape index: {}]   ;;  %s545_s1 = inlined_call_operand.vmem [shape: f32[5,32,32], index: 1, kind: input, shape index: {}]   ;;  %s546_s2 = inlined_call_operand.vmem [shape: f32[1,32], index: 2, kind: input, shape index: {}]   ;;  %s547_s3 = inlined_call_operand.vmem [shape: f32[2,6,32], index: 3, kind: output, shape index: {}]  }
   0x1 LB: > { %s384_s13 = sadd.s32 4294967295, %s433_s12   ;;  %p388_p0 = scmp.ge.s32.totalorder %s433_s12, 1  ;;  %s433_s12 = sphi %s455_s12, %s13_s12  }
   0x2   : > { %p137_p1 = scmp.lt.s32.totalorder %s433_s12, 3 }
   0x4   : > { %p138_p2 = pnand %p388_p0, %p137_p1 }
   0x5   : > { %p160_p3 = scmp.lt.s32.totalorder (!%p138_p2), %s384_s13, 1 }
   0x6   : > { %141 = sbr.rel (%p138_p2) target bundleno = 167 (0xa7), region = 32 }
   0xb   : > { %v401_v0 = vld [vmem:[%s545_s1 + $0x58] sm:$0xff]  ;;  %v400_v2 = vld [vmem:[%s545_s1 + $0x50] sm:$0xff]  ;;  %v399_v6 = vld [vmem:[%s545_s1 + $0x48] sm:$0xff]  ;;  %s549_s13 = smov (!%p160_p3, %s384_s13), 1  ;;  %vm180_vm0 = vcmask 261120   ;;  %vm269_vm1 = vcmask 1044480  }
   0xc   : > { %v179_v1 = vld [vmem:[%s545_s1 + $0x18] sm:$0xff]  ;;  %254 = vmatpush.msra.mxu2 %v401_v0  ;;  %v178_v4 = vld [vmem:[%s545_s1 + $0x10] sm:$0xff]  ;;  %v177_v8 = vld [vmem:[%s545_s1 + $0x8] sm:$0xff]  ;;  %s415_s11 = sshll.u32 %s549_s13, 4  ;;  %vm301_vm2 = vcmask 1043456   ;;  %s391_s8 = sshll.u32 %s549_s13, 3 }
   0xd   : > { %196 = vmatpush.msra.mxu0 %v179_v1  ;;  %v406_v3 = vld [vmem:[%s545_s1 + $0x78] sm:$0xff]  ;;  %v405_v7 = vld [vmem:[%s545_s1 + $0x70] sm:$0xff]  ;;  %v404_v10 = vld [vmem:[%s545_s1 + $0x68] sm:$0xff]  ;;  %s164_s20 = scalar_lea.vmem %s544_s0, %s415_s11  ;;  %s168_s11 = scalar_lea.vmem %s547_s3, %s391_s8  ;;  %vm329_vm3 = vcmask 259072  }
   0xe   : > { %v396_v5 = vld [vmem:[%s545_s1 + $0x38] sm:$0xff]  ;;  %287 = vmatpush.msra.mxu3 %v406_v3  ;;  %255 = vmatpush.msra.mxu2 %v400_v2  ;;  %v395_v9 = vld [vmem:[%s545_s1 + $0x30] sm:$0xff]  ;;  %v398_v11 = vld [vmem:[%s545_s1 + $0x40] sm:$0xff] }
   0xf   : > { %225 = vmatpush.msra.mxu1 %v396_v5  ;;  %197 = vmatpush.msra.mxu0 %v178_v4  ;;  %v176_v12 = vld [vmem:[%s545_s1] sm:$0xff]  ;;  %v394_v13 = vld [vmem:[%s545_s1 + $0x28] sm:$0xff]  ;;  %v411_v17 = vld [vmem:[%s545_s1 + $0x98] sm:$0xff] }
  0x10   : > { %288 = vmatpush.msra.mxu3 %v405_v7  ;;  %256 = vmatpush.msra.mxu2 %v399_v6  ;;  %v403_v14 = vld [vmem:[%s545_s1 + $0x60] sm:$0xff]  ;;  %v170_v16 = vld [vmem:[%s164_s20 + $0x8] sm:$0x3]  ;;  %v410_v23 = vld [vmem:[%s545_s1 + $0x90] sm:$0xff] }
  0x11   : > { %226 = vmatpush.msra.mxu1 %v395_v9  ;;  %198 = vmatpush.msra.mxu0 %v177_v8  ;;  %v169_v15 = vld [vmem:[%s164_s20] sm:$0xff]  ;;  %v271_v20 = vrot.slane %v170_v16, 3  ;;  %v303_v26 = vrot.slane %v170_v16, 4  ;;  %v409_v27 = vld [vmem:[%s545_s1 + $0x88] sm:$0xff] }
  0x12   : > { %289 = vmatpush.msra.mxu3 %v404_v10  ;;  %257 = vmatpush.msra.mxu2 %v398_v11  ;;  %v239_v18 = vrot.slane %v169_v15, 2  ;;  %v270_v19 = vrot.slane %v169_v15, 3  ;;  %v393_v21 = vld [vmem:[%s545_s1 + $0x20] sm:$0xff]  ;;  %v210_v22 = vrot.slane %v169_v15, 1  ;;  %v302_v25 = vrot.slane %v169_v15, 4 }
  0x13   : > { %227 = vmatpush.msra.mxu1 %v394_v13  ;;  %199 = vmatpush.msra.mxu0 %v176_v12  ;;  %v408_v28 = vld [vmem:[%s545_s1 + $0x80] sm:$0xff] }
  0x14   : > { %290 = vmatpush.msra.mxu3 %v403_v14  ;;  %392 = vmatmul.msk.f32.vlgmr.msra.gmra.mxu0 %vm180_vm0, %v169_v15  ;;  %v272_v24 = vsel %vm269_vm1, %v270_v19, %v271_v20  ;;  %v304_v29 = vsel %vm301_vm2, %v302_v25, %v303_v26  ;;  %v424_v30 = vld [vmem:[%s546_s2] ss:$0 sm:$0xff] }
  0x15   : > { %402 = vmatmul.msk.f32.vlgmr.msra.gmra.mxu2 %vm180_vm0, %v239_v18  ;;  %319 = vmatpush.msrb.mxu0 %v411_v17 }
  0x16   : > { %407 = vmatmul.msk.f32.vlgmr.msra.gmra.mxu3 %vm180_vm0, %v272_v24  ;;  %228 = vmatpush.msra.mxu1 %v393_v21 }
  0x17   : > { %397 = vmatmul.msk.f32.vlgmr.msra.gmra.mxu1 %vm180_vm0, %v210_v22  ;;  %320 = vmatpush.msrb.mxu0 %v410_v23 }
  0x19   : > { %321 = vmatpush.msrb.mxu0 %v409_v27 }
  0x1b   : > { %322 = vmatpush.msrb.mxu0 %v408_v28 }
  0x1c   : > { %412 = vmatmul.msk.f32.vlgmr.msrb.gmra.mxu0 %vm180_vm0, %v304_v29 }
  0x91   : > { %v201_v31 = vpop.f32.mrf.mxu0 }
  0x92   : > { %v204_v32 = vadd.f32 %v424_v30, %v201_v31 }
  0x94   : > { %v230_v33 = vpop.f32.mrf.mxu1 }
  0x95   : > { %v233_v34 = vadd.f32 %v230_v33, %v204_v32 }
  0x98   : > { %v259_v35 = vpop.f32.mrf.mxu2 }
  0x99   : > { %v262_v36 = vadd.f32 %v259_v35, %v233_v34  ;;  %v292_v37 = vpop.f32.mrf.mxu3  ;;  %v324_v38 = vpop.f32.mrf.mxu0 }
  0x9b   : > { %v295_v39 = vadd.f32 %v292_v37, %v262_v36 }
  0x9d   : > { %v327_v40 = vadd.f32 %v324_v38, %v295_v39 }
  0x9f   : > { %425 = vtanh.f32 %v327_v40 }
  0xa5   : > { %v426_v41 = vpop.eup %425 }
  0xa6   : > { %330 = vst.msk [vmem:[%s168_s11] sm:$0x3f] %vm329_vm3, %v426_v41 }
  0xa7 PF: > { %s13_s12 = sadd.s32 1, %s433_s12  }
  0xa8   : > { %p10_p4 = scmp.ge.s32.totalorder %s13_s12, 4  }
  0xaa   :  { %12 = sbr.rel (!%p10_p4) target bundleno = 1 (0x1), region = 66 }

// kernel: tacotron2_forward.21
= control target key start
LH: loop header
LB: loop body
LE: loop exit
PB: predicated region body
PF: predicated region fallthrough
CT: control target
= control target key end

     0   :  { %s452_s12 = smov 0   ;;  %s541_s0 = inlined_call_operand.vmem [shape: f32[2,10,32], index: 0, kind: input, shape index: {}]   ;;  %s542_s1 = inlined_call_operand.vmem [shape: f32[5,32,8], index: 1, kind: input, shape index: {}]   ;;  %s543_s2 = inlined_call_operand.vmem [shape: f32[1,8], index: 2, kind: input, shape index: {}]   ;;  %s544_s3 = inlined_call_operand.vmem [shape: f32[2,6,8], index: 3, kind: output, shape index: {}]  }
   0x1 LB: > { %s383_s13 = sadd.s32 4294967295, %s430_s12   ;;  %p387_p0 = scmp.ge.s32.totalorder %s430_s12, 1  ;;  %s430_s12 = sphi %s452_s12, %s13_s12  }
   0x2   : > { %p137_p1 = scmp.lt.s32.totalorder %s430_s12, 3 }
   0x4   : > { %p138_p2 = pnand %p387_p0, %p137_p1 }
   0x5   : > { %p160_p3 = scmp.lt.s32.totalorder (!%p138_p2), %s383_s13, 1 }
   0x6   : > { %141 = sbr.rel (%p138_p2) target bundleno = 160 (0xa0), region = 32 }
   0xb   : > { %v400_v0 = vld [vmem:[%s542_s1 + $0x58] sm:$0xff]  ;;  %v399_v2 = vld [vmem:[%s542_s1 + $0x50] sm:$0xff]  ;;  %v398_v6 = vld [vmem:[%s542_s1 + $0x48] sm:$0xff]  ;;  %s546_s13 = smov (!%p160_p3, %s383_s13), 1  ;;  %vm180_vm0 = vcmask 261120   ;;  %vm269_vm1 = vcmask 1044480  }
   0xc   : > { %v179_v1 = vld [vmem:[%s542_s1 + $0x18] sm:$0xff]  ;;  %254 = vmatpush.msra.mxu2 %v400_v0  ;;  %v178_v4 = vld [vmem:[%s542_s1 + $0x10] sm:$0xff]  ;;  %v177_v8 = vld [vmem:[%s542_s1 + $0x8] sm:$0xff]  ;;  %s414_s11 = sshll.u32 %s546_s13, 4  ;;  %vm301_vm2 = vcmask 1043456   ;;  %s390_s8 = sshll.u32 %s546_s13, 3 }
   0xd   : > { %196 = vmatpush.msra.mxu0 %v179_v1  ;;  %v405_v3 = vld [vmem:[%s542_s1 + $0x78] sm:$0xff]  ;;  %v404_v7 = vld [vmem:[%s542_s1 + $0x70] sm:$0xff]  ;;  %v403_v10 = vld [vmem:[%s542_s1 + $0x68] sm:$0xff]  ;;  %s164_s20 = scalar_lea.vmem %s541_s0, %s414_s11  ;;  %s168_s11 = scalar_lea.vmem %s544_s3, %s390_s8  ;;  %vm328_vm3 = vcmask 62464  }
   0xe   : > { %v395_v5 = vld [vmem:[%s542_s1 + $0x38] sm:$0xff]  ;;  %287 = vmatpush.msra.mxu3 %v405_v3  ;;  %255 = vmatpush.msra.mxu2 %v399_v2  ;;  %v394_v9 = vld [vmem:[%s542_s1 + $0x30] sm:$0xff]  ;;  %v397_v11 = vld [vmem:[%s542_s1 + $0x40] sm:$0xff] }
   0xf   : > { %225 = vmatpush.msra.mxu1 %v395_v5  ;;  %197 = vmatpush.msra.mxu0 %v178_v4  ;;  %v176_v12 = vld [vmem:[%s542_s1] sm:$0xff]  ;;  %v393_v13 = vld [vmem:[%s542_s1 + $0x28] sm:$0xff]  ;;  %v410_v17 = vld [vmem:[%s542_s1 + $0x98] sm:$0xff] }
  0x10   : > { %288 = vmatpush.msra.mxu3 %v404_v7  ;;  %256 = vmatpush.msra.mxu2 %v398_v6  ;;  %v402_v14 = vld [vmem:[%s542_s1 + $0x60] sm:$0xff]  ;;  %v170_v16 = vld [vmem:[%s164_s20 + $0x8] sm:$0x3]  ;;  %v409_v23 = vld [vmem:[%s542_s1 + $0x90] sm:$0xff] }
  0x11   : > { %226 = vmatpush.msra.mxu1 %v394_v9  ;;  %198 = vmatpush.msra.mxu0 %v177_v8  ;;  %v169_v15 = vld [vmem:[%s164_s20] sm:$0xff]  ;;  %v271_v20 = vrot.slane %v170_v16, 3  ;;  %v303_v26 = vrot.slane %v170_v16, 4  ;;  %v408_v27 = vld [vmem:[%s542_s1 + $0x88] sm:$0xff] }
  0x12   : > { %289 = vmatpush.msra.mxu3 %v403_v10  ;;  %257 = vmatpush.msra.mxu2 %v397_v11  ;;  %v239_v18 = vrot.slane %v169_v15, 2  ;;  %v270_v19 = vrot.slane %v169_v15, 3  ;;  %v392_v21 = vld [vmem:[%s542_s1 + $0x20] sm:$0xff]  ;;  %v210_v22 = vrot.slane %v169_v15, 1  ;;  %v302_v25 = vrot.slane %v169_v15, 4 }
  0x13   : > { %227 = vmatpush.msra.mxu1 %v393_v13  ;;  %199 = vmatpush.msra.mxu0 %v176_v12  ;;  %v407_v28 = vld [vmem:[%s542_s1 + $0x80] sm:$0xff] }
  0x14   : > { %290 = vmatpush.msra.mxu3 %v402_v14  ;;  %391 = vmatmul.msk.f32.vlgmr.msra.gmra.mxu0 %vm180_vm0, %v169_v15  ;;  %v272_v24 = vsel %vm269_vm1, %v270_v19, %v271_v20  ;;  %v304_v29 = vsel %vm301_vm2, %v302_v25, %v303_v26  ;;  %v423_v30 = vld [vmem:[%s543_s2] ss:$0 sm:$0xff] }
  0x15   : > { %401 = vmatmul.msk.f32.vlgmr.msra.gmra.mxu2 %vm180_vm0, %v239_v18  ;;  %319 = vmatpush.msrb.mxu0 %v410_v17 }
  0x16   : > { %406 = vmatmul.msk.f32.vlgmr.msra.gmra.mxu3 %vm180_vm0, %v272_v24  ;;  %228 = vmatpush.msra.mxu1 %v392_v21 }
  0x17   : > { %396 = vmatmul.msk.f32.vlgmr.msra.gmra.mxu1 %vm180_vm0, %v210_v22  ;;  %320 = vmatpush.msrb.mxu0 %v409_v23 }
  0x19   : > { %321 = vmatpush.msrb.mxu0 %v408_v27 }
  0x1b   : > { %322 = vmatpush.msrb.mxu0 %v407_v28 }
  0x1c   : > { %411 = vmatmul.msk.f32.vlgmr.msrb.gmra.mxu0 %vm180_vm0, %v304_v29 }
  0x91   : > { %v201_v31 = vpop.f32.mrf.mxu0 }
  0x92   : > { %v204_v32 = vadd.f32 %v423_v30, %v201_v31 }
  0x94   : > { %v230_v33 = vpop.f32.mrf.mxu1 }
  0x95   : > { %v233_v34 = vadd.f32 %v230_v33, %v204_v32 }
  0x98   : > { %v259_v35 = vpop.f32.mrf.mxu2 }
  0x99   : > { %v262_v36 = vadd.f32 %v259_v35, %v233_v34  ;;  %v292_v37 = vpop.f32.mrf.mxu3  ;;  %v324_v38 = vpop.f32.mrf.mxu0 }
  0x9b   : > { %v295_v39 = vadd.f32 %v292_v37, %v262_v36 }
  0x9d   : > { %v327_v40 = vadd.f32 %v324_v38, %v295_v39 }
  0x9f   : > { %329 = vst.msk [vmem:[%s168_s11] sm:$0x3f] %vm328_vm3, %v327_v40 }
  0xa0 PF: > { %s13_s12 = sadd.s32 1, %s430_s12  }
  0xa1   : > { %p10_p4 = scmp.ge.s32.totalorder %s13_s12, 4  }
  0xa3   :  { %12 = sbr.rel (!%p10_p4) target bundleno = 1 (0x1), region = 66 }

// kernel: tacotron2_forward.16
= control target key start
LH: loop header
LB: loop body
LE: loop exit
PB: predicated region body
PF: predicated region fallthrough
CT: control target
= control target key end

     0   :  { %s2750_s0 = inlined_call_operand.vmem [shape: f32[6,2,8], index: 0, kind: input, shape index: {}]   ;;  %s2751_s1 = inlined_call_operand.vmem [shape: f32[2,8,32], index: 1, kind: input, shape index: {}]   ;;  %s2752_s2 = inlined_call_operand.vmem [shape: f32[2,8,16], index: 2, kind: input, shape index: {}]   ;;  %s2753_s3 = inlined_call_operand.vmem [shape: f32[2,8], index: 3, kind: input, shape index: {}]   ;;  %s2754_s4 = inlined_call_operand.vmem [shape: f32[8,32], index: 4, kind: input, shape index: {}]   ;;  %s2755_s5 = inlined_call_operand.vmem [shape: f32[32,16], index: 5, kind: input, shape index: {}]   ;;  %s2756_s6 = inlined_call_operand.vmem [shape: f32[1,32], index: 6, kind: input, shape index: {}]   ;;  %s2757_s7 = inlined_call_operand.vmem [shape: f32[1,16], index: 7, kind: input, shape index: {}]   ;;  %s2758_s8 = inlined_call_operand.hbm [shape: f32[16,128], index: 8, kind: input, shape index: {}]   ;;  %s2759_s9 = inlined_call_operand.vmem [shape: f32[32,128], index: 9, kind: input, shape index: {}]   ;;  %s2760_s10 = inlined_call_operand.vmem [shape: f32[32,128], index: 10, kind: input, shape index: {}]   ;;  %s2761_s11 = inlined_call_operand.hbm [shape: f32[1,128], index: 11, kind: input, shape index: {}]   ;;  %s2762_s12 = inlined_call_operand.vmem [shape: f32[32,16], index: 12, kind: input, shape index: {}]   ;;  %s2763_s13 = inlined_call_operand.hbm [shape: f32[5,1,16], index: 13, kind: input, shape index: {}]   ;;  %s2764_s14 = inlined_call_operand.vmem [shape: f32[1,16], index: 14, kind: input, shape index: {}]   ;;  %s2765_s15 = inlined_call_operand.vmem [shape: f32[32,128], index: 15, kind: input, shape index: {}]   ;;  %s2766_s16 = inlined_call_operand.hbm [shape: f32[32,128], index: 16, kind: input, shape index: {}]   ;;  %s2767_s17 = inlined_call_operand.hbm [shape: f32[32,128], index: 17, kind: input, shape index: {}]   ;;  %s2768_s18 = inlined_call_operand.hbm [shape: f32[1,128], index: 18, kind: input, shape index: {}]   ;;  %s2769_s19 = inlined_call_operand.vmem [shape: f32[32,9], index: 19, kind: input, shape index: {}]   ;;  %s2770_s20 = inlined_call_operand.vmem [shape: f32[32,9], index: 20, kind: input, shape index: {}]   ;;  %s2771_s21 = inlined_call_operand.vmem [shape: f32[1,9], index: 21, kind: input, shape index: {}]   ;;  %s2772_s22 = inlined_call_operand.vmem [shape: f32[6,2,8], index: 22, kind: output, shape index: {0}]   ;;  %s2773_s23 = inlined_call_operand.vmem [shape: f32[6,2,1], index: 23, kind: output, shape index: {1}]   ;;  %s2774_s24 = inlined_call_operand.hbm [shape: f32[6,2,8], index: 24, kind: output, shape index: {2}]  }
   0x1   :  { %2792 = sst [smem:[#allocation32_spill]] %s2750_s0 }
   0x2   :  { %2793 = sst [smem:[#allocation33_spill]] %s2751_s1 }
   0x3   :  { %2794 = sst [smem:[#allocation34_spill]] %s2752_s2 }
   0x4   :  { %2795 = sst [smem:[#allocation35_spill]] %s2753_s3 }
   0x5   :  { %2796 = sst [smem:[#allocation36_spill]] %s2754_s4 }
   0x6   :  { %2797 = sst [smem:[#allocation37_spill]] %s2755_s5 }
   0x7   :  { %2798 = sst [smem:[#allocation38_spill]] %s2756_s6 }
   0x8   :  { %2799 = sst [smem:[#allocation39_spill]] %s2757_s7 }
   0x9   :  { %2800 = sst [smem:[#allocation40_spill]] %s2758_s8 }
   0xa   :  { %2801 = sst [smem:[#allocation41_spill]] %s2759_s9 }
   0xb   :  { %2802 = sst [smem:[#allocation42_spill]] %s2760_s10 }
   0xc   :  { %2803 = sst [smem:[#allocation43_spill]] %s2761_s11 }
   0xd   :  { %2804 = sst [smem:[#allocation44_spill]] %s2766_s16 }
   0xe   :  { %2805 = sst [smem:[#allocation45_spill]] %s2769_s19 }
   0xf   :  { %2806 = sst [smem:[#allocation46_spill]] %s2771_s21 }
  0x10   :  { %2807 = sst [smem:[#allocation47_spill]] %s2774_s24 }
  0x11   :  { %30 = vsyncpa [#allocation9], 0 }
  0x12   :  { %31 = vsyncpa [#allocation12], 0 }
  0x13   :  { %32 = vsyncpa [#allocation15], 0 }
  0x14   :  { %33 = vsyncpa [#allocation18], 0 }
  0x15   :  { %34 = vsyncpa [#allocation10], 0 }
  0x16   :  { %36 = vsyncpa [#allocation10 + $0x1], 0  ;;  %s2397_s5 = smov 0   ;;  %s2399_s26 = smov 0  }
  0x17   :  { %s2401_s27 = smov 0   ;;  %s2403_s28 = smov 0  }
  0x18 LB: > { %2808 = sst [smem:[#allocation25_spill]] %s2241_s5  ;;  %s2418_s6 = sadd.s32 4294967295, %s2253_s28   ;;  %s2253_s28 = sphi %s2403_s28, %s2845_s28   ;;  %s2249_s27 = sphi %s2401_s27, %s2847_s27   ;;  %s2245_s26 = sphi %s2399_s26, %s2849_s26   ;;  %s2241_s5 = sphi %s2397_s5, %s2848_s5  }
  0x19   : > { %2809 = sst [smem:[#allocation26_spill]] %s2249_s27  ;;  %s1788_s2 = sadd.s32 4294967294, %s2253_s28  }
  0x1a   : > { %2810 = sst [smem:[#allocation27_spill]] %s2253_s28  ;;  %s2422_s29 = sadd.s32 1, %s2253_s28  }
  0x1b   : > { %2811 = sst [smem:[#allocation28_spill]] %s2422_s29  ;;  %s568_s0 = sadd.s32 1, %s2249_s27 }
  0x1c   : > { %s565_s7 = ssub.s32 %s2253_s28, %s2422_s29  ;;  %p578_p0 = scmp.ne.s32.totalorder %s2249_s27, %s2245_s26 }
  0x1d   : > { %p566_p1 = scmp.eq.s32.totalorder %s565_s7, 0  ;;  %p579_p2 = scmp.eq.s32.totalorder %s2418_s6, 5 }
  0x1e   : > { %p584_p3 = scmp.ne.s32.totalorder %s2245_s26, %s2241_s5  ;;  %p585_p4 = scmp.eq.s32.totalorder %s1788_s2, 5 }
  0x1f   : > { %s2433_s30 = scalar_select %p566_p1, %s2249_s27, %s568_s0  }
  0x20   : > { %p2435_p5 = por %p579_p2, %p578_p0  ;;  %p2439_p6 = por %p585_p4, %p584_p3 }
  0x21   : > { %2812 = sst [smem:[#allocation29_spill]] %s2433_s30  ;;  %p1789_p7 = scmp.ge.s32.totalorder %s2253_s28, 1 }
  0x22   : > { %s2813_s3 = scalar_select %p2435_p5, 1, 0 }
  0x23   : > { %s2815_s25 = scalar_select %p2439_p6, 1, 0 }
  0x24   : > { %2814 = sst [smem:[#allocation30_spill]] %s2813_s3  ;;  %p592_p8 = scmp.lt.s32.totalorder %s2253_s28, 7 }
  0x25   : > { %2816 = sst [smem:[#allocation31_spill]] %s2815_s25  ;;  %p1790_p9 = scmp.ne.s32.totalorder %s2418_s6, 0 }
  0x26   : > { %p1876_p10 = scmp.eq.s32.totalorder %s2418_s6, 0  ;;  %p2447_p11 = pnand %p1789_p7, %p592_p8 }
  0x27   : > { %s2818_s11 = sld [smem:[#allocation43_spill]]  ;;  %s2255_s0 = smov [#allocation11]  }
  0x28   : > { %p1853_p12 = pneg %p2447_p11  ;;  %s647_s7 = sshll.u32 %s2255_s0, 4  ;;  %s648_s7 = int_to_ptr.vmem [resolvable:$true] %s647_s7 }
  0x29   : > { %s2820_s16 = sld [smem:[#allocation44_spill]]  ;;  %s2256_s4 = smov [#allocation14]  }
  0x2a   : > { %p2458_p13 = pnand %p1876_p10, %p1853_p12  ;;  %s681_s1 = sshll.u32 %s2256_s4, 4  ;;  %s682_s1 = int_to_ptr.vmem [resolvable:$true] %s681_s1 }
  0x2b   : > { %s2821_s5 = sld [smem:[#allocation40_spill]]  ;;  %s2257_s24 = smov 128  }
  0x2c   : > { %s2258_s3 = smov 8   ;;  %s2259_s21 = smov [#allocation8]  }
  0x2d   : > { %s645_s2 = sshll.u32 %s2818_s11, 4  ;;  %s626_s19 = sshll.u32 %s2259_s21, 4  ;;  %s646_s2 = int_to_ptr.hbm [resolvable:$true] %s645_s2  ;;  %s627_s19 = int_to_ptr.vmem [resolvable:$true] %s626_s19 }
  0x2e   : > { %1859 = dma.hbm_to_vmem [thread:$0]  (!%p2458_p13), %s646_s2, 16, %s648_s7, [#allocation12]  }
  0x2f   : > { %s679_s25 = sshll.u32 %s2820_s16, 4  ;;  %s659_s16 = sshll.u32 %s2763_s13, 4  ;;  %s680_s25 = int_to_ptr.hbm [resolvable:$true] %s679_s25  ;;  %s660_s16 = int_to_ptr.hbm [resolvable:$true] %s659_s16 }
  0x30   : > { %1865 = dma.hbm_to_vmem [thread:$0]  (!%p2458_p13), %s680_s25, 512, %s682_s1, [#allocation15], %s2257_s24, %s2257_s24, %s2258_s3  }
  0x31   : > { %s624_s28 = sshll.u32 %s2821_s5, 4  ;;  %s2260_s11 = smov [#allocation13]   ;;  %s625_s28 = int_to_ptr.hbm [resolvable:$true] %s624_s28 }
  0x32   : > { %1856 = dma.hbm_to_vmem [thread:$0]  (!%p2458_p13), %s625_s28, 256, %s627_s19, [#allocation9], %s2257_s24, %s2257_s24, %s2258_s3  }
  0x33   : > { %s661_s5 = sshll.u32 %s2260_s11, 4  ;;  %s2261_s2 = smov 16   ;;  %s662_s5 = int_to_ptr.vmem [resolvable:$true] %s661_s5 }
  0x34   : > { %s2262_s7 = smov 1   ;;  %s693_s1 = sshll.u32 %s2767_s17, 4  ;;  %s694_s1 = int_to_ptr.hbm [resolvable:$true] %s693_s1 }
  0x35   : > { %1862 = dma.hbm_to_vmem [thread:$0]  (!%p2458_p13), %s660_s16, 80, %s662_s5, [#allocation12], %s2261_s2, %s2261_s2, %s2262_s7  }
  0x36   : > { %s2263_s0 = smov [#allocation16]   ;;  %s708_s19 = sshll.u32 %s2768_s18, 4  ;;  %s709_s19 = int_to_ptr.hbm [resolvable:$true] %s708_s19 }
  0x37   : > { %s695_s21 = sshll.u32 %s2263_s0, 4  ;;  %s2264_s28 = smov [#allocation17]   ;;  %s696_s21 = int_to_ptr.vmem [resolvable:$true] %s695_s21 }
  0x38   : > { %1868 = dma.hbm_to_vmem [thread:$0]  (!%p2458_p13), %s694_s1, 512, %s696_s21, [#allocation15], %s2257_s24, %s2257_s24, %s2258_s3  }
  0x39   : > { %s710_s11 = sshll.u32 %s2264_s28, 4  ;;  %739 = sbr.rel (%p2447_p11) target bundleno = 2738 (0xab2), region = 108  ;;  %s711_s11 = int_to_ptr.vmem [resolvable:$true] %s710_s11 }
  0x3a   : > { %1871 = dma.hbm_to_vmem [thread:$0]  (!%p2458_p13), %s709_s19, 16, %s711_s11, [#allocation18]  }
  0x3e   : > { %2220 = dma.done.wait (%p1876_p10), [#allocation9], 256  }
  0x3f   : > { %2222 = vsyncadd (%p1876_p10), [#allocation9], 4294967040 }
  0x40   : > { %2224 = dma.done.wait (%p1876_p10), [#allocation12], 96  }
  0x41   : > { %2226 = vsyncadd (%p1876_p10), [#allocation12], 4294967200 }
  0x42   : > { %2228 = dma.done.wait (%p1876_p10), [#allocation15], 1024  }
  0x43   : > { %2230 = vsyncadd (%p1876_p10), [#allocation15], 4294966272 }
  0x44   : > { %2232 = dma.done.wait (%p1876_p10), [#allocation18], 16  }
  0x45   : > { %2234 = vsyncadd (%p1876_p10), [#allocation18], 4294967280  ;;  %s2788_s16 = sand.u32 1, %s2245_s26   ;;  %p838_p0 = scmp.lt.s32.totalorder %s2418_s6, 5 }
  0x46   : > { %s2511_s24 = sshll.u32 %s2788_s16, 1  ;;  %s2822_s2 = sld [smem:[#allocation32_spill]] }
  0x47   : > { %s839_s30 = scalar_select %p838_p0, %s2418_s6, 5 }
  0x48   : > { %s2789_s29 = scalar_lea.vmem [#allocation19], %s2511_s24  ;;  %853 = sbr.rel (%p1790_p9) target bundleno = 84 (0x54), region = 136 }
  0x49   : > { %s2514_s3 = sshll.u32 %s839_s30, 1 }
  0x4a   : > { %s845_s1 = scalar_lea.vmem %s2772_s22, %s2514_s3 }
  0x4c   : > { %s841_s7 = scalar_lea.vmem %s2822_s2, %s2514_s3 }
  0x4d   : > { %vm854_vm0 = vcmask 254976   ;;  %v2265_v0 = vmov 0.0   ;;  %vm860_vm1 = vcmask 58368  }
  0x4e   : > { %855 = vst.msk [vmem:[#allocation2] sm:$0x3] %vm854_vm0, %v2265_v0 }
  0x4f   : > { %856 = vst.msk [vmem:[#allocation3] sm:$0x3] %vm854_vm0, %v2265_v0 }
  0x50   : > { %857 = vst.msk [vmem:[#allocation4] sm:$0x3] %vm854_vm0, %v2265_v0 }
  0x51   : > { %858 = vst.msk [vmem:[#allocation5] sm:$0x3] %vm854_vm0, %v2265_v0 }
  0x52   : > { %859 = vst.msk [vmem:[#allocation6] sm:$0x3] %vm854_vm0, %v2265_v0 }
  0x53   : > { %861 = vst.msk [vmem:[#allocation7] sm:$0x3] %vm860_vm1, %v2265_v0 }
  0x54 PF: > { %s2823_s11 = sld [smem:[#allocation36_spill]]  ;;  %v862_v2 = vld [vmem:[%s841_s7] sm:$0x3]  ;;  %vm868_vm2 = vcmask 64512   ;;  %vm901_vm3 = vcmask 261120   ;;  %v929_v14 = vld [vmem:[#allocation8 + $0x8] sm:$0xff] }
  0x55   : > { %s2824_s5 = sld [smem:[#allocation37_spill]]  ;;  %975 = vmatpush.msra.mxu3 %v929_v14  ;;  %v928_v16 = vld [vmem:[#allocation8] sm:$0xff]  ;;  %v927_v22 = vld [vmem:[#allocation2] sm:$0x3]  ;;  %vm957_vm4 = vcmask 130048   ;;  %s2266_s28 = smov 64  }
  0x56   : > { %s2826_s9 = sld [smem:[#allocation41_spill]]  ;;  %v1954_v31 = vld [vmem:[#allocation11] ss:$0 sm:$0xff]  ;;  %v1034_v35 = vld [vmem:[#allocation3] sm:$0x3]  ;;  %v1069_v58 = vld [vmem:[%s2762_s12 + $0x10] sm:$0xff] }
  0x57   : > { %976 = vmatpush.msra.mxu3 %v928_v16  ;;  %s2828_s10 = sld [smem:[#allocation42_spill]]  ;;  %v1070_v56 = vld [vmem:[%s2762_s12 + $0x18] sm:$0xff]  ;;  %v1376_v59 = vld [vmem:[%s2765_s15 + $0x10] sm:$0xff]  ;;  %v1068_v60 = vld [vmem:[%s2762_s12 + $0x8] sm:$0xff]  ;;  %s2268_s27 = smov 2   ;;  %vm1060_vm9 = vcmask 254976  }
  0x58   : > { %s2829_s7 = sld [smem:[#allocation39_spill]]  ;;  %v1377_v57 = vld [vmem:[%s2765_s15 + $0x18] sm:$0xff]  ;;  %v1375_v61 = vld [vmem:[%s2765_s15 + $0x8] sm:$0xff]  ;;  %v1067_v62 = vld [vmem:[%s2762_s12] sm:$0xff]  ;;  %vm1098_vm10 = vcmask 15360   ;;  %vm1100_vm11 = vcmask 80896  }
  0x59   : > { %v926_v17 = vld [vmem:[#allocation6] sm:$0x3]  ;;  %1085 = vmatpush.msrb.mxu3 %v1070_v56  ;;  %v1374_v63 = vld [vmem:[%s2765_s15] sm:$0xff]  ;;  %vm1266_vm12 = vcmask 1041409   ;;  %vm1269_vm13 = vcmask 58368   ;;  %s2270_s19 = smov 96  }
  0x5a   : > { %v863_v1 = vld [vmem:[%s2823_s11] sm:$0xff]  ;;  %s2267_s11 = smov 32   ;;  %s2833_s8 = sld [smem:[#allocation33_spill]] }
  0x5b   : > { %s2825_s2 = smov %s2824_s5  ;;  %v896_v3 = vld [vmem:[%s2824_s5 + $0x18] sm:$0xff]  ;;  %887 = vmatpush.msra.mxu0 %v863_v1  ;;  %s2827_s5 = sld [smem:[#allocation38_spill]]  ;;  %1086 = vmatpush.msrb.mxu3 %v1069_v58 }
  0x5c   : > { %917 = vmatpush.msra.mxu1 %v896_v3  ;;  %1809 = vmatmul.msk.f32.vlgmr.msra.gmra.mxu0 %vm868_vm2, %v862_v2  ;;  %v895_v4 = vld [vmem:[%s2825_s2 + $0x10] sm:$0xff]  ;;  %v894_v5 = vld [vmem:[%s2825_s2 + $0x8] sm:$0xff]  ;;  %v893_v6 = vld [vmem:[%s2825_s2] sm:$0xff]  ;;  %v1103_v3 = vlaneseq  ;;  %s2834_s21 = sld [smem:[#allocation45_spill]]  ;;  %s2839_s16 = scalar_lea.vmem [#allocation19], %s2511_s24 }
  0x5d   : > { %v933_v7 = vld [vmem:[%s2826_s9 + $0x18] sm:$0xff]  ;;  %v932_v12 = vld [vmem:[%s2826_s9 + $0x10] sm:$0xff]  ;;  %v931_v13 = vld [vmem:[%s2826_s9 + $0x8] sm:$0xff]  ;;  %1087 = vmatpush.msrb.mxu3 %v1068_v60 }
  0x5e   : > { %918 = vmatpush.msra.mxu1 %v895_v4  ;;  %949 = vmatpush.msra.mxu2 %v933_v7  ;;  %v930_v15 = vld [vmem:[%s2826_s9] sm:$0xff]  ;;  %v984_v18 = vld [vmem:[%s2828_s10 + $0x18] sm:$0xff]  ;;  %v983_v19 = vld [vmem:[%s2828_s10 + $0x10] sm:$0xff]  ;;  %v1104_v4 = vshrl.u32 %v1103_v3, 7 }
  0x5f   : > { %1000 = vmatpush.msrb.mxu0 %v984_v18  ;;  %v982_v20 = vld [vmem:[%s2828_s10 + $0x8] sm:$0xff]  ;;  %v981_v21 = vld [vmem:[%s2828_s10] sm:$0xff]  ;;  %1088 = vmatpush.msrb.mxu3 %v1067_v62 }
  0x60   : > { %919 = vmatpush.msra.mxu1 %v894_v5  ;;  %950 = vmatpush.msra.mxu2 %v932_v12  ;;  %v1953_v23 = vld [vmem:[%s2829_s7] ss:$0 sm:$0xff]  ;;  %v2612_v2 = vld [vmem:[#allocation7] sm:$0x3]  ;;  %v1126_v5 = vadd.s32 1, %v1104_v4  ;;  %v1147_v12 = vadd.s32 2, %v1104_v4 }
  0x61   : > { %v1952_v8 = vld [vmem:[%s2827_s5] ss:$0 sm:$0xff]  ;;  %1001 = vmatpush.msrb.mxu0 %v983_v19  ;;  %1939 = vset.pattern.permute.xlu1 %v1104_v4  ;;  %v1189_v14 = vadd.s32 4, %v1104_v4  ;;  %v1957_v19 = vld [vmem:[#allocation13] ss:$0 sm:$0xff]  ;;  %s2830_s7 = sld [smem:[#allocation35_spill]] }
  0x62   : > { %920 = vmatpush.msra.mxu1 %v893_v6  ;;  %951 = vmatpush.msra.mxu2 %v931_v13  ;;  %v1168_v13 = vadd.s32 3, %v1104_v4  ;;  %s2831_s5 = sld [smem:[#allocation34_spill]] }
  0x63   : > { %1002 = vmatpush.msrb.mxu0 %v982_v20  ;;  %1938 = vset.pattern.permute.xlu0 %v1104_v4  ;;  %v1955_v20 = vld [vmem:[#allocation13 + $0x1] ss:$0 sm:$0xff] }
  0x64   : > { %952 = vmatpush.msra.mxu2 %v930_v15  ;;  %1940 = vset.pattern.permute.xlu2 %v1126_v5 }
  0x65   : > { %1811 = vmatmul.msk.f32.vlgmr.msra.gmra.mxu2 %vm901_vm3, %v926_v17  ;;  %1003 = vmatpush.msrb.mxu0 %v981_v21 }
  0x66   : > { %1813 = vmatmul.msk.f32.vlgmr.msrb.gmra.mxu0 %vm901_vm3, %v927_v22  ;;  %1416 = vmatpush.msrb.mxu2 %v1377_v57 }
  0x68   : > { %1417 = vmatpush.msrb.mxu2 %v1376_v59  ;;  %s2832_s25 = smov %s2831_s5 }
  0x69   : > { %v1210_v59 = vld [vmem:[%s2832_s25] sm:$0xff] }
  0x6a   : > { %1418 = vmatpush.msrb.mxu2 %v1375_v61 }
  0x6c   : > { %1419 = vmatpush.msrb.mxu2 %v1374_v63 }
  0xd9   : > { %v889_v9 = vpop.f32.mrf.mxu0 }
  0xda   : > { %v890_v10 = vadd.f32 %v1952_v8, %v889_v9 }
  0xdc   : > { %v892_v11 = vmax.f32 %v890_v10, 0.0 }
  0xde   : > { %1810 = vmatmul.msk.f32.vlgmr.msra.gmra.mxu1 %vm901_vm3, %v892_v11 }
  0xe3   : > { %v1005_v29 = vpop.f32.mrf.mxu0 }
  0xe8   : > { %v954_v27 = vpop.f32.mrf.mxu2 }
 0x15b   : > { %v922_v24 = vpop.f32.mrf.mxu1 }
 0x15c   : > { %v923_v25 = vadd.f32 %v1953_v23, %v922_v24  ;;  %v1956_v24 = vld [vmem:[#allocation13 + $0x2] ss:$0 sm:$0xff] }
 0x15e   : > { %v925_v26 = vmax.f32 %v923_v25, 0.0 }
 0x160   : > { %1812 = vmatmul.msk.f32.vlgmr.msra.gmra.mxu3 %vm957_vm4, %v925_v26 }
 0x1e3   : > { %v978_v28 = vpop.f32.mrf.mxu3 }
 0x1e4   : > { %v979_v30 = vadd.f32 %v978_v28, %v954_v27 }
 0x1e6   : > { %v1008_v32 = vadd.f32 %v1005_v29, %v979_v30  ;;  %v1958_v29 = vld [vmem:[#allocation13 + $0x3] ss:$0 sm:$0xff] }
 0x1e8   : > { %v1013_v33 = vadd.f32 %v1954_v31, %v1008_v32 }
 0x1ea   : > { %1963 = vtanh.f32 %v1013_v33  ;;  %v1814_v36 = vmul.f32 -1.442695, %v1013_v33  ;;  %v1959_v33 = vld [vmem:[#allocation13 + $0x4] ss:$0 sm:$0xff] }
 0x1ec   : > { %1965 = vpow2.f32 %v1814_v36  ;;  %v1234_v36 = vld [vmem:[%s2830_s7] sm:$0x3] }
 0x1f0   : > { %v1964_v34 = vpop.eup %1963 }
 0x1f1   : > { %1041 = vrot.lane.b32.xlu0 %v1964_v34, %s2266_s28 }
 0x1f2   : > { %v1966_v37 = vpop.eup %1965 }
 0x1f3   : > { %v1017_v38 = vadd.f32 1.0, %v1966_v37  ;;  %v1211_v37 = vld [vmem:[%s2831_s5 + $0x8] sm:$0xff]  ;;  %s2837_s5 = sld [smem:[#allocation47_spill]] }
 0x1f5   : > { %1967 = vrcp.f32 %v1017_v38  ;;  %v1029_v44 = vand.u32 2147483648, %v1017_v38  ;;  %vm1023_vm6 = vweird.f32 %v1017_v38  ;;  %v1027_v45 = vand.u32 2147483647, %v1017_v38 }
 0x1f7   : > { %v1030_v47 = vor.u32 1.1754944e-38, %v1029_v44  ;;  %vm1028_vm8 = vcmp.eq.f32.partialorder %v1027_v45, 8.507059e+37  ;;  %v1243_v45 = vperm.slane %v1234_v36, 1 }
 0x1f9   : > { %1036 = vrot.lane.b32.xlu0 %v1034_v35, %s2267_s11  ;;  %s2838_s4 = smov %s2837_s5 }
 0x1fa   : > { %s2195_s10 = scalar_lea.hbm %s2838_s4, 12 }
 0x1fb   : > { %v1968_v39 = vpop.eup %1967 }
 0x1fc   : > { %v1019_v40 = vmul.f32 %v1968_v39, %v1017_v38  ;;  %vm1024_vm5 = vweird.f32 %v1968_v39 }
 0x1fd   : > { %vm1025_vm7 = vmor %vm1023_vm6, %vm1024_vm5 }
 0x1fe   : > { %v1020_v41 = vsub.f32 1.0, %v1019_v40 }
 0x200   : > { %v1021_v42 = vmul.f32 %v1968_v39, %v1020_v41 }
 0x202   : > { %v1022_v43 = vadd.f32 %v1968_v39, %v1021_v42 }
 0x204   : > { %v1026_v46 = vsel %vm1025_vm7, %v1968_v39, %v1022_v43  ;;  %v1236_v39 = vperm.slane %v1234_v36, 0 }
 0x205   : > { %v1031_v49 = vsel %vm1028_vm8, %v1030_v47, %v1026_v46  ;;  %v1960_v46 = vld [vmem:[%s2764_s14] ss:$0 sm:$0xff] }
 0x263   : > { %v1042_v48 = vpop.permute.xlu0 %1041 }
 0x264   : > { %v1044_v50 = vmul.f32 %v1042_v48, %v1031_v49 }
 0x266   : > { %1046 = vrot.lane.b32.xlu1 %v1044_v50, %s2267_s11 }
 0x26b   : > { %v1037_v51 = vpop.permute.xlu0 %1036 }
 0x26c   : > { %v1039_v52 = vmul.f32 %v1037_v51, %v1031_v49 }
 0x2d8   : > { %v1047_v53 = vpop.permute.xlu1 %1046 }
 0x2d9   : > { %v2583_v54 = vadd.f32 %v1047_v53, %v1039_v52 }
 0x2db   : > { %1969 = vtanh.f32 %v2583_v54 }
 0x2e1   : > { %v1970_v55 = vpop.eup %1969 }
 0x2e2   : > { %1052 = vrot.lane.b32.xlu1 %v1970_v55, %s2266_s28 }
 0x354   : > { %v1053_v0 = vpop.permute.xlu1 %1052 }
 0x355   : > { %v1055_v1 = vmul.f32 %v1053_v0, %v1031_v49 }
 0x357   : > { %1057 = vrot.lane.b32.xlu2 %v1055_v1, %s2267_s11 }
 0x35f   : > { %1095 = vrot.lane.b32.xlu2 %v2612_v2, %s2268_s27  ;;  %s1824_s27 = sshll.u32 %s2418_s6, 1 }
 0x3b1   : > { %v1058_v6 = vpop.permute.xlu2 %1057 }
 0x3b2   : > { %1061 = vst.msk [vmem:[#allocation2] sm:$0x3] %vm1060_vm9, %v1058_v6  ;;  %1815 = vmatmul.msk.f32.vlgmr.msrb.gmra.mxu3 %vm901_vm3, %v1058_v6  ;;  %1817 = vmatmul.msk.f32.vlgmr.msrb.gmra.mxu2 %vm901_vm3, %v1058_v6 }
 0x3b9   : > { %v1096_v7 = vpop.permute.xlu2 %1095 }
 0x3ba   : > { %v1099_v8 = vsel %vm1098_vm10, 0.0, %v1096_v7  ;;  %v2269_v7 = vmov 0  }
 0x3bb   : > { %v1101_v9 = vsel %vm1100_vm11, %v1099_v8, 0.0 }
 0x3bc   : > { %v1102_v10 = vperm.slane %v1101_v9, 0  ;;  %v1109_v11 = vperm.slane %v1101_v9, 1 }
 0x3be   : > { %1114 = vperm.xlu1 %1939, %v1109_v11   ;;  %1128 = vperm.xlu2 %1940, %v1102_v10  }
 0x3bf   : > { %1107 = vperm.xlu0 %1938, %v1102_v10  }
 0x3c6   : > { %1941 = vset.pattern.permute.xlu1 %v1126_v5  ;;  %1942 = vset.pattern.permute.xlu2 %v1147_v12 }
 0x3c7   : > { %1943 = vset.pattern.permute.xlu0 %v1147_v12 }
 0x3ce   : > { %1134 = vperm.xlu1 %1941, %v1109_v11   ;;  %1149 = vperm.xlu2 %1942, %v1102_v10  }
 0x3cf   : > { %1155 = vperm.xlu0 %1943, %v1109_v11  }
 0x3d6   : > { %1944 = vset.pattern.permute.xlu1 %v1168_v13  ;;  %1945 = vset.pattern.permute.xlu2 %v1168_v13 }
 0x3d7   : > { %1950 = vset.pattern.permute.xlu0 %v2269_v7 }
 0x3de   : > { %1170 = vperm.xlu1 %1944, %v1102_v10   ;;  %1176 = vperm.xlu2 %1945, %v1109_v11  }
 0x3e6   : > { %1946 = vset.pattern.permute.xlu1 %v1189_v14  ;;  %1947 = vset.pattern.permute.xlu2 %v1189_v14 }
 0x3ee   : > { %1191 = vperm.xlu1 %1946, %v1102_v10   ;;  %1197 = vperm.xlu2 %1947, %v1109_v11  }
 0x3f6   : > { %1948 = vset.pattern.permute.xlu2 %v1104_v4  ;;  %1951 = vset.pattern.permute.xlu1 %v2269_v7 }
 0x3fe   : > { %1241 = vperm.xlu2 %1948, %v1236_v39  }
 0x406   : > { %1248 = vperm.xlu2 %1948, %v1243_v45  }
 0x40e   : > { %1949 = vset.pattern.permute.xlu2 %v2269_v7  ;;  %v1378_v7 = vld [vmem:[#allocation14] sm:$0xff] }
 0x418   : > { %v1129_v15 = vpop.permute.xlu2 %1128 }
 0x419   : > { %v1141_v52 = vmul.f32 %v1955_v20, %v1129_v15  ;;  %v2634_v15 = vand.u32 127, %v1103_v3 }
 0x428   : > { %v1150_v16 = vpop.permute.xlu2 %1149 }
 0x429   : > { %v1162_v55 = vmul.f32 %v1956_v24, %v1150_v16 }
 0x430   : > { %v1115_v17 = vpop.permute.xlu1 %1114 }
 0x431   : > { %v1108_v18 = vpop.permute.xlu0 %1107  ;;  %v1121_v25 = vmul.f32 %v1957_v19, %v1115_v17 }
 0x432   : > { %v1120_v49 = vmul.f32 %v1957_v19, %v1108_v18 }
 0x434   : > { %v1143_v53 = vadd.f32 %v1141_v52, %v1120_v49 }
 0x435   : > { %v1090_v21 = vpop.f32.mrf.mxu3 }
 0x436   : > { %v1209_v28 = vrot.slane %v1090_v21, 1  ;;  %v1212_v57 = vperm.slane %v1090_v21, 0  ;;  %v1164_v58 = vadd.f32 %v1162_v55, %v1143_v53 }
 0x438   : > { %v1177_v22 = vpop.permute.xlu2 %1176  ;;  %v1213_v34 = vperm.slane %v1209_v28, 0  ;;  %v1216_v63 = vadd.f32 %v1212_v57, %v1210_v59 }
 0x439   : > { %v1184_v35 = vmul.f32 %v1958_v29, %v1177_v22 }
 0x43a   : > { %v1217_v42 = vadd.f32 %v1213_v34, %v1211_v37 }
 0x440   : > { %v1135_v23 = vpop.permute.xlu1 %1134 }
 0x441   : > { %v1142_v26 = vmul.f32 %v1955_v20, %v1135_v23  ;;  %v1156_v27 = vpop.permute.xlu0 %1155 }
 0x442   : > { %v1163_v31 = vmul.f32 %v1956_v24, %v1156_v27 }
 0x443   : > { %v1144_v30 = vadd.f32 %v1142_v26, %v1121_v25 }
 0x445   : > { %v1165_v32 = vadd.f32 %v1163_v31, %v1144_v30 }
 0x447   : > { %v1186_v40 = vadd.f32 %v1184_v35, %v1165_v32 }
 0x448   : > { %v1198_v38 = vpop.permute.xlu2 %1197 }
 0x449   : > { %v1205_v41 = vmul.f32 %v1959_v33, %v1198_v38 }
 0x44b   : > { %v1207_v43 = vadd.f32 %v1205_v41, %v1186_v40 }
 0x44d   : > { %v1219_v44 = vadd.f32 %v1217_v42, %v1207_v43 }
 0x44f   : > { %1971 = vtanh.f32 %v1219_v44 }
 0x450   : > { %v1171_v50 = vpop.permute.xlu1 %1170 }
 0x451   : > { %v1183_v56 = vmul.f32 %v1958_v29, %v1171_v50 }
 0x453   : > { %v1185_v61 = vadd.f32 %v1183_v56, %v1164_v58 }
 0x455   : > { %v1972_v47 = vpop.eup %1971 }
 0x456   : > { %v1227_v48 = vmul.f32 %v1972_v47, %v1960_v46 }
 0x458   : > { %v1231_v51 = vsel %vm957_vm4, %v1227_v48, 0.0  ;;  %v1242_v8 = vpop.permute.xlu2 %1241 }
 0x459   : > { %1232 = vadd.xlane.f32.xlu1 %v1231_v51 }
 0x460   : > { %v1192_v60 = vpop.permute.xlu1 %1191  ;;  %v1249_v11 = vpop.permute.xlu2 %1248 }
 0x461   : > { %v1204_v62 = vmul.f32 %v1959_v33, %v1192_v60 }
 0x463   : > { %v1206_v0 = vadd.f32 %v1204_v62, %v1185_v61  ;;  %v1381_v61 = vld [vmem:[#allocation14 + $0x18] sm:$0xff] }
 0x464   : > { %v1516_v62 = vld [vmem:[%s2770_s20 + $0x18] sm:$0xff]  ;;  %1396 = vmatpush.msrb.mxu1 %v1381_v61 }
 0x465   : > { %v1218_v1 = vadd.f32 %v1216_v63, %v1206_v0  ;;  %1529 = vmatpush.msra.mxu3 %v1516_v62  ;;  %v1380_v63 = vld [vmem:[#allocation14 + $0x10] sm:$0xff]  ;;  %v1427_v0 = vld [vmem:[#allocation16 + $0x18] sm:$0xff] }
 0x466   : > { %1397 = vmatpush.msrb.mxu1 %v1380_v63  ;;  %1443 = vmatpush.msra.mxu0 %v1427_v0  ;;  %v1512_v0 = vld [vmem:[%s2834_s21 + $0x18] sm:$0xff] }
 0x467   : > { %1973 = vtanh.f32 %v1218_v1  ;;  %v1515_v1 = vld [vmem:[%s2770_s20 + $0x10] sm:$0xff] }
 0x468   : > { %1530 = vmatpush.msra.mxu3 %v1515_v1  ;;  %v1511_v1 = vld [vmem:[%s2834_s21 + $0x10] sm:$0xff] }
 0x46d   : > { %v1974_v4 = vpop.eup %1973 }
 0x46e   : > { %v1226_v5 = vmul.f32 %v1974_v4, %v1960_v46  ;;  %v1379_v4 = vld [vmem:[#allocation14 + $0x8] sm:$0xff] }
 0x46f   : > { %1398 = vmatpush.msrb.mxu1 %v1379_v4  ;;  %v1510_v4 = vld [vmem:[%s2834_s21 + $0x8] sm:$0xff] }
 0x470   : > { %v1228_v6 = vsel %vm957_vm4, %v1226_v5, 0.0  ;;  %v1426_v5 = vld [vmem:[#allocation16 + $0x10] sm:$0xff] }
 0x471   : > { %1229 = vadd.xlane.f32.xlu0 %v1228_v6  ;;  %v1514_v6 = vld [vmem:[%s2770_s20 + $0x8] sm:$0xff]  ;;  %1444 = vmatpush.msra.mxu0 %v1426_v5  ;;  %v1509_v5 = vld [vmem:[%s2834_s21] sm:$0xff] }
 0x472   : > { %1531 = vmatpush.msra.mxu3 %v1514_v6  ;;  %1399 = vmatpush.msrb.mxu1 %v1378_v7 }
 0x474   : > { %1551 = vmatpush.msra.mxu1 %v1512_v0 }
 0x476   : > { %1552 = vmatpush.msra.mxu1 %v1511_v1 }
 0x478   : > { %1553 = vmatpush.msra.mxu1 %v1510_v4 }
 0x47a   : > { %1554 = vmatpush.msra.mxu1 %v1509_v5 }
 0x4cc   : > { %v1233_v12 = vpop.xlane.xlu1 %1232 }
 0x4cd   : > { %v1253_v13 = vadd.f32 %v1249_v11, %v1233_v12  ;;  %v1424_v12 = vld [vmem:[#allocation16] sm:$0xff] }
 0x4e4   : > { %v1230_v9 = vpop.xlane.xlu0 %1229 }
 0x4e5   : > { %v1252_v10 = vadd.f32 %v1242_v8, %v1230_v9  ;;  %v1425_v8 = vld [vmem:[#allocation16 + $0x8] sm:$0xff]  ;;  %v1513_v9 = vld [vmem:[%s2770_s20] sm:$0xff] }
 0x4e6   : > { %1445 = vmatpush.msra.mxu0 %v1425_v8  ;;  %1532 = vmatpush.msra.mxu3 %v1513_v9 }
 0x4e7   : > { %1257 = vperm.xlu2 %1949, %v1252_v10  }
 0x4e8   : > { %1446 = vmatpush.msra.mxu0 %v1424_v12 }
 0x4ef   : > { %1260 = vperm.xlu2 %1949, %v1253_v13  }
 0x541   : > { %v1258_v14 = vpop.permute.xlu2 %1257 }
 0x542   : > { %v1264_v17 = vperm.slane %v1258_v14, %v2634_v15  ;;  %v1477_v14 = vld [vmem:[#allocation5] sm:$0x3] }
 0x549   : > { %v1261_v16 = vpop.permute.xlu2 %1260 }
 0x54a   : > { %v1265_v18 = vperm.slane %v1261_v16, %v2634_v15 }
 0x54c   : > { %v1267_v19 = vsel %vm1266_vm12, %v1265_v18, %v1264_v17 }
 0x54d   : > { %v1270_v20 = vsel %vm1269_vm13, %v1267_v19, -inf }
 0x54e   : > { %1271 = vmax.xlane.f32.xlu2 %v1270_v20  ;;  %v1335_v20 = vld [vmem:[%s2833_s8 + $0x8] sm:$0xff] }
 0x5c1   : > { %v1272_v21 = vpop.xlane.xlu2 %1271 }
 0x5c2   : > { %v1274_v22 = vperm.slane %v1272_v21, 0  ;;  %v1275_v23 = vperm.slane %v1272_v21, 1 }
 0x5c4   : > { %v1278_v24 = vsub.f32 %v1252_v10, %v1274_v22  ;;  %v1279_v25 = vsub.f32 %v1253_v13, %v1275_v23  ;;  %v1334_v10 = vld [vmem:[%s2833_s8] sm:$0xff]  ;;  %s2840_s8 = sand.u32 1, %s2245_s26  }
 0x5c5   : > { %v1373_v13 = vld [vmem:[#allocation4] sm:$0x3] }
 0x5c6   : > { %v1280_v26 = vmul.f32 1.442695, %v1278_v24  ;;  %v1282_v3 = vmul.f32 1.442695, %v1279_v25  ;;  %1818 = vmatmul.msk.f32.vlgmr.msra.gmra.mxu0 %vm901_vm3, %v1373_v13 }
 0x5c8   : > { %1975 = vpow2.f32 %v1280_v26 }
 0x5c9   : > { %1977 = vpow2.f32 %v1282_v3 }
 0x5ce   : > { %v1976_v27 = vpop.eup %1975 }
 0x5cf   : > { %v1978_v28 = vpop.eup %1977  ;;  %1287 = vperm.xlu0 %1950, %v1976_v27  }
 0x5d0   : > { %1290 = vperm.xlu1 %1951, %v1978_v28  }
 0x641   : > { %v1288_v29 = vpop.permute.xlu0 %1287 }
 0x642   : > { %v1291_v30 = vpop.permute.xlu1 %1290  ;;  %v1292_v31 = vperm.slane %v1288_v29, %v2634_v15 }
 0x643   : > { %v1293_v32 = vperm.slane %v1291_v30, %v2634_v15 }
 0x645   : > { %v1294_v33 = vsel %vm1266_vm12, %v1293_v32, %v1292_v31 }
 0x646   : > { %v1296_v34 = vsel %vm1269_vm13, %v1294_v33, 0.0 }
 0x647   : > { %1297 = vadd.xlane.f32.xlu1 %v1296_v34 }
 0x660   : > { %1063 = vrot.lane.b32.xlu1 %v2583_v54, %s2270_s19 }
 0x6ba   : > { %v1298_v35 = vpop.xlane.xlu1 %1297 }
 0x6bb   : > { %v1300_v36 = vperm.slane %v1298_v35, 0  ;;  %v1301_v37 = vperm.slane %v1298_v35, 1 }
 0x6bd   : > { %1979 = vrcp.f32 %v1300_v36  ;;  %v1315_v44 = vand.u32 2147483648, %v1300_v36  ;;  %v1330_v45 = vand.u32 2147483648, %v1301_v37  ;;  %v1313_v47 = vand.u32 2147483647, %v1300_v36 }
 0x6be   : > { %1981 = vrcp.f32 %v1301_v37  ;;  %v1328_v49 = vand.u32 2147483647, %v1301_v37  ;;  %vm1309_vm0 = vweird.f32 %v1300_v36  ;;  %vm1324_vm1 = vweird.f32 %v1301_v37 }
 0x6bf   : > { %v1316_v51 = vor.u32 1.1754944e-38, %v1315_v44  ;;  %v1331_v52 = vor.u32 1.1754944e-38, %v1330_v45  ;;  %vm1314_vm5 = vcmp.eq.f32.partialorder %v1313_v47, 8.507059e+37 }
 0x6c0   : > { %vm1329_vm6 = vcmp.eq.f32.partialorder %v1328_v49, 8.507059e+37 }
 0x6c3   : > { %v1980_v38 = vpop.eup %1979 }
 0x6c4   : > { %v1982_v39 = vpop.eup %1981  ;;  %v1305_v40 = vmul.f32 %v1980_v38, %v1300_v36  ;;  %vm1310_vm14 = vweird.f32 %v1980_v38 }
 0x6c5   : > { %v1320_v41 = vmul.f32 %v1982_v39, %v1301_v37  ;;  %vm1325_vm15 = vweird.f32 %v1982_v39  ;;  %vm1311_vm2 = vmor %vm1309_vm0, %vm1310_vm14 }
 0x6c6   : > { %v1306_v42 = vsub.f32 1.0, %v1305_v40  ;;  %vm1326_vm4 = vmor %vm1324_vm1, %vm1325_vm15  ;;  %v1961_v40 = vld [vmem:[#allocation17] ss:$0 sm:$0xff] }
 0x6c7   : > { %v1321_v43 = vsub.f32 1.0, %v1320_v41 }
 0x6c8   : > { %v1307_v46 = vmul.f32 %v1980_v38, %v1306_v42 }
 0x6c9   : > { %v1322_v48 = vmul.f32 %v1982_v39, %v1321_v43 }
 0x6ca   : > { %v1308_v54 = vadd.f32 %v1980_v38, %v1307_v46 }
 0x6cb   : > { %v1323_v50 = vadd.f32 %v1982_v39, %v1322_v48 }
 0x6cc   : > { %v1312_v53 = vsel %vm1311_vm2, %v1980_v38, %v1308_v54  ;;  %v1448_v38 = vpop.f32.mrf.mxu0 }
 0x6cd   : > { %v1327_v55 = vsel %vm1326_vm4, %v1982_v39, %v1323_v50  ;;  %v1317_v56 = vsel %vm1314_vm5, %v1316_v51, %v1312_v53 }
 0x6ce   : > { %v1332_v57 = vsel %vm1329_vm6, %v1331_v52, %v1327_v55  ;;  %v1318_v58 = vmul.f32 %v1976_v27, %v1317_v56 }
 0x6cf   : > { %v1333_v59 = vmul.f32 %v1978_v28, %v1332_v57 }
 0x6d0   : > { %1338 = vperm.xlu2 %1949, %v1318_v58  }
 0x6d1   : > { %1343 = vperm.xlu0 %1950, %v1333_v59  }
 0x6d2   : > { %v1064_v60 = vpop.permute.xlu1 %1063 }
 0x6d3   : > { %1066 = vst.msk [vmem:[#allocation3] sm:$0x3] %vm1060_vm9, %v1064_v60 }
 0x6d8   : > { %1479 = vrot.lane.b32.xlu2 %v1477_v14, %s2267_s11 }
 0x72a   : > { %v1339_v11 = vpop.permute.xlu2 %1338 }
 0x72b   : > { %v1346_v16 = vmul.f32 %v1339_v11, %v1334_v10  ;;  %v1367_v22 = vperm.slane %v1339_v11, %v2634_v15 }
 0x72d   : > { %v1348_v17 = vsel %vm901_vm3, %v1346_v16, 0.0 }
 0x72e   : > { %v1349_v18 = vrot.slane %v1348_v17, 4 }
 0x730   : > { %v1350_v19 = vadd.f32 %v1349_v18, %v1348_v17 }
 0x732   : > { %v1351_v25 = vrot.slane %v1350_v19, 2  ;;  %v1480_v59 = vpop.permute.xlu2 %1479 }
 0x734   : > { %v1352_v29 = vadd.f32 %v1351_v25, %v1350_v19 }
 0x736   : > { %v1353_v32 = vrot.slane %v1352_v29, 1 }
 0x743   : > { %v1344_v21 = vpop.permute.xlu0 %1343 }
 0x744   : > { %v1347_v23 = vmul.f32 %v1344_v21, %v1335_v20  ;;  %v1368_v24 = vperm.slane %v1344_v21, %v2634_v15  ;;  %v1354_v15 = vadd.f32 %v1353_v32, %v1352_v29 }
 0x746   : > { %v1355_v26 = vsel %vm901_vm3, %v1347_v23, 0.0  ;;  %v1369_v3 = vsel %vm1266_vm12, %v1368_v24, %v1367_v22 }
 0x747   : > { %v1356_v27 = vrot.slane %v1355_v26, 4  ;;  %v1371_v28 = vadd.f32 %v1369_v3, %v2612_v2  ;;  %1590 = vst.msk [vmem:[%s2789_s29] sm:$0x3] %vm1269_vm13, %v1369_v3  ;;  %v1421_v2 = vpop.f32.mrf.mxu2  ;;  %s2835_s29 = sld [smem:[#allocation46_spill]] }
 0x749   : > { %v1357_v30 = vadd.f32 %v1356_v27, %v1355_v26  ;;  %1372 = vst.msk [vmem:[#allocation7] sm:$0x3] %vm1269_vm13, %v1371_v28 }
 0x74b   : > { %v1358_v31 = vrot.slane %v1357_v30, 2 }
 0x74d   : > { %v1359_v33 = vadd.f32 %v1358_v31, %v1357_v30  ;;  %v1962_v10 = vld [vmem:[%s2835_s29] ss:$0 sm:$0xff]  ;;  %s1618_s29 = sshll.u32 %s2839_s16, 4  ;;  %s1619_s29 = int_to_ptr.vmem [resolvable:$true] %s1618_s29 }
 0x74f   : > { %v1360_v34 = vrot.slane %v1359_v33, 1 }
 0x751   : > { %v1361_v35 = vadd.f32 %v1360_v34, %v1359_v33 }
 0x753   : > { %v1364_v36 = vsel %vm1266_vm12, %v1361_v35, %v1354_v15 }
 0x754   : > { %1366 = vst.msk [vmem:[#allocation6] sm:$0x3] %vm1060_vm9, %v1364_v36  ;;  %1816 = vmatmul.msk.f32.vlgmr.msrb.gmra.mxu1 %vm901_vm3, %v1364_v36  ;;  %1820 = vmatmul.msk.f32.vlgmr.msra.gmra.mxu3 %vm901_vm3, %v1364_v36 }
 0x7d1   : > { %v1401_v37 = vpop.f32.mrf.mxu1 }
 0x7d2   : > { %v1422_v39 = vadd.f32 %v1421_v2, %v1401_v37 }
 0x7d4   : > { %v1451_v41 = vadd.f32 %v1448_v38, %v1422_v39 }
 0x7d6   : > { %v1456_v42 = vadd.f32 %v1961_v40, %v1451_v41 }
 0x7d7   : > { %v1534_v11 = vpop.f32.mrf.mxu3 }
 0x7d8   : > { %1983 = vtanh.f32 %v1456_v42  ;;  %v1819_v44 = vmul.f32 -1.442695, %v1456_v42 }
 0x7da   : > { %1985 = vpow2.f32 %v1819_v44 }
 0x7de   : > { %v1984_v43 = vpop.eup %1983 }
 0x7df   : > { %1484 = vrot.lane.b32.xlu0 %v1984_v43, %s2266_s28 }
 0x7e0   : > { %v1986_v45 = vpop.eup %1985 }
 0x7e1   : > { %v1460_v46 = vadd.f32 1.0, %v1986_v45 }
 0x7e3   : > { %1987 = vrcp.f32 %v1460_v46  ;;  %v1472_v51 = vand.u32 2147483648, %v1460_v46  ;;  %vm1466_vm8 = vweird.f32 %v1460_v46  ;;  %v1470_v52 = vand.u32 2147483647, %v1460_v46 }
 0x7e5   : > { %v1473_v55 = vor.u32 1.1754944e-38, %v1472_v51  ;;  %vm1471_vm11 = vcmp.eq.f32.partialorder %v1470_v52, 8.507059e+37 }
 0x7e9   : > { %v1988_v47 = vpop.eup %1987 }
 0x7ea   : > { %v1462_v48 = vmul.f32 %v1988_v47, %v1460_v46  ;;  %vm1467_vm7 = vweird.f32 %v1988_v47 }
 0x7eb   : > { %vm1468_vm10 = vmor %vm1466_vm8, %vm1467_vm7 }
 0x7ec   : > { %v1463_v49 = vsub.f32 1.0, %v1462_v48 }
 0x7ee   : > { %v1464_v54 = vmul.f32 %v1988_v47, %v1463_v49 }
 0x7f0   : > { %v1465_v50 = vadd.f32 %v1988_v47, %v1464_v54 }
 0x7f2   : > { %v1469_v53 = vsel %vm1468_vm10, %v1988_v47, %v1465_v50 }
 0x7f3   : > { %v1474_v56 = vsel %vm1471_vm11, %v1473_v55, %v1469_v53 }
 0x7f4   : > { %v1482_v60 = vmul.f32 %v1480_v59, %v1474_v56 }
 0x851   : > { %v1485_v57 = vpop.permute.xlu0 %1484 }
 0x852   : > { %v1487_v58 = vmul.f32 %v1485_v57, %v1474_v56 }
 0x854   : > { %1489 = vrot.lane.b32.xlu0 %v1487_v58, %s2267_s11 }
 0x8c6   : > { %v1490_v61 = vpop.permute.xlu0 %1489 }
 0x8c7   : > { %v1492_v62 = vadd.f32 %v1490_v61, %v1482_v60 }
 0x8c9   : > { %1989 = vtanh.f32 %v1492_v62 }
 0x8cf   : > { %v1990_v63 = vpop.eup %1989 }
 0x8d0   : > { %1495 = vrot.lane.b32.xlu2 %v1990_v63, %s2266_s28  ;;  %s1616_s28 = scalar_lea.hbm %s2837_s5, %s1824_s27 }
 0x8d1   : > { %s1620_s2 = sshll.u32 %s1616_s28, 4  ;;  %s1621_s2 = int_to_ptr.hbm [resolvable:$true] %s1620_s2 }
 0x8d8   : > { %1505 = vrot.lane.b32.xlu2 %v1492_v62, %s2270_s19  ;;  %s2189_s19 = sshra.s32 %s1621_s2, 4  ;;  %s2190_s19 = int_to_ptr.hbm [resolvable:$true] %s2189_s19 }
 0x8d9   : > { %p2196_p4 = scmp.lt.s32.totalorder %s2190_s19, %s2838_s4 }
 0x92a   : > { %v1496_v6 = vpop.permute.xlu2 %1495 }
 0x92b   : > { %v1498_v7 = vmul.f32 %v1496_v6, %v1474_v56 }
 0x92d   : > { %1500 = vrot.lane.b32.xlu0 %v1498_v7, %s2267_s11  ;;  %s1600_s11 = scalar_lea.sflag [#allocation10], %s2840_s8 }
 0x932   : > { %v1506_v8 = vpop.permute.xlu2 %1505 }
 0x933   : > { %1508 = vst.msk [vmem:[#allocation5] sm:$0x3] %vm1060_vm9, %v1506_v8 }
 0x99f   : > { %v1501_v9 = vpop.permute.xlu0 %1500 }
 0x9a0   : > { %1503 = vst.msk [vmem:[#allocation4] sm:$0x3] %vm1060_vm9, %v1501_v9  ;;  %1821 = vmatmul.msk.f32.vlgmr.msra.gmra.mxu1 %vm901_vm3, %v1501_v9 }
 0xa1d   : > { %v1556_v12 = vpop.f32.mrf.mxu1 }
 0xa1e   : > { %v1557_v13 = vadd.f32 %v1556_v12, %v1534_v11 }
 0xa20   : > { %v1563_v14 = vadd.f32 %v1962_v10, %v1557_v13 }
 0xa22   : > { %1564 = vst.msk [vmem:[%s845_s1] sm:$0x3] %vm1269_vm13, %v1563_v14  ;;  %v1822_v16 = vmul.f32 -1.442695, %v1563_v14  ;;  %s2191_s1 = scalar_lea.hbm %s2190_s19, 2 }
 0xa23   : > { %p2192_p1 = scmp.ne.s32.totalorder %s2190_s19, %s2191_s1  ;;  %p2197_p7 = scmp.lt.s32.totalorder %s2195_s10, %s2191_s1 }
 0xa24   : > { %1991 = vpow2.f32 %v1822_v16 }
 0xa25   : > { %p2193_p2 = pnand %p2192_p1, %p2435_p5  ;;  %p2198_p8 = por %p2197_p7, %p2196_p4 }
 0xa27   : > { %p2194_p3 = pneg %p2193_p2 }
 0xa29   : > { %p2199_p9 = pnand %p2198_p8, %p2194_p3 }
 0xa2a   : > { %v1992_v17 = vpop.eup %1991 }
 0xa2b   : > { %v1568_v18 = vadd.f32 1.0, %v1992_v17 }
 0xa2d   : > { %1993 = vrcp.f32 %v1568_v18 }
 0xa2e   : > { %2202 = shalt.err (!%p2199_p9)
}
 0xa2f   : > { %1851 = dma.vmem_to_hbm [thread:$0]  (%p2435_p5), %s1619_s29, 32, %s1621_s2, %s1600_s11   ;;  %v1580_v22 = vand.u32 2147483648, %v1568_v18  ;;  %v1578_v24 = vand.u32 2147483647, %v1568_v18  ;;  %vm1574_vm9 = vweird.f32 %v1568_v18  ;;  %vm1588_vm14 = vcmask 1024  }
 0xa30   : > { %s2271_s9 = smov 120   ;;  %s2841_s2 = scalar_lea.vmem %s2773_s23, %s2514_s3 }
 0xa31   : > { %v1581_v26 = vor.u32 1.1754944e-38, %v1580_v22  ;;  %vm1579_vm13 = vcmp.eq.f32.partialorder %v1578_v24, 8.507059e+37 }
 0xa33   : > { %v1994_v19 = vpop.eup %1993 }
 0xa34   : > { %v1570_v20 = vmul.f32 %v1994_v19, %v1568_v18  ;;  %vm1575_vm3 = vweird.f32 %v1994_v19 }
 0xa35   : > { %vm1576_vm12 = vmor %vm1574_vm9, %vm1575_vm3 }
 0xa36   : > { %v1571_v21 = vsub.f32 1.0, %v1570_v20 }
 0xa38   : > { %v1572_v23 = vmul.f32 %v1994_v19, %v1571_v21 }
 0xa3a   : > { %v1573_v25 = vadd.f32 %v1994_v19, %v1572_v23 }
 0xa3c   : > { %v1577_v3 = vsel %vm1576_vm12, %v1994_v19, %v1573_v25 }
 0xa3d   : > { %v1582_v27 = vsel %vm1579_vm13, %v1581_v26, %v1577_v3 }
 0xa3e   : > { %1585 = vrot.lane.b32.xlu0 %v1582_v27, %s2271_s9 }
 0xab0   : > { %v1586_v28 = vpop.permute.xlu0 %1585 }
 0xab1   : > { %1589 = vst.msk [vmem:[%s2841_s2] sm:$0x3] %vm1588_vm14, %v1586_v28 }
 0xab2 PF: > { %s2842_s8 = sld [smem:[#allocation27_spill]] }
 0xab3   : > { %s2843_s0 = sld [smem:[#allocation25_spill]] }
 0xab8   : > { %p1888_p5 = scmp.ge.s32.totalorder %s2842_s8, 2 }
 0xab9   : > { %s1646_s5 = sand.u32 1, %s2843_s0  }
 0xaba   : > { %p1873_p10 = pnand %p1888_p5, %p2439_p6  ;;  %s1647_s28 = scalar_lea.sflag [#allocation10], %s1646_s5 }
 0xabc   : > { %p1874_p11 = pneg %p1873_p10 }
 0xabe   : > { %2236 = dma.done.wait (%p1874_p11), %s1647_s28, 32  }
 0xabf   : > { %2238 = vsyncadd (%p1874_p11), %s1647_s28, 4294967264  ;;  %s2845_s28 = sld [smem:[#allocation28_spill]]  ;;  %s2848_s5 = smov %s2245_s26 }
 0xac0   : > { %s2846_s16 = sld [smem:[#allocation26_spill]] }
 0xac1   : > { %s2847_s27 = sld [smem:[#allocation29_spill]] }
 0xac5   : > { %p39_p12 = scmp.ge.s32.totalorder %s2845_s28, 8  }
 0xac6   : > { %s2849_s26 = smov %s2846_s16 }
 0xac7   :  { %41 = sbr.rel (!%p39_p12) target bundleno = 24 (0x18), region = 200 }
 0xacc   :  { %1653 = vsyncpa [#allocation9], 1 }
 0xacd   :  { %1655 = vsyncpa [#allocation9 + $0x1], 1 }
 0xace   :  { %1656 = vsyncpa [#allocation12], 1 }
 0xacf   :  { %1657 = vsyncpa [#allocation15], 1 }
 0xad0   :  { %1658 = vsyncpa [#allocation18], 1 }
 0xad1   :  { %1659 = vsyncpa [#allocation10], 1 }
 0xad2   :  { %1661 = vsyncpa [#allocation10 + $0x1], 1 }

</bundles_post_ra>
